<compile_context>
chip_gen: v7x
topology: tpu7x:2x2x1
jax: 0.10.0
libtpu: 0.0.40
codegen_flags: <defaults>
</compile_context>

<pallas_src>
import math
import functools
import numpy as np

import jax
import jax.numpy as jnp
from jax.experimental import pallas as pl
from jax.experimental.pallas import tpu as pltpu


# ------------------------ constant builders (host-side numpy) ------------------------

def _block_bias_np(B, Lq, Lk, H, causal):
    """Additive attention bias for the (head, batch)-row-stacked score matrix.

    Rows ordered (head, batch, query pos), cols (head, batch, key pos):
    0 where the (head, batch) blocks match (and causality holds), -1e30 elsewhere."""
    rows, cols = H * B * Lq, H * B * Lk
    ri = np.arange(rows)[:, None]
    ci = np.arange(cols)[None, :]
    keep = (ri // Lq) == (ci // Lk)
    if causal:
        keep = keep & ((ri % Lq) >= (ci % Lk))
    return np.where(keep, 0.0, -1e30).astype(np.float32)


def _shift_perm_np(B, L, shift):
    """Row permutation: (P @ x)[b*L + t] = x[b*L + (t - shift) mod L] (per-batch circular roll)."""
    n = B * L
    P = np.zeros((n, n), np.float32)
    for b in range(B):
        for t in range(L):
            P[b * L + t, b * L + (t - shift) % L] = 1.0
    return P


def _pool_select_np(B, L):
    """MaxPool1d(kernel=3, stride=2, padding=1) as three row-selection matrices
    (window indices clamped into range -> identical to -inf padding for max).
    Returned stacked along rows: (3 * B*L_out, B*L)."""
    L_out = (L - 1) // 2 + 1
    mats = []
    for off in (-1, 0, 1):
        S = np.zeros((B * L_out, B * L), np.float32)
        for b in range(B):
            for i in range(L_out):
                src = min(max(2 * i + off, 0), L - 1)
                S[b * L_out + i, b * L + src] = 1.0
        mats.append(S)
    return np.concatenate(mats, axis=0)


def _mix_select_np(B, L, H):
    """PyTorch Informer mix=True scramble as H stacked row-selection matrices.
    ctx rows are ordered (head, batch, position); output column block j is
    S[j*B*L:(j+1)*B*L, :] @ ctx.  Reproduced faithfully - do not "fix"."""
    n = B * L
    S = np.zeros((H * n, H * n), np.float32)
    for j in range(H):
        for b in range(B):
            for l in range(L):
                r = l * H + j
                h, lp = r // L, r % L
                S[j * n + b * L + l, h * n + b * L + lp] = 1.0
    return S


# ------------------------------- fused forward kernel -------------------------------

def _make_informer_kernel(*, B, H, Dh, enc_lens, Ld, e_layers, d_layers):
    dm = H * Dh

    def layernorm(x, g, b, eps=1e-5):
        mu = jnp.mean(x, axis=-1, keepdims=True)
        xc = x - mu
        var = jnp.mean(xc * xc, axis=-1, keepdims=True)
        return xc * jax.lax.rsqrt(var + eps) * g + b

    def gelu(x):
        # torch default exact-erf GELU; erf via Abramowitz-Stegun 7.1.26.
        z = x * (1.0 / math.sqrt(2.0))
        a = jnp.abs(z)
        t = 1.0 / (1.0 + 0.3275911 * a)
        poly = t * (0.254829592 + t * (-0.284496736 + t * (1.421413741
               + t * (-1.453152027 + t * 1.061405429))))
        erf_a = 1.0 - poly * jnp.exp(-a * a)
        erf = jnp.where(z >= 0.0, erf_a, -erf_a)
        return 0.5 * x * (1.0 + erf)

    def mm(a, b):
        return jnp.dot(a, b, preferred_element_type=jnp.float32)

    def kernel(*refs):
        dec_out_ref, enc_out_ref = refs[-2], refs[-1]
        it = iter(refs[:-2])

        def nxt():
            return next(it)[...]

        def stack_heads(x):                    # (B*L, H*Dh) -> (H*B*L, Dh), head-major rows
            return jnp.concatenate([x[:, h * Dh:(h + 1) * Dh] for h in range(H)], axis=0)

        def unstack_heads(c, L):               # (H*B*L, Dh) -> (B*L, H*Dh)  (mix=False merge)
            return jnp.concatenate([c[h * B * L:(h + 1) * B * L, :] for h in range(H)], axis=1)

        def attention(q2, k2, v2, bias):
            """Scaled-dot-product attention over head/batch row-stacked layout.
            bias encodes the (head, batch) block structure (and causality)."""
            qs, ks, vs = stack_heads(q2), stack_heads(k2), stack_heads(v2)
            s = jax.lax.dot_general(qs, ks, (((1,), (1,)), ((), ())),
                                    preferred_element_type=jnp.float32) + bias
            m = jnp.max(s, axis=-1, keepdims=True)
            e = jnp.exp(s - m)
            p = e / jnp.sum(e, axis=-1, keepdims=True)
            return mm(p, vs)                   # (H*B*Lq, Dh)

        # ---------------- embeddings (3-tap circular conv as one stacked matmul) ----------------
        x3 = nxt(); pe = nxt(); wemb = nxt()
        x = mm(x3, wemb) + pe                  # encoder embedding  (B*L0, dm)
        xd3 = nxt(); ped = nxt(); wembd = nxt()
        y = mm(xd3, wembd) + ped               # decoder embedding  (B*Ld, dm)

        # ---------------- encoder stack (attn + LN + FFN + LN, optional distil conv) ----------------
        for li in range(e_layers):
            L = enc_lens[li]
            bias = nxt()
            wqkv = nxt(); bqkv = nxt(); wo = nxt(); bo = nxt()
            ng1 = nxt(); nb1 = nxt()
            w1 = nxt(); b1 = nxt(); w2 = nxt(); b2 = nxt()
            ng2 = nxt(); nb2 = nxt()

            qkv = mm(x, wqkv) + bqkv           # 1/sqrt(Dh) already folded into Q columns
            ctx = attention(qkv[:, :dm], qkv[:, dm:2 * dm], qkv[:, 2 * dm:], bias)
            attn_out = mm(unstack_heads(ctx, L), wo) + bo
            xn = layernorm(x + attn_out, ng1, nb1)
            ff = mm(gelu(mm(xn, w1) + b1), w2) + b2
            x = layernorm(xn + ff, ng2, nb2)

            if li < e_layers - 1:              # distil ConvLayer
                pprev = nxt(); pnext = nxt(); wconv = nxt(); bconv = nxt(); spool = nxt()
                cat = jnp.concatenate([mm(pprev, x), x, mm(pnext, x)], axis=1)  # (B*L, 3*dm)
                c = mm(cat, wconv) + bconv     # conv + BatchNorm(eval) scale folded in
                c = jnp.where(c > 0.0, c, jnp.exp(jnp.minimum(c, 0.0)) - 1.0)   # ELU
                L_out = (L - 1) // 2 + 1
                n = B * L_out
                x = jnp.maximum(jnp.maximum(mm(spool[0:n, :], c),
                                            mm(spool[n:2 * n, :], c)),
                                mm(spool[2 * n:3 * n, :], c))     # MaxPool1d(3, 2, 1)

        # ---------------- encoder final LayerNorm (fused) ----------------
        eng = nxt(); enb = nxt()
        enc_out = layernorm(x, eng, enb)       # (B*Ls, dm)
        enc_out_ref[...] = enc_out

        # ---------------- decoder stack ----------------
        sa_bias = nxt(); s_mix = nxt(); ca_bias = nxt()
        Ls = enc_lens[-1]
        nmix = B * Ld
        for _ in range(d_layers):
            sa_wqkv = nxt(); sa_bqkv = nxt(); sa_wo = nxt(); sa_bo = nxt()
            ng1 = nxt(); nb1 = nxt()
            ca_wq = nxt(); ca_bq = nxt(); ca_wkv = nxt(); ca_bkv = nxt()
            ca_wo = nxt(); ca_bo = nxt()
            ng2 = nxt(); nb2 = nxt()
            w1 = nxt(); b1 = nxt(); w2 = nxt(); b2 = nxt()
            ng3 = nxt(); nb3 = nxt()

            # masked (causal) self-attention with the PyTorch mix=True scramble (as matmuls)
            qkv = mm(y, sa_wqkv) + sa_bqkv
            ctx = attention(qkv[:, :dm], qkv[:, dm:2 * dm], qkv[:, 2 * dm:], sa_bias)
            mixed = jnp.concatenate(
                [mm(s_mix[j * nmix:(j + 1) * nmix, :], ctx) for j in range(H)], axis=1)
            sa = mm(mixed, sa_wo) + sa_bo
            y = layernorm(y + sa, ng1, nb1)

            # full cross-attention (mix=False), fused K/V projection of encoder output
            q2 = mm(y, ca_wq) + ca_bq
            kv = mm(enc_out, ca_wkv) + ca_bkv
            ctx = attention(q2, kv[:, :dm], kv[:, dm:], ca_bias)
            ca = mm(unstack_heads(ctx, Ld), ca_wo) + ca_bo
            y = layernorm(y + ca, ng2, nb2)

            ff = mm(gelu(mm(y, w1) + b1), w2) + b2
            y = layernorm(y + ff, ng3, nb3)

        # ---------------- decoder head: LayerNorm + projection ----------------
        dg = nxt(); db = nxt(); pw = nxt(); pb = nxt()
        dec_out_ref[...] = mm(layernorm(y, dg, db), pw) + pb
        _ = Ls  # (kept for clarity; cross length fixed by enc_lens[-1])

    return kernel


# ------------------------------- host-side wrapper -------------------------------

def _sinusoid_table(n, d):
    pos = np.arange(n, dtype=np.float32)[:, None]
    div = np.exp(np.arange(0, d, 2, dtype=np.float32) * -(math.log(10000.0) / d))
    tab = np.zeros((n, d), dtype=np.float32)
    tab[:, 0::2] = np.sin(pos * div)
    tab[:, 1::2] = np.cos(pos * div)
    return jnp.asarray(tab)


def _prep_embed(x, x_mark, tables, d_model):
    """Circular-shifted input triple (for the k=3 conv) + positional/temporal tables (XLA, tiny)."""
    B, L, C = x.shape
    xf = x.astype(jnp.float32)
    x3 = jnp.concatenate([jnp.roll(xf, 1, axis=1), xf, jnp.roll(xf, -1, axis=1)], axis=-1)
    pos = tables["pos"][:L][None, :, :]
    temporal = (tables["hour"][x_mark[:, :, 3]]
                + tables["weekday"][x_mark[:, :, 2]]
                + tables["day"][x_mark[:, :, 1]]
                + tables["month"][x_mark[:, :, 0]])
    pe = (pos + temporal).astype(jnp.float32).reshape(B * L, d_model)
    return x3.reshape(B * L, 3 * C), pe


def _scale_q_cols(w, b, dm, scale):
    """Fold the 1/sqrt(Dh) attention scale into the Q columns of a fused QKV projection."""
    return (jnp.concatenate([w[:, :dm] * scale, w[:, dm:]], axis=1),
            jnp.concatenate([b[:, :dm] * scale, b[:, dm:]], axis=1))


def informer_forward(params, tables, x_enc, x_mark_enc, x_dec, x_mark_dec,
                     *, n_heads, pred_len):
    B, L0, _ = x_enc.shape
    _, Ld, _ = x_dec.shape
    dm = params["proj_w"].shape[0]
    c_out = params["proj_w"].shape[1]
    H = n_heads
    Dh = dm // H
    enc_p, dec_p = params["encoder"], params["decoder"]
    e_layers = len(enc_p["attn_layers"])
    d_layers = len(dec_p["layers"])
    d_ff = enc_p["attn_layers"][0]["w1"].shape[1]

    enc_lens = [L0]
    for _ in range(e_layers - 1):
        enc_lens.append((enc_lens[-1] - 1) // 2 + 1)
    Ls = enc_lens[-1]

    scale = 1.0 / math.sqrt(Dh)
    bn_scale = 1.0 / math.sqrt(1.0 + 1e-5)       # BatchNorm1d eval, fresh running stats

    x3_enc, pe_enc = _prep_embed(x_enc, x_mark_enc, tables, dm)
    x3_dec, pe_dec = _prep_embed(x_dec, x_mark_dec, tables, dm)

    inputs = []
    ee, de = params["enc_emb"], params["dec_emb"]
    inputs += [x3_enc, pe_enc, jnp.concatenate([ee["w0"], ee["w1"], ee["w2"]], axis=0)]
    inputs += [x3_dec, pe_dec, jnp.concatenate([de["w0"], de["w1"], de["w2"]], axis=0)]

    for li in range(e_layers):
        L = enc_lens[li]
        al = enc_p["attn_layers"][li]
        inputs.append(jnp.asarray(_block_bias_np(B, L, L, H, causal=False)))
        wqkv, bqkv = _scale_q_cols(al["wqkv"], al["bqkv"], dm, scale)
        inputs += [wqkv, bqkv, al["wo"], al["bo"], al["ng1"], al["nb1"],
                   al["w1"], al["b1"], al["w2"], al["b2"], al["ng2"], al["nb2"]]
        if li < e_layers - 1:
            cl = enc_p["conv_layers"][li]
            inputs += [jnp.asarray(_shift_perm_np(B, L, +1)),
                       jnp.asarray(_shift_perm_np(B, L, -1)),
                       jnp.concatenate([cl["w0"], cl["w1"], cl["w2"]], axis=0) * bn_scale,
                       cl["b"] * bn_scale,
                       jnp.asarray(_pool_select_np(B, L))]

    inputs += [enc_p["norm_g"], enc_p["norm_b"]]

    inputs += [jnp.asarray(_block_bias_np(B, Ld, Ld, H, causal=True)),
               jnp.asarray(_mix_select_np(B, Ld, H)),
               jnp.asarray(_block_bias_np(B, Ld, Ls, H, causal=False))]

    for lp in dec_p["layers"]:
        sa, ca = lp["sa"], lp["ca"]
        sa_wqkv, sa_bqkv = _scale_q_cols(sa["wqkv"], sa["bqkv"], dm, scale)
        inputs += [sa_wqkv, sa_bqkv, sa["wo"], sa["bo"], lp["ng1"], lp["nb1"],
                   ca["wq"] * scale, ca["bq"] * scale, ca["wkv"], ca["bkv"],
                   ca["wo"], ca["bo"], lp["ng2"], lp["nb2"],
                   lp["w1"], lp["b1"], lp["w2"], lp["b2"], lp["ng3"], lp["nb3"]]

    inputs += [dec_p["norm_g"], dec_p["norm_b"], params["proj_w"], params["proj_b"]]

    kernel = _make_informer_kernel(B=B, H=H, Dh=Dh, enc_lens=tuple(enc_lens),
                                   Ld=Ld, e_layers=e_layers, d_layers=d_layers)

    out_shapes = (jax.ShapeDtypeStruct((B * Ld, c_out), jnp.float32),   # projection
                  jax.ShapeDtypeStruct((B * Ls, dm), jnp.float32))      # enc_out
    vmem = pl.BlockSpec(memory_space=pltpu.MemorySpace.VMEM)

    bytes_accessed = int(sum(int(np.prod(v.shape)) for v in inputs) * 4
                         + (B * Ld * c_out + B * Ls * dm) * 4)
    flops = int(2 * B * (sum(enc_lens) + Ld * (1 + d_layers)) * dm * (4 * dm + 2 * d_ff)
                + 4 * sum((H * B * l) ** 2 * Dh for l in enc_lens)
                + 4 * d_layers * ((H * B * Ld) ** 2 + (H * B * Ld) * (H * B * Ls)) * Dh)
    transcendentals = int(B * (sum(enc_lens) + Ld * d_layers) * d_ff
                          + sum((H * B * l) ** 2 for l in enc_lens)
                          + d_layers * ((H * B * Ld) ** 2 + (H * B * Ld) * (H * B * Ls)))

    dec_flat, enc_flat = pl.pallas_call(
        kernel,
        out_shape=out_shapes,
        in_specs=[vmem] * len(inputs),
        out_specs=(vmem, vmem),
        cost_estimate=pl.CostEstimate(flops=flops, transcendentals=transcendentals,
                                      bytes_accessed=bytes_accessed),
    )(*inputs)

    dec_out = dec_flat.reshape(B, Ld, c_out)[:, -pred_len:, :]
    enc_out = enc_flat.reshape(B, Ls, dm)
    enc_out_aug = None                     # contrastive_loss == 0.0 -> branch disabled
    return dec_out, enc_out, enc_out_aug


# ------------------------------- parameter init -------------------------------

def init_params(key, enc_in, dec_in, c_out, d_model, n_heads, d_ff,
                e_layers, d_layers):
    keys = iter(jax.random.split(key, 256))

    def nrm(shape, scale=0.05):
        return scale * jax.random.normal(next(keys), shape, jnp.float32)

    def zeros(n):
        return jnp.zeros((1, n), jnp.float32)

    def ones(n):
        return jnp.ones((1, n), jnp.float32)

    def self_attn():
        return dict(wqkv=nrm((d_model, 3 * d_model)), bqkv=zeros(3 * d_model),
                    wo=nrm((d_model, d_model)), bo=zeros(d_model))

    def cross_attn():
        return dict(wq=nrm((d_model, d_model)), bq=zeros(d_model),
                    wkv=nrm((d_model, 2 * d_model)), bkv=zeros(2 * d_model),
                    wo=nrm((d_model, d_model)), bo=zeros(d_model))

    def ffn():
        return dict(w1=nrm((d_model, d_ff)), b1=zeros(d_ff),
                    w2=nrm((d_ff, d_model)), b2=zeros(d_model))

    def enc_layer():
        return dict(**self_attn(), **ffn(),
                    ng1=ones(d_model), nb1=zeros(d_model),
                    ng2=ones(d_model), nb2=zeros(d_model))

    def dec_layer():
        return dict(sa=self_attn(), ca=cross_attn(), **ffn(),
                    ng1=ones(d_model), nb1=zeros(d_model),
                    ng2=ones(d_model), nb2=zeros(d_model),
                    ng3=ones(d_model), nb3=zeros(d_model))

    def token_emb(c_in):          # three k=3 conv taps: w0*x[t-1] + w1*x[t] + w2*x[t+1]
        return dict(w0=nrm((c_in, d_model)), w1=nrm((c_in, d_model)),
                    w2=nrm((c_in, d_model)))

    return dict(
        enc_emb=token_emb(enc_in),
        dec_emb=token_emb(dec_in),
        encoder=dict(
            attn_layers=[enc_layer() for _ in range(e_layers)],
            conv_layers=[dict(w0=nrm((d_model, d_model)), w1=nrm((d_model, d_model)),
                              w2=nrm((d_model, d_model)), b=zeros(d_model))
                         for _ in range(e_layers - 1)],
            norm_g=ones(d_model), norm_b=zeros(d_model)),
        decoder=dict(
            layers=[dec_layer() for _ in range(d_layers)],
            norm_g=ones(d_model), norm_b=zeros(d_model)),
        proj_w=nrm((d_model, c_out)), proj_b=zeros(c_out))


# ------------------------------------- main -------------------------------------

if __name__ == "__main__":
    enc_in = dec_in = c_out = 4
    seq_len, label_len, pred_len = 8, 4, 4          # decoder length = 8
    d_model, n_heads, d_ff = 32, 4, 32
    e_layers, d_layers = 2, 1
    B = 2

    key = jax.random.PRNGKey(0)
    kp, k1, k2, k3, k4 = jax.random.split(key, 5)
    params = init_params(kp, enc_in, dec_in, c_out, d_model, n_heads, d_ff,
                         e_layers, d_layers)
    tables = dict(pos=_sinusoid_table(512, d_model),
                  month=_sinusoid_table(13, d_model),
                  day=_sinusoid_table(32, d_model),
                  weekday=_sinusoid_table(7, d_model),
                  hour=_sinusoid_table(24, d_model))

    x_enc = jax.random.normal(k1, (B, seq_len, enc_in), jnp.float32)
    x_dec = jax.random.normal(k2, (B, label_len + pred_len, dec_in), jnp.float32)

    def make_mark(k, L):
        km, kd, kw, kh = jax.random.split(k, 4)
        return jnp.stack([jax.random.randint(km, (B, L), 0, 13),
                          jax.random.randint(kd, (B, L), 0, 32),
                          jax.random.randint(kw, (B, L), 0, 7),
                          jax.random.randint(kh, (B, L), 0, 24)],
                         axis=-1).astype(jnp.int32)

    x_mark_enc = make_mark(k3, seq_len)
    x_mark_dec = make_mark(k4, label_len + pred_len)

    fwd = jax.jit(functools.partial(informer_forward, n_heads=n_heads,
                                    pred_len=pred_len))
    dec_pred, enc_out, enc_out_aug = fwd(params, tables, x_enc, x_mark_enc,
                                         x_dec, x_mark_dec)
    jax.block_until_ready((dec_pred, enc_out))

    assert dec_pred.shape == (B, pred_len, c_out)
    assert enc_out.shape[0] == B and enc_out.shape[-1] == d_model
    assert enc_out_aug is None
    assert bool(jnp.all(jnp.isfinite(dec_pred)))
    assert bool(jnp.all(jnp.isfinite(enc_out)))
    print("KERNEL_OK")
</pallas_src>

<mosaic_0001>
module attributes {stable_mosaic.version = 11 : i64} {
  func.func @kernel(%arg0: memref<16x12xf32, #tpu.memory_space<vmem>>, %arg1: memref<16x32xf32, #tpu.memory_space<vmem>>, %arg2: memref<12x32xf32, #tpu.memory_space<vmem>>, %arg3: memref<16x12xf32, #tpu.memory_space<vmem>>, %arg4: memref<16x32xf32, #tpu.memory_space<vmem>>, %arg5: memref<12x32xf32, #tpu.memory_space<vmem>>, %arg6: memref<64x64xf32, #tpu.memory_space<vmem>>, %arg7: memref<32x96xf32, #tpu.memory_space<vmem>>, %arg8: memref<1x96xf32, #tpu.memory_space<vmem>>, %arg9: memref<32x32xf32, #tpu.memory_space<vmem>>, %arg10: memref<1x32xf32, #tpu.memory_space<vmem>>, %arg11: memref<1x32xf32, #tpu.memory_space<vmem>>, %arg12: memref<1x32xf32, #tpu.memory_space<vmem>>, %arg13: memref<32x32xf32, #tpu.memory_space<vmem>>, %arg14: memref<1x32xf32, #tpu.memory_space<vmem>>, %arg15: memref<32x32xf32, #tpu.memory_space<vmem>>, %arg16: memref<1x32xf32, #tpu.memory_space<vmem>>, %arg17: memref<1x32xf32, #tpu.memory_space<vmem>>, %arg18: memref<1x32xf32, #tpu.memory_space<vmem>>, %arg19: memref<16x16xf32, #tpu.memory_space<vmem>>, %arg20: memref<16x16xf32, #tpu.memory_space<vmem>>, %arg21: memref<96x32xf32, #tpu.memory_space<vmem>>, %arg22: memref<1x32xf32, #tpu.memory_space<vmem>>, %arg23: memref<24x16xf32, #tpu.memory_space<vmem>>, %arg24: memref<32x32xf32, #tpu.memory_space<vmem>>, %arg25: memref<32x96xf32, #tpu.memory_space<vmem>>, %arg26: memref<1x96xf32, #tpu.memory_space<vmem>>, %arg27: memref<32x32xf32, #tpu.memory_space<vmem>>, %arg28: memref<1x32xf32, #tpu.memory_space<vmem>>, %arg29: memref<1x32xf32, #tpu.memory_space<vmem>>, %arg30: memref<1x32xf32, #tpu.memory_space<vmem>>, %arg31: memref<32x32xf32, #tpu.memory_space<vmem>>, %arg32: memref<1x32xf32, #tpu.memory_space<vmem>>, %arg33: memref<32x32xf32, #tpu.memory_space<vmem>>, %arg34: memref<1x32xf32, #tpu.memory_space<vmem>>, %arg35: memref<1x32xf32, #tpu.memory_space<vmem>>, %arg36: memref<1x32xf32, #tpu.memory_space<vmem>>, %arg37: memref<1x32xf32, #tpu.memory_space<vmem>>, %arg38: memref<1x32xf32, #tpu.memory_space<vmem>>, %arg39: memref<64x64xf32, #tpu.memory_space<vmem>>, %arg40: memref<64x64xf32, #tpu.memory_space<vmem>>, %arg41: memref<64x32xf32, #tpu.memory_space<vmem>>, %arg42: memref<32x96xf32, #tpu.memory_space<vmem>>, %arg43: memref<1x96xf32, #tpu.memory_space<vmem>>, %arg44: memref<32x32xf32, #tpu.memory_space<vmem>>, %arg45: memref<1x32xf32, #tpu.memory_space<vmem>>, %arg46: memref<1x32xf32, #tpu.memory_space<vmem>>, %arg47: memref<1x32xf32, #tpu.memory_space<vmem>>, %arg48: memref<32x32xf32, #tpu.memory_space<vmem>>, %arg49: memref<1x32xf32, #tpu.memory_space<vmem>>, %arg50: memref<32x64xf32, #tpu.memory_space<vmem>>, %arg51: memref<1x64xf32, #tpu.memory_space<vmem>>, %arg52: memref<32x32xf32, #tpu.memory_space<vmem>>, %arg53: memref<1x32xf32, #tpu.memory_space<vmem>>, %arg54: memref<1x32xf32, #tpu.memory_space<vmem>>, %arg55: memref<1x32xf32, #tpu.memory_space<vmem>>, %arg56: memref<32x32xf32, #tpu.memory_space<vmem>>, %arg57: memref<1x32xf32, #tpu.memory_space<vmem>>, %arg58: memref<32x32xf32, #tpu.memory_space<vmem>>, %arg59: memref<1x32xf32, #tpu.memory_space<vmem>>, %arg60: memref<1x32xf32, #tpu.memory_space<vmem>>, %arg61: memref<1x32xf32, #tpu.memory_space<vmem>>, %arg62: memref<1x32xf32, #tpu.memory_space<vmem>>, %arg63: memref<1x32xf32, #tpu.memory_space<vmem>>, %arg64: memref<32x4xf32, #tpu.memory_space<vmem>>, %arg65: memref<1x4xf32, #tpu.memory_space<vmem>>, %arg66: memref<16x4xf32, #tpu.memory_space<vmem>>, %arg67: memref<8x32xf32, #tpu.memory_space<vmem>>) attributes {dimension_semantics = [], scalar_prefetch = 0 : i64, scratch_operands = 0 : i64, tpu.core_type = #tpu.core_type<tc>} {
    %c0 = arith.constant 0 : index
    %c0_0 = arith.constant 0 : index
    %0 = vector.load %arg0[%c0, %c0_0] : memref<16x12xf32, #tpu.memory_space<vmem>>, vector<16x12xf32>
    %c0_1 = arith.constant 0 : index
    %c0_2 = arith.constant 0 : index
    %1 = vector.load %arg1[%c0_1, %c0_2] : memref<16x32xf32, #tpu.memory_space<vmem>>, vector<16x32xf32>
    %c0_3 = arith.constant 0 : index
    %c0_4 = arith.constant 0 : index
    %2 = vector.load %arg2[%c0_3, %c0_4] : memref<12x32xf32, #tpu.memory_space<vmem>>, vector<12x32xf32>
    %cst = arith.constant dense<0.000000e+00> : vector<16x32xf32>
    %3 = tpu.matmul %0, %2, %cst {dimension_numbers = #tpu.dot_dimension_numbers<[1], [0], [0], [1], [0, 0, 1, 1], [], []>} : vector<16x12xf32>, vector<12x32xf32>, vector<16x32xf32> -> vector<16x32xf32>
    %4 = arith.addf %3, %1 : vector<16x32xf32>
    %c0_5 = arith.constant 0 : index
    %c0_6 = arith.constant 0 : index
    %5 = vector.load %arg3[%c0_5, %c0_6] : memref<16x12xf32, #tpu.memory_space<vmem>>, vector<16x12xf32>
    %c0_7 = arith.constant 0 : index
    %c0_8 = arith.constant 0 : index
    %6 = vector.load %arg4[%c0_7, %c0_8] : memref<16x32xf32, #tpu.memory_space<vmem>>, vector<16x32xf32>
    %c0_9 = arith.constant 0 : index
    %c0_10 = arith.constant 0 : index
    %7 = vector.load %arg5[%c0_9, %c0_10] : memref<12x32xf32, #tpu.memory_space<vmem>>, vector<12x32xf32>
    %cst_11 = arith.constant dense<0.000000e+00> : vector<16x32xf32>
    %8 = tpu.matmul %5, %7, %cst_11 {dimension_numbers = #tpu.dot_dimension_numbers<[1], [0], [0], [1], [0, 0, 1, 1], [], []>} : vector<16x12xf32>, vector<12x32xf32>, vector<16x32xf32> -> vector<16x32xf32>
    %9 = arith.addf %8, %6 : vector<16x32xf32>
    %c0_12 = arith.constant 0 : index
    %c0_13 = arith.constant 0 : index
    %10 = vector.load %arg6[%c0_12, %c0_13] : memref<64x64xf32, #tpu.memory_space<vmem>>, vector<64x64xf32>
    %c0_14 = arith.constant 0 : index
    %c0_15 = arith.constant 0 : index
    %11 = vector.load %arg7[%c0_14, %c0_15] : memref<32x96xf32, #tpu.memory_space<vmem>>, vector<32x96xf32>
    %c0_16 = arith.constant 0 : index
    %c0_17 = arith.constant 0 : index
    %12 = vector.load %arg8[%c0_16, %c0_17] : memref<1x96xf32, #tpu.memory_space<vmem>>, vector<1x96xf32>
    %c0_18 = arith.constant 0 : index
    %c0_19 = arith.constant 0 : index
    %13 = vector.load %arg9[%c0_18, %c0_19] : memref<32x32xf32, #tpu.memory_space<vmem>>, vector<32x32xf32>
    %c0_20 = arith.constant 0 : index
    %c0_21 = arith.constant 0 : index
    %14 = vector.load %arg10[%c0_20, %c0_21] : memref<1x32xf32, #tpu.memory_space<vmem>>, vector<1x32xf32>
    %c0_22 = arith.constant 0 : index
    %c0_23 = arith.constant 0 : index
    %15 = vector.load %arg11[%c0_22, %c0_23] : memref<1x32xf32, #tpu.memory_space<vmem>>, vector<1x32xf32>
    %c0_24 = arith.constant 0 : index
    %c0_25 = arith.constant 0 : index
    %16 = vector.load %arg12[%c0_24, %c0_25] : memref<1x32xf32, #tpu.memory_space<vmem>>, vector<1x32xf32>
    %c0_26 = arith.constant 0 : index
    %c0_27 = arith.constant 0 : index
    %17 = vector.load %arg13[%c0_26, %c0_27] : memref<32x32xf32, #tpu.memory_space<vmem>>, vector<32x32xf32>
    %c0_28 = arith.constant 0 : index
    %c0_29 = arith.constant 0 : index
    %18 = vector.load %arg14[%c0_28, %c0_29] : memref<1x32xf32, #tpu.memory_space<vmem>>, vector<1x32xf32>
    %c0_30 = arith.constant 0 : index
    %c0_31 = arith.constant 0 : index
    %19 = vector.load %arg15[%c0_30, %c0_31] : memref<32x32xf32, #tpu.memory_space<vmem>>, vector<32x32xf32>
    %c0_32 = arith.constant 0 : index
    %c0_33 = arith.constant 0 : index
    %20 = vector.load %arg16[%c0_32, %c0_33] : memref<1x32xf32, #tpu.memory_space<vmem>>, vector<1x32xf32>
    %c0_34 = arith.constant 0 : index
    %c0_35 = arith.constant 0 : index
    %21 = vector.load %arg17[%c0_34, %c0_35] : memref<1x32xf32, #tpu.memory_space<vmem>>, vector<1x32xf32>
    %c0_36 = arith.constant 0 : index
    %c0_37 = arith.constant 0 : index
    %22 = vector.load %arg18[%c0_36, %c0_37] : memref<1x32xf32, #tpu.memory_space<vmem>>, vector<1x32xf32>
    %cst_38 = arith.constant dense<0.000000e+00> : vector<16x96xf32>
    %23 = tpu.matmul %4, %11, %cst_38 {dimension_numbers = #tpu.dot_dimension_numbers<[1], [0], [0], [1], [0, 0, 1, 1], [], []>} : vector<16x32xf32>, vector<32x96xf32>, vector<16x96xf32> -> vector<16x96xf32>
    %24 = vector.broadcast %12 : vector<1x96xf32> to vector<16x96xf32>
    %25 = arith.addf %23, %24 : vector<16x96xf32>
    %26 = vector.extract_strided_slice %25 {offsets = [0, 0], sizes = [16, 32], strides = [1, 1]} : vector<16x96xf32> to vector<16x32xf32>
    %27 = vector.extract_strided_slice %25 {offsets = [0, 32], sizes = [16, 32], strides = [1, 1]} : vector<16x96xf32> to vector<16x32xf32>
    %28 = vector.extract_strided_slice %25 {offsets = [0, 64], sizes = [16, 32], strides = [1, 1]} : vector<16x96xf32> to vector<16x32xf32>
    %29 = vector.extract_strided_slice %26 {offsets = [0, 0], sizes = [16, 8], strides = [1, 1]} : vector<16x32xf32> to vector<16x8xf32>
    %30 = vector.extract_strided_slice %26 {offsets = [0, 8], sizes = [16, 8], strides = [1, 1]} : vector<16x32xf32> to vector<16x8xf32>
    %31 = vector.extract_strided_slice %26 {offsets = [0, 16], sizes = [16, 8], strides = [1, 1]} : vector<16x32xf32> to vector<16x8xf32>
    %32 = vector.extract_strided_slice %26 {offsets = [0, 24], sizes = [16, 8], strides = [1, 1]} : vector<16x32xf32> to vector<16x8xf32>
    %33 = tpu.concatenate %29, %30, %31, %32 in 0 : vector<16x8xf32>, vector<16x8xf32>, vector<16x8xf32>, vector<16x8xf32> -> vector<64x8xf32>
    %34 = vector.extract_strided_slice %27 {offsets = [0, 0], sizes = [16, 8], strides = [1, 1]} : vector<16x32xf32> to vector<16x8xf32>
    %35 = vector.extract_strided_slice %27 {offsets = [0, 8], sizes = [16, 8], strides = [1, 1]} : vector<16x32xf32> to vector<16x8xf32>
    %36 = vector.extract_strided_slice %27 {offsets = [0, 16], sizes = [16, 8], strides = [1, 1]} : vector<16x32xf32> to vector<16x8xf32>
    %37 = vector.extract_strided_slice %27 {offsets = [0, 24], sizes = [16, 8], strides = [1, 1]} : vector<16x32xf32> to vector<16x8xf32>
    %38 = tpu.concatenate %34, %35, %36, %37 in 0 : vector<16x8xf32>, vector<16x8xf32>, vector<16x8xf32>, vector<16x8xf32> -> vector<64x8xf32>
    %39 = vector.extract_strided_slice %28 {offsets = [0, 0], sizes = [16, 8], strides = [1, 1]} : vector<16x32xf32> to vector<16x8xf32>
    %40 = vector.extract_strided_slice %28 {offsets = [0, 8], sizes = [16, 8], strides = [1, 1]} : vector<16x32xf32> to vector<16x8xf32>
    %41 = vector.extract_strided_slice %28 {offsets = [0, 16], sizes = [16, 8], strides = [1, 1]} : vector<16x32xf32> to vector<16x8xf32>
    %42 = vector.extract_strided_slice %28 {offsets = [0, 24], sizes = [16, 8], strides = [1, 1]} : vector<16x32xf32> to vector<16x8xf32>
    %43 = tpu.concatenate %39, %40, %41, %42 in 0 : vector<16x8xf32>, vector<16x8xf32>, vector<16x8xf32>, vector<16x8xf32> -> vector<64x8xf32>
    %cst_39 = arith.constant dense<0.000000e+00> : vector<64x64xf32>
    %44 = tpu.matmul %33, %38, %cst_39 {dimension_numbers = #tpu.dot_dimension_numbers<[1], [1], [0], [0], [0, 0, 1, 0], [], []>} : vector<64x8xf32>, vector<64x8xf32>, vector<64x64xf32> -> vector<64x64xf32>
    %45 = arith.addf %44, %10 : vector<64x64xf32>
    %cst_40 = arith.constant dense<0xFF800000> : vector<64xf32>
    %46 = vector.multi_reduction <maximumf>, %45, %cst_40 [1] : vector<64x64xf32> to vector<64xf32>
    %47 = vector.shape_cast %46 : vector<64xf32> to vector<64x1xf32>
    %48 = vector.broadcast %47 : vector<64x1xf32> to vector<64x64xf32>
    %49 = arith.subf %45, %48 : vector<64x64xf32>
    %50 = math.exp %49 : vector<64x64xf32>
    %cst_41 = arith.constant dense<0.000000e+00> : vector<64xf32>
    %51 = vector.multi_reduction <add>, %50, %cst_41 [1] : vector<64x64xf32> to vector<64xf32>
    %52 = vector.shape_cast %51 : vector<64xf32> to vector<64x1xf32>
    %53 = vector.broadcast %52 : vector<64x1xf32> to vector<64x64xf32>
    %54 = arith.divf %50, %53 : vector<64x64xf32>
    %cst_42 = arith.constant dense<0.000000e+00> : vector<64x8xf32>
    %55 = tpu.matmul %54, %43, %cst_42 {dimension_numbers = #tpu.dot_dimension_numbers<[1], [0], [0], [1], [0, 0, 1, 1], [], []>} : vector<64x64xf32>, vector<64x8xf32>, vector<64x8xf32> -> vector<64x8xf32>
    %56 = vector.extract_strided_slice %55 {offsets = [0, 0], sizes = [16, 8], strides = [1, 1]} : vector<64x8xf32> to vector<16x8xf32>
    %57 = vector.extract_strided_slice %55 {offsets = [16, 0], sizes = [16, 8], strides = [1, 1]} : vector<64x8xf32> to vector<16x8xf32>
    %58 = vector.extract_strided_slice %55 {offsets = [32, 0], sizes = [16, 8], strides = [1, 1]} : vector<64x8xf32> to vector<16x8xf32>
    %59 = vector.extract_strided_slice %55 {offsets = [48, 0], sizes = [16, 8], strides = [1, 1]} : vector<64x8xf32> to vector<16x8xf32>
    %60 = tpu.concatenate %56, %57, %58, %59 in 1 : vector<16x8xf32>, vector<16x8xf32>, vector<16x8xf32>, vector<16x8xf32> -> vector<16x32xf32>
    %cst_43 = arith.constant dense<0.000000e+00> : vector<16x32xf32>
    %61 = tpu.matmul %60, %13, %cst_43 {dimension_numbers = #tpu.dot_dimension_numbers<[1], [0], [0], [1], [0, 0, 1, 1], [], []>} : vector<16x32xf32>, vector<32x32xf32>, vector<16x32xf32> -> vector<16x32xf32>
    %62 = vector.broadcast %14 : vector<1x32xf32> to vector<16x32xf32>
    %63 = arith.addf %61, %62 : vector<16x32xf32>
    %64 = arith.addf %4, %63 : vector<16x32xf32>
    %cst_44 = arith.constant dense<0.000000e+00> : vector<16xf32>
    %65 = vector.multi_reduction <add>, %64, %cst_44 [1] : vector<16x32xf32> to vector<16xf32>
    %66 = vector.shape_cast %65 : vector<16xf32> to vector<16x1xf32>
    %cst_45 = arith.constant 3.200000e+01 : f32
    %67 = vector.broadcast %cst_45 : f32 to vector<16x1xf32>
    %68 = arith.divf %66, %67 : vector<16x1xf32>
    %69 = vector.broadcast %68 : vector<16x1xf32> to vector<16x32xf32>
    %70 = arith.subf %64, %69 : vector<16x32xf32>
    %71 = arith.mulf %70, %70 : vector<16x32xf32>
    %cst_46 = arith.constant dense<0.000000e+00> : vector<16xf32>
    %72 = vector.multi_reduction <add>, %71, %cst_46 [1] : vector<16x32xf32> to vector<16xf32>
    %73 = vector.shape_cast %72 : vector<16xf32> to vector<16x1xf32>
    %cst_47 = arith.constant 3.200000e+01 : f32
    %74 = vector.broadcast %cst_47 : f32 to vector<16x1xf32>
    %75 = arith.divf %73, %74 : vector<16x1xf32>
    %cst_48 = arith.constant 9.99999974E-6 : f32
    %76 = vector.broadcast %cst_48 : f32 to vector<16x1xf32>
    %77 = arith.addf %75, %76 : vector<16x1xf32>
    %78 = math.rsqrt %77 : vector<16x1xf32>
    %79 = vector.broadcast %78 : vector<16x1xf32> to vector<16x32xf32>
    %80 = arith.mulf %70, %79 : vector<16x32xf32>
    %81 = vector.broadcast %15 : vector<1x32xf32> to vector<16x32xf32>
    %82 = arith.mulf %80, %81 : vector<16x32xf32>
    %83 = vector.broadcast %16 : vector<1x32xf32> to vector<16x32xf32>
    %84 = arith.addf %82, %83 : vector<16x32xf32>
    %cst_49 = arith.constant dense<0.000000e+00> : vector<16x32xf32>
    %85 = tpu.matmul %84, %17, %cst_49 {dimension_numbers = #tpu.dot_dimension_numbers<[1], [0], [0], [1], [0, 0, 1, 1], [], []>} : vector<16x32xf32>, vector<32x32xf32>, vector<16x32xf32> -> vector<16x32xf32>
    %86 = vector.broadcast %18 : vector<1x32xf32> to vector<16x32xf32>
    %87 = arith.addf %85, %86 : vector<16x32xf32>
    %cst_50 = arith.constant 0.707106769 : f32
    %88 = vector.broadcast %cst_50 : f32 to vector<16x32xf32>
    %89 = arith.mulf %87, %88 : vector<16x32xf32>
    %90 = math.absf %89 : vector<16x32xf32>
    %cst_51 = arith.constant 0.327591091 : f32
    %91 = vector.broadcast %cst_51 : f32 to vector<16x32xf32>
    %92 = arith.mulf %91, %90 : vector<16x32xf32>
    %cst_52 = arith.constant 1.000000e+00 : f32
    %93 = vector.broadcast %cst_52 : f32 to vector<16x32xf32>
    %94 = arith.addf %93, %92 : vector<16x32xf32>
    %cst_53 = arith.constant 1.000000e+00 : f32
    %95 = vector.broadcast %cst_53 : f32 to vector<16x32xf32>
    %96 = arith.divf %95, %94 : vector<16x32xf32>
    %cst_54 = arith.constant 1.06140542 : f32
    %97 = vector.broadcast %cst_54 : f32 to vector<16x32xf32>
    %98 = arith.mulf %96, %97 : vector<16x32xf32>
    %cst_55 = arith.constant -1.45315206 : f32
    %99 = vector.broadcast %cst_55 : f32 to vector<16x32xf32>
    %100 = arith.addf %99, %98 : vector<16x32xf32>
    %101 = arith.mulf %96, %100 : vector<16x32xf32>
    %cst_56 = arith.constant 1.42141378 : f32
    %102 = vector.broadcast %cst_56 : f32 to vector<16x32xf32>
    %103 = arith.addf %102, %101 : vector<16x32xf32>
    %104 = arith.mulf %96, %103 : vector<16x32xf32>
    %cst_57 = arith.constant -0.284496725 : f32
    %105 = vector.broadcast %cst_57 : f32 to vector<16x32xf32>
    %106 = arith.addf %105, %104 : vector<16x32xf32>
    %107 = arith.mulf %96, %106 : vector<16x32xf32>
    %cst_58 = arith.constant 0.254829586 : f32
    %108 = vector.broadcast %cst_58 : f32 to vector<16x32xf32>
    %109 = arith.addf %108, %107 : vector<16x32xf32>
    %110 = arith.mulf %96, %109 : vector<16x32xf32>
    %cst_59 = arith.constant 0.000000e+00 : f32
    %111 = vector.broadcast %cst_59 : f32 to vector<16x32xf32>
    %112 = arith.subf %111, %90 : vector<16x32xf32>
    %113 = arith.mulf %112, %90 : vector<16x32xf32>
    %114 = math.exp %113 : vector<16x32xf32>
    %115 = arith.mulf %110, %114 : vector<16x32xf32>
    %cst_60 = arith.constant 1.000000e+00 : f32
    %116 = vector.broadcast %cst_60 : f32 to vector<16x32xf32>
    %117 = arith.subf %116, %115 : vector<16x32xf32>
    %cst_61 = arith.constant 0.000000e+00 : f32
    %118 = vector.broadcast %cst_61 : f32 to vector<16x32xf32>
    %119 = arith.cmpf oge, %89, %118 : vector<16x32xf32>
    %cst_62 = arith.constant 0.000000e+00 : f32
    %120 = vector.broadcast %cst_62 : f32 to vector<16x32xf32>
    %121 = arith.subf %120, %117 : vector<16x32xf32>
    %122 = arith.select %119, %117, %121 : vector<16x32xi1>, vector<16x32xf32>
    %cst_63 = arith.constant 5.000000e-01 : f32
    %123 = vector.broadcast %cst_63 : f32 to vector<16x32xf32>
    %124 = arith.mulf %123, %87 : vector<16x32xf32>
    %cst_64 = arith.constant 1.000000e+00 : f32
    %125 = vector.broadcast %cst_64 : f32 to vector<16x32xf32>
    %126 = arith.addf %125, %122 : vector<16x32xf32>
    %127 = arith.mulf %124, %126 : vector<16x32xf32>
    %cst_65 = arith.constant dense<0.000000e+00> : vector<16x32xf32>
    %128 = tpu.matmul %127, %19, %cst_65 {dimension_numbers = #tpu.dot_dimension_numbers<[1], [0], [0], [1], [0, 0, 1, 1], [], []>} : vector<16x32xf32>, vector<32x32xf32>, vector<16x32xf32> -> vector<16x32xf32>
    %129 = vector.broadcast %20 : vector<1x32xf32> to vector<16x32xf32>
    %130 = arith.addf %128, %129 : vector<16x32xf32>
    %131 = arith.addf %84, %130 : vector<16x32xf32>
    %cst_66 = arith.constant dense<0.000000e+00> : vector<16xf32>
    %132 = vector.multi_reduction <add>, %131, %cst_66 [1] : vector<16x32xf32> to vector<16xf32>
    %133 = vector.shape_cast %132 : vector<16xf32> to vector<16x1xf32>
    %cst_67 = arith.constant 3.200000e+01 : f32
    %134 = vector.broadcast %cst_67 : f32 to vector<16x1xf32>
    %135 = arith.divf %133, %134 : vector<16x1xf32>
    %136 = vector.broadcast %135 : vector<16x1xf32> to vector<16x32xf32>
    %137 = arith.subf %131, %136 : vector<16x32xf32>
    %138 = arith.mulf %137, %137 : vector<16x32xf32>
    %cst_68 = arith.constant dense<0.000000e+00> : vector<16xf32>
    %139 = vector.multi_reduction <add>, %138, %cst_68 [1] : vector<16x32xf32> to vector<16xf32>
    %140 = vector.shape_cast %139 : vector<16xf32> to vector<16x1xf32>
    %cst_69 = arith.constant 3.200000e+01 : f32
    %141 = vector.broadcast %cst_69 : f32 to vector<16x1xf32>
    %142 = arith.divf %140, %141 : vector<16x1xf32>
    %cst_70 = arith.constant 9.99999974E-6 : f32
    %143 = vector.broadcast %cst_70 : f32 to vector<16x1xf32>
    %144 = arith.addf %142, %143 : vector<16x1xf32>
    %145 = math.rsqrt %144 : vector<16x1xf32>
    %146 = vector.broadcast %145 : vector<16x1xf32> to vector<16x32xf32>
    %147 = arith.mulf %137, %146 : vector<16x32xf32>
    %148 = vector.broadcast %21 : vector<1x32xf32> to vector<16x32xf32>
    %149 = arith.mulf %147, %148 : vector<16x32xf32>
    %150 = vector.broadcast %22 : vector<1x32xf32> to vector<16x32xf32>
    %151 = arith.addf %149, %150 : vector<16x32xf32>
    %c0_71 = arith.constant 0 : index
    %c0_72 = arith.constant 0 : index
    %152 = vector.load %arg19[%c0_71, %c0_72] : memref<16x16xf32, #tpu.memory_space<vmem>>, vector<16x16xf32>
    %c0_73 = arith.constant 0 : index
    %c0_74 = arith.constant 0 : index
    %153 = vector.load %arg20[%c0_73, %c0_74] : memref<16x16xf32, #tpu.memory_space<vmem>>, vector<16x16xf32>
    %c0_75 = arith.constant 0 : index
    %c0_76 = arith.constant 0 : index
    %154 = vector.load %arg21[%c0_75, %c0_76] : memref<96x32xf32, #tpu.memory_space<vmem>>, vector<96x32xf32>
    %c0_77 = arith.constant 0 : index
    %c0_78 = arith.constant 0 : index
    %155 = vector.load %arg22[%c0_77, %c0_78] : memref<1x32xf32, #tpu.memory_space<vmem>>, vector<1x32xf32>
    %c0_79 = arith.constant 0 : index
    %c0_80 = arith.constant 0 : index
    %156 = vector.load %arg23[%c0_79, %c0_80] : memref<24x16xf32, #tpu.memory_space<vmem>>, vector<24x16xf32>
    %cst_81 = arith.constant dense<0.000000e+00> : vector<16x32xf32>
    %157 = tpu.matmul %152, %151, %cst_81 {dimension_numbers = #tpu.dot_dimension_numbers<[1], [0], [0], [1], [0, 0, 1, 1], [], []>} : vector<16x16xf32>, vector<16x32xf32>, vector<16x32xf32> -> vector<16x32xf32>
    %cst_82 = arith.constant dense<0.000000e+00> : vector<16x32xf32>
    %158 = tpu.matmul %153, %151, %cst_82 {dimension_numbers = #tpu.dot_dimension_numbers<[1], [0], [0], [1], [0, 0, 1, 1], [], []>} : vector<16x16xf32>, vector<16x32xf32>, vector<16x32xf32> -> vector<16x32xf32>
    %159 = tpu.concatenate %157, %151, %158 in 1 : vector<16x32xf32>, vector<16x32xf32>, vector<16x32xf32> -> vector<16x96xf32>
    %cst_83 = arith.constant dense<0.000000e+00> : vector<16x32xf32>
    %160 = tpu.matmul %159, %154, %cst_83 {dimension_numbers = #tpu.dot_dimension_numbers<[1], [0], [0], [1], [0, 0, 1, 1], [], []>} : vector<16x96xf32>, vector<96x32xf32>, vector<16x32xf32> -> vector<16x32xf32>
    %161 = vector.broadcast %155 : vector<1x32xf32> to vector<16x32xf32>
    %162 = arith.addf %160, %161 : vector<16x32xf32>
    %cst_84 = arith.constant 0.000000e+00 : f32
    %163 = vector.broadcast %cst_84 : f32 to vector<16x32xf32>
    %164 = arith.cmpf ogt, %162, %163 : vector<16x32xf32>
    %cst_85 = arith.constant 0.000000e+00 : f32
    %165 = vector.broadcast %cst_85 : f32 to vector<16x32xf32>
    %166 = arith.minimumf %162, %165 : vector<16x32xf32>
    %167 = math.exp %166 : vector<16x32xf32>
    %cst_86 = arith.constant 1.000000e+00 : f32
    %168 = vector.broadcast %cst_86 : f32 to vector<16x32xf32>
    %169 = arith.subf %167, %168 : vector<16x32xf32>
    %170 = arith.select %164, %162, %169 : vector<16x32xi1>, vector<16x32xf32>
    %171 = vector.extract_strided_slice %156 {offsets = [0, 0], sizes = [8, 16], strides = [1, 1]} : vector<24x16xf32> to vector<8x16xf32>
    %cst_87 = arith.constant dense<0.000000e+00> : vector<8x32xf32>
    %172 = tpu.matmul %171, %170, %cst_87 {dimension_numbers = #tpu.dot_dimension_numbers<[1], [0], [0], [1], [0, 0, 1, 1], [], []>} : vector<8x16xf32>, vector<16x32xf32>, vector<8x32xf32> -> vector<8x32xf32>
    %173 = vector.extract_strided_slice %156 {offsets = [8, 0], sizes = [8, 16], strides = [1, 1]} : vector<24x16xf32> to vector<8x16xf32>
    %cst_88 = arith.constant dense<0.000000e+00> : vector<8x32xf32>
    %174 = tpu.matmul %173, %170, %cst_88 {dimension_numbers = #tpu.dot_dimension_numbers<[1], [0], [0], [1], [0, 0, 1, 1], [], []>} : vector<8x16xf32>, vector<16x32xf32>, vector<8x32xf32> -> vector<8x32xf32>
    %175 = arith.maximumf %172, %174 : vector<8x32xf32>
    %176 = vector.extract_strided_slice %156 {offsets = [16, 0], sizes = [8, 16], strides = [1, 1]} : vector<24x16xf32> to vector<8x16xf32>
    %cst_89 = arith.constant dense<0.000000e+00> : vector<8x32xf32>
    %177 = tpu.matmul %176, %170, %cst_89 {dimension_numbers = #tpu.dot_dimension_numbers<[1], [0], [0], [1], [0, 0, 1, 1], [], []>} : vector<8x16xf32>, vector<16x32xf32>, vector<8x32xf32> -> vector<8x32xf32>
    %178 = arith.maximumf %175, %177 : vector<8x32xf32>
    %c0_90 = arith.constant 0 : index
    %c0_91 = arith.constant 0 : index
    %179 = vector.load %arg24[%c0_90, %c0_91] : memref<32x32xf32, #tpu.memory_space<vmem>>, vector<32x32xf32>
    %c0_92 = arith.constant 0 : index
    %c0_93 = arith.constant 0 : index
    %180 = vector.load %arg25[%c0_92, %c0_93] : memref<32x96xf32, #tpu.memory_space<vmem>>, vector<32x96xf32>
    %c0_94 = arith.constant 0 : index
    %c0_95 = arith.constant 0 : index
    %181 = vector.load %arg26[%c0_94, %c0_95] : memref<1x96xf32, #tpu.memory_space<vmem>>, vector<1x96xf32>
    %c0_96 = arith.constant 0 : index
    %c0_97 = arith.constant 0 : index
    %182 = vector.load %arg27[%c0_96, %c0_97] : memref<32x32xf32, #tpu.memory_space<vmem>>, vector<32x32xf32>
    %c0_98 = arith.constant 0 : index
    %c0_99 = arith.constant 0 : index
    %183 = vector.load %arg28[%c0_98, %c0_99] : memref<1x32xf32, #tpu.memory_space<vmem>>, vector<1x32xf32>
    %c0_100 = arith.constant 0 : index
    %c0_101 = arith.constant 0 : index
    %184 = vector.load %arg29[%c0_100, %c0_101] : memref<1x32xf32, #tpu.memory_space<vmem>>, vector<1x32xf32>
    %c0_102 = arith.constant 0 : index
    %c0_103 = arith.constant 0 : index
    %185 = vector.load %arg30[%c0_102, %c0_103] : memref<1x32xf32, #tpu.memory_space<vmem>>, vector<1x32xf32>
    %c0_104 = arith.constant 0 : index
    %c0_105 = arith.constant 0 : index
    %186 = vector.load %arg31[%c0_104, %c0_105] : memref<32x32xf32, #tpu.memory_space<vmem>>, vector<32x32xf32>
    %c0_106 = arith.constant 0 : index
    %c0_107 = arith.constant 0 : index
    %187 = vector.load %arg32[%c0_106, %c0_107] : memref<1x32xf32, #tpu.memory_space<vmem>>, vector<1x32xf32>
    %c0_108 = arith.constant 0 : index
    %c0_109 = arith.constant 0 : index
    %188 = vector.load %arg33[%c0_108, %c0_109] : memref<32x32xf32, #tpu.memory_space<vmem>>, vector<32x32xf32>
    %c0_110 = arith.constant 0 : index
    %c0_111 = arith.constant 0 : index
    %189 = vector.load %arg34[%c0_110, %c0_111] : memref<1x32xf32, #tpu.memory_space<vmem>>, vector<1x32xf32>
    %c0_112 = arith.constant 0 : index
    %c0_113 = arith.constant 0 : index
    %190 = vector.load %arg35[%c0_112, %c0_113] : memref<1x32xf32, #tpu.memory_space<vmem>>, vector<1x32xf32>
    %c0_114 = arith.constant 0 : index
    %c0_115 = arith.constant 0 : index
    %191 = vector.load %arg36[%c0_114, %c0_115] : memref<1x32xf32, #tpu.memory_space<vmem>>, vector<1x32xf32>
    %cst_116 = arith.constant dense<0.000000e+00> : vector<8x96xf32>
    %192 = tpu.matmul %178, %180, %cst_116 {dimension_numbers = #tpu.dot_dimension_numbers<[1], [0], [0], [1], [0, 0, 1, 1], [], []>} : vector<8x32xf32>, vector<32x96xf32>, vector<8x96xf32> -> vector<8x96xf32>
    %193 = vector.broadcast %181 : vector<1x96xf32> to vector<8x96xf32>
    %194 = arith.addf %192, %193 : vector<8x96xf32>
    %195 = vector.extract_strided_slice %194 {offsets = [0, 0], sizes = [8, 32], strides = [1, 1]} : vector<8x96xf32> to vector<8x32xf32>
    %196 = vector.extract_strided_slice %194 {offsets = [0, 32], sizes = [8, 32], strides = [1, 1]} : vector<8x96xf32> to vector<8x32xf32>
    %197 = vector.extract_strided_slice %194 {offsets = [0, 64], sizes = [8, 32], strides = [1, 1]} : vector<8x96xf32> to vector<8x32xf32>
    %198 = vector.extract_strided_slice %195 {offsets = [0, 0], sizes = [8, 8], strides = [1, 1]} : vector<8x32xf32> to vector<8x8xf32>
    %199 = vector.extract_strided_slice %195 {offsets = [0, 8], sizes = [8, 8], strides = [1, 1]} : vector<8x32xf32> to vector<8x8xf32>
    %200 = vector.extract_strided_slice %195 {offsets = [0, 16], sizes = [8, 8], strides = [1, 1]} : vector<8x32xf32> to vector<8x8xf32>
    %201 = vector.extract_strided_slice %195 {offsets = [0, 24], sizes = [8, 8], strides = [1, 1]} : vector<8x32xf32> to vector<8x8xf32>
    %202 = tpu.concatenate %198, %199, %200, %201 in 0 : vector<8x8xf32>, vector<8x8xf32>, vector<8x8xf32>, vector<8x8xf32> -> vector<32x8xf32>
    %203 = vector.extract_strided_slice %196 {offsets = [0, 0], sizes = [8, 8], strides = [1, 1]} : vector<8x32xf32> to vector<8x8xf32>
    %204 = vector.extract_strided_slice %196 {offsets = [0, 8], sizes = [8, 8], strides = [1, 1]} : vector<8x32xf32> to vector<8x8xf32>
    %205 = vector.extract_strided_slice %196 {offsets = [0, 16], sizes = [8, 8], strides = [1, 1]} : vector<8x32xf32> to vector<8x8xf32>
    %206 = vector.extract_strided_slice %196 {offsets = [0, 24], sizes = [8, 8], strides = [1, 1]} : vector<8x32xf32> to vector<8x8xf32>
    %207 = tpu.concatenate %203, %204, %205, %206 in 0 : vector<8x8xf32>, vector<8x8xf32>, vector<8x8xf32>, vector<8x8xf32> -> vector<32x8xf32>
    %208 = vector.extract_strided_slice %197 {offsets = [0, 0], sizes = [8, 8], strides = [1, 1]} : vector<8x32xf32> to vector<8x8xf32>
    %209 = vector.extract_strided_slice %197 {offsets = [0, 8], sizes = [8, 8], strides = [1, 1]} : vector<8x32xf32> to vector<8x8xf32>
    %210 = vector.extract_strided_slice %197 {offsets = [0, 16], sizes = [8, 8], strides = [1, 1]} : vector<8x32xf32> to vector<8x8xf32>
    %211 = vector.extract_strided_slice %197 {offsets = [0, 24], sizes = [8, 8], strides = [1, 1]} : vector<8x32xf32> to vector<8x8xf32>
    %212 = tpu.concatenate %208, %209, %210, %211 in 0 : vector<8x8xf32>, vector<8x8xf32>, vector<8x8xf32>, vector<8x8xf32> -> vector<32x8xf32>
    %cst_117 = arith.constant dense<0.000000e+00> : vector<32x32xf32>
    %213 = tpu.matmul %202, %207, %cst_117 {dimension_numbers = #tpu.dot_dimension_numbers<[1], [1], [0], [0], [0, 0, 1, 0], [], []>} : vector<32x8xf32>, vector<32x8xf32>, vector<32x32xf32> -> vector<32x32xf32>
    %214 = arith.addf %213, %179 : vector<32x32xf32>
    %cst_118 = arith.constant dense<0xFF800000> : vector<32xf32>
    %215 = vector.multi_reduction <maximumf>, %214, %cst_118 [1] : vector<32x32xf32> to vector<32xf32>
    %216 = vector.shape_cast %215 : vector<32xf32> to vector<32x1xf32>
    %217 = vector.broadcast %216 : vector<32x1xf32> to vector<32x32xf32>
    %218 = arith.subf %214, %217 : vector<32x32xf32>
    %219 = math.exp %218 : vector<32x32xf32>
    %cst_119 = arith.constant dense<0.000000e+00> : vector<32xf32>
    %220 = vector.multi_reduction <add>, %219, %cst_119 [1] : vector<32x32xf32> to vector<32xf32>
    %221 = vector.shape_cast %220 : vector<32xf32> to vector<32x1xf32>
    %222 = vector.broadcast %221 : vector<32x1xf32> to vector<32x32xf32>
    %223 = arith.divf %219, %222 : vector<32x32xf32>
    %cst_120 = arith.constant dense<0.000000e+00> : vector<32x8xf32>
    %224 = tpu.matmul %223, %212, %cst_120 {dimension_numbers = #tpu.dot_dimension_numbers<[1], [0], [0], [1], [0, 0, 1, 1], [], []>} : vector<32x32xf32>, vector<32x8xf32>, vector<32x8xf32> -> vector<32x8xf32>
    %225 = vector.extract_strided_slice %224 {offsets = [0, 0], sizes = [8, 8], strides = [1, 1]} : vector<32x8xf32> to vector<8x8xf32>
    %226 = vector.extract_strided_slice %224 {offsets = [8, 0], sizes = [8, 8], strides = [1, 1]} : vector<32x8xf32> to vector<8x8xf32>
    %227 = vector.extract_strided_slice %224 {offsets = [16, 0], sizes = [8, 8], strides = [1, 1]} : vector<32x8xf32> to vector<8x8xf32>
    %228 = vector.extract_strided_slice %224 {offsets = [24, 0], sizes = [8, 8], strides = [1, 1]} : vector<32x8xf32> to vector<8x8xf32>
    %229 = tpu.concatenate %225, %226, %227, %228 in 1 : vector<8x8xf32>, vector<8x8xf32>, vector<8x8xf32>, vector<8x8xf32> -> vector<8x32xf32>
    %cst_121 = arith.constant dense<0.000000e+00> : vector<8x32xf32>
    %230 = tpu.matmul %229, %182, %cst_121 {dimension_numbers = #tpu.dot_dimension_numbers<[1], [0], [0], [1], [0, 0, 1, 1], [], []>} : vector<8x32xf32>, vector<32x32xf32>, vector<8x32xf32> -> vector<8x32xf32>
    %231 = vector.broadcast %183 : vector<1x32xf32> to vector<8x32xf32>
    %232 = arith.addf %230, %231 : vector<8x32xf32>
    %233 = arith.addf %178, %232 : vector<8x32xf32>
    %cst_122 = arith.constant dense<0.000000e+00> : vector<8xf32>
    %234 = vector.multi_reduction <add>, %233, %cst_122 [1] : vector<8x32xf32> to vector<8xf32>
    %235 = vector.shape_cast %234 : vector<8xf32> to vector<8x1xf32>
    %cst_123 = arith.constant 3.200000e+01 : f32
    %236 = vector.broadcast %cst_123 : f32 to vector<8x1xf32>
    %237 = arith.divf %235, %236 : vector<8x1xf32>
    %238 = vector.broadcast %237 : vector<8x1xf32> to vector<8x32xf32>
    %239 = arith.subf %233, %238 : vector<8x32xf32>
    %240 = arith.mulf %239, %239 : vector<8x32xf32>
    %cst_124 = arith.constant dense<0.000000e+00> : vector<8xf32>
    %241 = vector.multi_reduction <add>, %240, %cst_124 [1] : vector<8x32xf32> to vector<8xf32>
    %242 = vector.shape_cast %241 : vector<8xf32> to vector<8x1xf32>
    %cst_125 = arith.constant 3.200000e+01 : f32
    %243 = vector.broadcast %cst_125 : f32 to vector<8x1xf32>
    %244 = arith.divf %242, %243 : vector<8x1xf32>
    %cst_126 = arith.constant 9.99999974E-6 : f32
    %245 = vector.broadcast %cst_126 : f32 to vector<8x1xf32>
    %246 = arith.addf %244, %245 : vector<8x1xf32>
    %247 = math.rsqrt %246 : vector<8x1xf32>
    %248 = vector.broadcast %247 : vector<8x1xf32> to vector<8x32xf32>
    %249 = arith.mulf %239, %248 : vector<8x32xf32>
    %250 = vector.broadcast %184 : vector<1x32xf32> to vector<8x32xf32>
    %251 = arith.mulf %249, %250 : vector<8x32xf32>
    %252 = vector.broadcast %185 : vector<1x32xf32> to vector<8x32xf32>
    %253 = arith.addf %251, %252 : vector<8x32xf32>
    %cst_127 = arith.constant dense<0.000000e+00> : vector<8x32xf32>
    %254 = tpu.matmul %253, %186, %cst_127 {dimension_numbers = #tpu.dot_dimension_numbers<[1], [0], [0], [1], [0, 0, 1, 1], [], []>} : vector<8x32xf32>, vector<32x32xf32>, vector<8x32xf32> -> vector<8x32xf32>
    %255 = vector.broadcast %187 : vector<1x32xf32> to vector<8x32xf32>
    %256 = arith.addf %254, %255 : vector<8x32xf32>
    %cst_128 = arith.constant 0.707106769 : f32
    %257 = vector.broadcast %cst_128 : f32 to vector<8x32xf32>
    %258 = arith.mulf %256, %257 : vector<8x32xf32>
    %259 = math.absf %258 : vector<8x32xf32>
    %cst_129 = arith.constant 0.327591091 : f32
    %260 = vector.broadcast %cst_129 : f32 to vector<8x32xf32>
    %261 = arith.mulf %260, %259 : vector<8x32xf32>
    %cst_130 = arith.constant 1.000000e+00 : f32
    %262 = vector.broadcast %cst_130 : f32 to vector<8x32xf32>
    %263 = arith.addf %262, %261 : vector<8x32xf32>
    %cst_131 = arith.constant 1.000000e+00 : f32
    %264 = vector.broadcast %cst_131 : f32 to vector<8x32xf32>
    %265 = arith.divf %264, %263 : vector<8x32xf32>
    %cst_132 = arith.constant 1.06140542 : f32
    %266 = vector.broadcast %cst_132 : f32 to vector<8x32xf32>
    %267 = arith.mulf %265, %266 : vector<8x32xf32>
    %cst_133 = arith.constant -1.45315206 : f32
    %268 = vector.broadcast %cst_133 : f32 to vector<8x32xf32>
    %269 = arith.addf %268, %267 : vector<8x32xf32>
    %270 = arith.mulf %265, %269 : vector<8x32xf32>
    %cst_134 = arith.constant 1.42141378 : f32
    %271 = vector.broadcast %cst_134 : f32 to vector<8x32xf32>
    %272 = arith.addf %271, %270 : vector<8x32xf32>
    %273 = arith.mulf %265, %272 : vector<8x32xf32>
    %cst_135 = arith.constant -0.284496725 : f32
    %274 = vector.broadcast %cst_135 : f32 to vector<8x32xf32>
    %275 = arith.addf %274, %273 : vector<8x32xf32>
    %276 = arith.mulf %265, %275 : vector<8x32xf32>
    %cst_136 = arith.constant 0.254829586 : f32
    %277 = vector.broadcast %cst_136 : f32 to vector<8x32xf32>
    %278 = arith.addf %277, %276 : vector<8x32xf32>
    %279 = arith.mulf %265, %278 : vector<8x32xf32>
    %cst_137 = arith.constant 0.000000e+00 : f32
    %280 = vector.broadcast %cst_137 : f32 to vector<8x32xf32>
    %281 = arith.subf %280, %259 : vector<8x32xf32>
    %282 = arith.mulf %281, %259 : vector<8x32xf32>
    %283 = math.exp %282 : vector<8x32xf32>
    %284 = arith.mulf %279, %283 : vector<8x32xf32>
    %cst_138 = arith.constant 1.000000e+00 : f32
    %285 = vector.broadcast %cst_138 : f32 to vector<8x32xf32>
    %286 = arith.subf %285, %284 : vector<8x32xf32>
    %cst_139 = arith.constant 0.000000e+00 : f32
    %287 = vector.broadcast %cst_139 : f32 to vector<8x32xf32>
    %288 = arith.cmpf oge, %258, %287 : vector<8x32xf32>
    %cst_140 = arith.constant 0.000000e+00 : f32
    %289 = vector.broadcast %cst_140 : f32 to vector<8x32xf32>
    %290 = arith.subf %289, %286 : vector<8x32xf32>
    %291 = arith.select %288, %286, %290 : vector<8x32xi1>, vector<8x32xf32>
    %cst_141 = arith.constant 5.000000e-01 : f32
    %292 = vector.broadcast %cst_141 : f32 to vector<8x32xf32>
    %293 = arith.mulf %292, %256 : vector<8x32xf32>
    %cst_142 = arith.constant 1.000000e+00 : f32
    %294 = vector.broadcast %cst_142 : f32 to vector<8x32xf32>
    %295 = arith.addf %294, %291 : vector<8x32xf32>
    %296 = arith.mulf %293, %295 : vector<8x32xf32>
    %cst_143 = arith.constant dense<0.000000e+00> : vector<8x32xf32>
    %297 = tpu.matmul %296, %188, %cst_143 {dimension_numbers = #tpu.dot_dimension_numbers<[1], [0], [0], [1], [0, 0, 1, 1], [], []>} : vector<8x32xf32>, vector<32x32xf32>, vector<8x32xf32> -> vector<8x32xf32>
    %298 = vector.broadcast %189 : vector<1x32xf32> to vector<8x32xf32>
    %299 = arith.addf %297, %298 : vector<8x32xf32>
    %300 = arith.addf %253, %299 : vector<8x32xf32>
    %cst_144 = arith.constant dense<0.000000e+00> : vector<8xf32>
    %301 = vector.multi_reduction <add>, %300, %cst_144 [1] : vector<8x32xf32> to vector<8xf32>
    %302 = vector.shape_cast %301 : vector<8xf32> to vector<8x1xf32>
    %cst_145 = arith.constant 3.200000e+01 : f32
    %303 = vector.broadcast %cst_145 : f32 to vector<8x1xf32>
    %304 = arith.divf %302, %303 : vector<8x1xf32>
    %305 = vector.broadcast %304 : vector<8x1xf32> to vector<8x32xf32>
    %306 = arith.subf %300, %305 : vector<8x32xf32>
    %307 = arith.mulf %306, %306 : vector<8x32xf32>
    %cst_146 = arith.constant dense<0.000000e+00> : vector<8xf32>
    %308 = vector.multi_reduction <add>, %307, %cst_146 [1] : vector<8x32xf32> to vector<8xf32>
    %309 = vector.shape_cast %308 : vector<8xf32> to vector<8x1xf32>
    %cst_147 = arith.constant 3.200000e+01 : f32
    %310 = vector.broadcast %cst_147 : f32 to vector<8x1xf32>
    %311 = arith.divf %309, %310 : vector<8x1xf32>
    %cst_148 = arith.constant 9.99999974E-6 : f32
    %312 = vector.broadcast %cst_148 : f32 to vector<8x1xf32>
    %313 = arith.addf %311, %312 : vector<8x1xf32>
    %314 = math.rsqrt %313 : vector<8x1xf32>
    %315 = vector.broadcast %314 : vector<8x1xf32> to vector<8x32xf32>
    %316 = arith.mulf %306, %315 : vector<8x32xf32>
    %317 = vector.broadcast %190 : vector<1x32xf32> to vector<8x32xf32>
    %318 = arith.mulf %316, %317 : vector<8x32xf32>
    %319 = vector.broadcast %191 : vector<1x32xf32> to vector<8x32xf32>
    %320 = arith.addf %318, %319 : vector<8x32xf32>
    %c0_149 = arith.constant 0 : index
    %c0_150 = arith.constant 0 : index
    %321 = vector.load %arg37[%c0_149, %c0_150] : memref<1x32xf32, #tpu.memory_space<vmem>>, vector<1x32xf32>
    %c0_151 = arith.constant 0 : index
    %c0_152 = arith.constant 0 : index
    %322 = vector.load %arg38[%c0_151, %c0_152] : memref<1x32xf32, #tpu.memory_space<vmem>>, vector<1x32xf32>
    %cst_153 = arith.constant dense<0.000000e+00> : vector<8xf32>
    %323 = vector.multi_reduction <add>, %320, %cst_153 [1] : vector<8x32xf32> to vector<8xf32>
    %324 = vector.shape_cast %323 : vector<8xf32> to vector<8x1xf32>
    %cst_154 = arith.constant 3.200000e+01 : f32
    %325 = vector.broadcast %cst_154 : f32 to vector<8x1xf32>
    %326 = arith.divf %324, %325 : vector<8x1xf32>
    %327 = vector.broadcast %326 : vector<8x1xf32> to vector<8x32xf32>
    %328 = arith.subf %320, %327 : vector<8x32xf32>
    %329 = arith.mulf %328, %328 : vector<8x32xf32>
    %cst_155 = arith.constant dense<0.000000e+00> : vector<8xf32>
    %330 = vector.multi_reduction <add>, %329, %cst_155 [1] : vector<8x32xf32> to vector<8xf32>
    %331 = vector.shape_cast %330 : vector<8xf32> to vector<8x1xf32>
    %cst_156 = arith.constant 3.200000e+01 : f32
    %332 = vector.broadcast %cst_156 : f32 to vector<8x1xf32>
    %333 = arith.divf %331, %332 : vector<8x1xf32>
    %cst_157 = arith.constant 9.99999974E-6 : f32
    %334 = vector.broadcast %cst_157 : f32 to vector<8x1xf32>
    %335 = arith.addf %333, %334 : vector<8x1xf32>
    %336 = math.rsqrt %335 : vector<8x1xf32>
    %337 = vector.broadcast %336 : vector<8x1xf32> to vector<8x32xf32>
    %338 = arith.mulf %328, %337 : vector<8x32xf32>
    %339 = vector.broadcast %321 : vector<1x32xf32> to vector<8x32xf32>
    %340 = arith.mulf %338, %339 : vector<8x32xf32>
    %341 = vector.broadcast %322 : vector<1x32xf32> to vector<8x32xf32>
    %342 = arith.addf %340, %341 : vector<8x32xf32>
    %c0_158 = arith.constant 0 : index
    %c0_159 = arith.constant 0 : index
    %343 = vector.load %arg67[%c0_158, %c0_159] : memref<8x32xf32, #tpu.memory_space<vmem>>, vector<8x32xf32>
    tpu.vector_store %arg67[%c0_158, %c0_159], %342 {strides = array<i32>} : memref<8x32xf32, #tpu.memory_space<vmem>>, vector<8x32xf32>,
    %c0_160 = arith.constant 0 : index
    %c0_161 = arith.constant 0 : index
    %344 = vector.load %arg39[%c0_160, %c0_161] : memref<64x64xf32, #tpu.memory_space<vmem>>, vector<64x64xf32>
    %c0_162 = arith.constant 0 : index
    %c0_163 = arith.constant 0 : index
    %345 = vector.load %arg40[%c0_162, %c0_163] : memref<64x64xf32, #tpu.memory_space<vmem>>, vector<64x64xf32>
    %c0_164 = arith.constant 0 : index
    %c0_165 = arith.constant 0 : index
    %346 = vector.load %arg41[%c0_164, %c0_165] : memref<64x32xf32, #tpu.memory_space<vmem>>, vector<64x32xf32>
    %c0_166 = arith.constant 0 : index
    %c0_167 = arith.constant 0 : index
    %347 = vector.load %arg42[%c0_166, %c0_167] : memref<32x96xf32, #tpu.memory_space<vmem>>, vector<32x96xf32>
    %c0_168 = arith.constant 0 : index
    %c0_169 = arith.constant 0 : index
    %348 = vector.load %arg43[%c0_168, %c0_169] : memref<1x96xf32, #tpu.memory_space<vmem>>, vector<1x96xf32>
    %c0_170 = arith.constant 0 : index
    %c0_171 = arith.constant 0 : index
    %349 = vector.load %arg44[%c0_170, %c0_171] : memref<32x32xf32, #tpu.memory_space<vmem>>, vector<32x32xf32>
    %c0_172 = arith.constant 0 : index
    %c0_173 = arith.constant 0 : index
    %350 = vector.load %arg45[%c0_172, %c0_173] : memref<1x32xf32, #tpu.memory_space<vmem>>, vector<1x32xf32>
    %c0_174 = arith.constant 0 : index
    %c0_175 = arith.constant 0 : index
    %351 = vector.load %arg46[%c0_174, %c0_175] : memref<1x32xf32, #tpu.memory_space<vmem>>, vector<1x32xf32>
    %c0_176 = arith.constant 0 : index
    %c0_177 = arith.constant 0 : index
    %352 = vector.load %arg47[%c0_176, %c0_177] : memref<1x32xf32, #tpu.memory_space<vmem>>, vector<1x32xf32>
    %c0_178 = arith.constant 0 : index
    %c0_179 = arith.constant 0 : index
    %353 = vector.load %arg48[%c0_178, %c0_179] : memref<32x32xf32, #tpu.memory_space<vmem>>, vector<32x32xf32>
    %c0_180 = arith.constant 0 : index
    %c0_181 = arith.constant 0 : index
    %354 = vector.load %arg49[%c0_180, %c0_181] : memref<1x32xf32, #tpu.memory_space<vmem>>, vector<1x32xf32>
    %c0_182 = arith.constant 0 : index
    %c0_183 = arith.constant 0 : index
    %355 = vector.load %arg50[%c0_182, %c0_183] : memref<32x64xf32, #tpu.memory_space<vmem>>, vector<32x64xf32>
    %c0_184 = arith.constant 0 : index
    %c0_185 = arith.constant 0 : index
    %356 = vector.load %arg51[%c0_184, %c0_185] : memref<1x64xf32, #tpu.memory_space<vmem>>, vector<1x64xf32>
    %c0_186 = arith.constant 0 : index
    %c0_187 = arith.constant 0 : index
    %357 = vector.load %arg52[%c0_186, %c0_187] : memref<32x32xf32, #tpu.memory_space<vmem>>, vector<32x32xf32>
    %c0_188 = arith.constant 0 : index
    %c0_189 = arith.constant 0 : index
    %358 = vector.load %arg53[%c0_188, %c0_189] : memref<1x32xf32, #tpu.memory_space<vmem>>, vector<1x32xf32>
    %c0_190 = arith.constant 0 : index
    %c0_191 = arith.constant 0 : index
    %359 = vector.load %arg54[%c0_190, %c0_191] : memref<1x32xf32, #tpu.memory_space<vmem>>, vector<1x32xf32>
    %c0_192 = arith.constant 0 : index
    %c0_193 = arith.constant 0 : index
    %360 = vector.load %arg55[%c0_192, %c0_193] : memref<1x32xf32, #tpu.memory_space<vmem>>, vector<1x32xf32>
    %c0_194 = arith.constant 0 : index
    %c0_195 = arith.constant 0 : index
    %361 = vector.load %arg56[%c0_194, %c0_195] : memref<32x32xf32, #tpu.memory_space<vmem>>, vector<32x32xf32>
    %c0_196 = arith.constant 0 : index
    %c0_197 = arith.constant 0 : index
    %362 = vector.load %arg57[%c0_196, %c0_197] : memref<1x32xf32, #tpu.memory_space<vmem>>, vector<1x32xf32>
    %c0_198 = arith.constant 0 : index
    %c0_199 = arith.constant 0 : index
    %363 = vector.load %arg58[%c0_198, %c0_199] : memref<32x32xf32, #tpu.memory_space<vmem>>, vector<32x32xf32>
    %c0_200 = arith.constant 0 : index
    %c0_201 = arith.constant 0 : index
    %364 = vector.load %arg59[%c0_200, %c0_201] : memref<1x32xf32, #tpu.memory_space<vmem>>, vector<1x32xf32>
    %c0_202 = arith.constant 0 : index
    %c0_203 = arith.constant 0 : index
    %365 = vector.load %arg60[%c0_202, %c0_203] : memref<1x32xf32, #tpu.memory_space<vmem>>, vector<1x32xf32>
    %c0_204 = arith.constant 0 : index
    %c0_205 = arith.constant 0 : index
    %366 = vector.load %arg61[%c0_204, %c0_205] : memref<1x32xf32, #tpu.memory_space<vmem>>, vector<1x32xf32>
    %cst_206 = arith.constant dense<0.000000e+00> : vector<16x96xf32>
    %367 = tpu.matmul %9, %347, %cst_206 {dimension_numbers = #tpu.dot_dimension_numbers<[1], [0], [0], [1], [0, 0, 1, 1], [], []>} : vector<16x32xf32>, vector<32x96xf32>, vector<16x96xf32> -> vector<16x96xf32>
    %368 = vector.broadcast %348 : vector<1x96xf32> to vector<16x96xf32>
    %369 = arith.addf %367, %368 : vector<16x96xf32>
    %370 = vector.extract_strided_slice %369 {offsets = [0, 0], sizes = [16, 32], strides = [1, 1]} : vector<16x96xf32> to vector<16x32xf32>
    %371 = vector.extract_strided_slice %369 {offsets = [0, 32], sizes = [16, 32], strides = [1, 1]} : vector<16x96xf32> to vector<16x32xf32>
    %372 = vector.extract_strided_slice %369 {offsets = [0, 64], sizes = [16, 32], strides = [1, 1]} : vector<16x96xf32> to vector<16x32xf32>
    %373 = vector.extract_strided_slice %370 {offsets = [0, 0], sizes = [16, 8], strides = [1, 1]} : vector<16x32xf32> to vector<16x8xf32>
    %374 = vector.extract_strided_slice %370 {offsets = [0, 8], sizes = [16, 8], strides = [1, 1]} : vector<16x32xf32> to vector<16x8xf32>
    %375 = vector.extract_strided_slice %370 {offsets = [0, 16], sizes = [16, 8], strides = [1, 1]} : vector<16x32xf32> to vector<16x8xf32>
    %376 = vector.extract_strided_slice %370 {offsets = [0, 24], sizes = [16, 8], strides = [1, 1]} : vector<16x32xf32> to vector<16x8xf32>
    %377 = tpu.concatenate %373, %374, %375, %376 in 0 : vector<16x8xf32>, vector<16x8xf32>, vector<16x8xf32>, vector<16x8xf32> -> vector<64x8xf32>
    %378 = vector.extract_strided_slice %371 {offsets = [0, 0], sizes = [16, 8], strides = [1, 1]} : vector<16x32xf32> to vector<16x8xf32>
    %379 = vector.extract_strided_slice %371 {offsets = [0, 8], sizes = [16, 8], strides = [1, 1]} : vector<16x32xf32> to vector<16x8xf32>
    %380 = vector.extract_strided_slice %371 {offsets = [0, 16], sizes = [16, 8], strides = [1, 1]} : vector<16x32xf32> to vector<16x8xf32>
    %381 = vector.extract_strided_slice %371 {offsets = [0, 24], sizes = [16, 8], strides = [1, 1]} : vector<16x32xf32> to vector<16x8xf32>
    %382 = tpu.concatenate %378, %379, %380, %381 in 0 : vector<16x8xf32>, vector<16x8xf32>, vector<16x8xf32>, vector<16x8xf32> -> vector<64x8xf32>
    %383 = vector.extract_strided_slice %372 {offsets = [0, 0], sizes = [16, 8], strides = [1, 1]} : vector<16x32xf32> to vector<16x8xf32>
    %384 = vector.extract_strided_slice %372 {offsets = [0, 8], sizes = [16, 8], strides = [1, 1]} : vector<16x32xf32> to vector<16x8xf32>
    %385 = vector.extract_strided_slice %372 {offsets = [0, 16], sizes = [16, 8], strides = [1, 1]} : vector<16x32xf32> to vector<16x8xf32>
    %386 = vector.extract_strided_slice %372 {offsets = [0, 24], sizes = [16, 8], strides = [1, 1]} : vector<16x32xf32> to vector<16x8xf32>
    %387 = tpu.concatenate %383, %384, %385, %386 in 0 : vector<16x8xf32>, vector<16x8xf32>, vector<16x8xf32>, vector<16x8xf32> -> vector<64x8xf32>
    %cst_207 = arith.constant dense<0.000000e+00> : vector<64x64xf32>
    %388 = tpu.matmul %377, %382, %cst_207 {dimension_numbers = #tpu.dot_dimension_numbers<[1], [1], [0], [0], [0, 0, 1, 0], [], []>} : vector<64x8xf32>, vector<64x8xf32>, vector<64x64xf32> -> vector<64x64xf32>
    %389 = arith.addf %388, %344 : vector<64x64xf32>
    %cst_208 = arith.constant dense<0xFF800000> : vector<64xf32>
    %390 = vector.multi_reduction <maximumf>, %389, %cst_208 [1] : vector<64x64xf32> to vector<64xf32>
    %391 = vector.shape_cast %390 : vector<64xf32> to vector<64x1xf32>
    %392 = vector.broadcast %391 : vector<64x1xf32> to vector<64x64xf32>
    %393 = arith.subf %389, %392 : vector<64x64xf32>
    %394 = math.exp %393 : vector<64x64xf32>
    %cst_209 = arith.constant dense<0.000000e+00> : vector<64xf32>
    %395 = vector.multi_reduction <add>, %394, %cst_209 [1] : vector<64x64xf32> to vector<64xf32>
    %396 = vector.shape_cast %395 : vector<64xf32> to vector<64x1xf32>
    %397 = vector.broadcast %396 : vector<64x1xf32> to vector<64x64xf32>
    %398 = arith.divf %394, %397 : vector<64x64xf32>
    %cst_210 = arith.constant dense<0.000000e+00> : vector<64x8xf32>
    %399 = tpu.matmul %398, %387, %cst_210 {dimension_numbers = #tpu.dot_dimension_numbers<[1], [0], [0], [1], [0, 0, 1, 1], [], []>} : vector<64x64xf32>, vector<64x8xf32>, vector<64x8xf32> -> vector<64x8xf32>
    %400 = vector.extract_strided_slice %345 {offsets = [0, 0], sizes = [16, 64], strides = [1, 1]} : vector<64x64xf32> to vector<16x64xf32>
    %cst_211 = arith.constant dense<0.000000e+00> : vector<16x8xf32>
    %401 = tpu.matmul %400, %399, %cst_211 {dimension_numbers = #tpu.dot_dimension_numbers<[1], [0], [0], [1], [0, 0, 1, 1], [], []>} : vector<16x64xf32>, vector<64x8xf32>, vector<16x8xf32> -> vector<16x8xf32>
    %402 = vector.extract_strided_slice %345 {offsets = [16, 0], sizes = [16, 64], strides = [1, 1]} : vector<64x64xf32> to vector<16x64xf32>
    %cst_212 = arith.constant dense<0.000000e+00> : vector<16x8xf32>
    %403 = tpu.matmul %402, %399, %cst_212 {dimension_numbers = #tpu.dot_dimension_numbers<[1], [0], [0], [1], [0, 0, 1, 1], [], []>} : vector<16x64xf32>, vector<64x8xf32>, vector<16x8xf32> -> vector<16x8xf32>
    %404 = vector.extract_strided_slice %345 {offsets = [32, 0], sizes = [16, 64], strides = [1, 1]} : vector<64x64xf32> to vector<16x64xf32>
    %cst_213 = arith.constant dense<0.000000e+00> : vector<16x8xf32>
    %405 = tpu.matmul %404, %399, %cst_213 {dimension_numbers = #tpu.dot_dimension_numbers<[1], [0], [0], [1], [0, 0, 1, 1], [], []>} : vector<16x64xf32>, vector<64x8xf32>, vector<16x8xf32> -> vector<16x8xf32>
    %406 = vector.extract_strided_slice %345 {offsets = [48, 0], sizes = [16, 64], strides = [1, 1]} : vector<64x64xf32> to vector<16x64xf32>
    %cst_214 = arith.constant dense<0.000000e+00> : vector<16x8xf32>
    %407 = tpu.matmul %406, %399, %cst_214 {dimension_numbers = #tpu.dot_dimension_numbers<[1], [0], [0], [1], [0, 0, 1, 1], [], []>} : vector<16x64xf32>, vector<64x8xf32>, vector<16x8xf32> -> vector<16x8xf32>
    %408 = tpu.concatenate %401, %403, %405, %407 in 1 : vector<16x8xf32>, vector<16x8xf32>, vector<16x8xf32>, vector<16x8xf32> -> vector<16x32xf32>
    %cst_215 = arith.constant dense<0.000000e+00> : vector<16x32xf32>
    %409 = tpu.matmul %408, %349, %cst_215 {dimension_numbers = #tpu.dot_dimension_numbers<[1], [0], [0], [1], [0, 0, 1, 1], [], []>} : vector<16x32xf32>, vector<32x32xf32>, vector<16x32xf32> -> vector<16x32xf32>
    %410 = vector.broadcast %350 : vector<1x32xf32> to vector<16x32xf32>
    %411 = arith.addf %409, %410 : vector<16x32xf32>
    %412 = arith.addf %9, %411 : vector<16x32xf32>
    %cst_216 = arith.constant dense<0.000000e+00> : vector<16xf32>
    %413 = vector.multi_reduction <add>, %412, %cst_216 [1] : vector<16x32xf32> to vector<16xf32>
    %414 = vector.shape_cast %413 : vector<16xf32> to vector<16x1xf32>
    %cst_217 = arith.constant 3.200000e+01 : f32
    %415 = vector.broadcast %cst_217 : f32 to vector<16x1xf32>
    %416 = arith.divf %414, %415 : vector<16x1xf32>
    %417 = vector.broadcast %416 : vector<16x1xf32> to vector<16x32xf32>
    %418 = arith.subf %412, %417 : vector<16x32xf32>
    %419 = arith.mulf %418, %418 : vector<16x32xf32>
    %cst_218 = arith.constant dense<0.000000e+00> : vector<16xf32>
    %420 = vector.multi_reduction <add>, %419, %cst_218 [1] : vector<16x32xf32> to vector<16xf32>
    %421 = vector.shape_cast %420 : vector<16xf32> to vector<16x1xf32>
    %cst_219 = arith.constant 3.200000e+01 : f32
    %422 = vector.broadcast %cst_219 : f32 to vector<16x1xf32>
    %423 = arith.divf %421, %422 : vector<16x1xf32>
    %cst_220 = arith.constant 9.99999974E-6 : f32
    %424 = vector.broadcast %cst_220 : f32 to vector<16x1xf32>
    %425 = arith.addf %423, %424 : vector<16x1xf32>
    %426 = math.rsqrt %425 : vector<16x1xf32>
    %427 = vector.broadcast %426 : vector<16x1xf32> to vector<16x32xf32>
    %428 = arith.mulf %418, %427 : vector<16x32xf32>
    %429 = vector.broadcast %351 : vector<1x32xf32> to vector<16x32xf32>
    %430 = arith.mulf %428, %429 : vector<16x32xf32>
    %431 = vector.broadcast %352 : vector<1x32xf32> to vector<16x32xf32>
    %432 = arith.addf %430, %431 : vector<16x32xf32>
    %cst_221 = arith.constant dense<0.000000e+00> : vector<16x32xf32>
    %433 = tpu.matmul %432, %353, %cst_221 {dimension_numbers = #tpu.dot_dimension_numbers<[1], [0], [0], [1], [0, 0, 1, 1], [], []>} : vector<16x32xf32>, vector<32x32xf32>, vector<16x32xf32> -> vector<16x32xf32>
    %434 = vector.broadcast %354 : vector<1x32xf32> to vector<16x32xf32>
    %435 = arith.addf %433, %434 : vector<16x32xf32>
    %cst_222 = arith.constant dense<0.000000e+00> : vector<8x64xf32>
    %436 = tpu.matmul %342, %355, %cst_222 {dimension_numbers = #tpu.dot_dimension_numbers<[1], [0], [0], [1], [0, 0, 1, 1], [], []>} : vector<8x32xf32>, vector<32x64xf32>, vector<8x64xf32> -> vector<8x64xf32>
    %437 = vector.broadcast %356 : vector<1x64xf32> to vector<8x64xf32>
    %438 = arith.addf %436, %437 : vector<8x64xf32>
    %439 = vector.extract_strided_slice %438 {offsets = [0, 0], sizes = [8, 32], strides = [1, 1]} : vector<8x64xf32> to vector<8x32xf32>
    %440 = vector.extract_strided_slice %438 {offsets = [0, 32], sizes = [8, 32], strides = [1, 1]} : vector<8x64xf32> to vector<8x32xf32>
    %441 = vector.extract_strided_slice %435 {offsets = [0, 0], sizes = [16, 8], strides = [1, 1]} : vector<16x32xf32> to vector<16x8xf32>
    %442 = vector.extract_strided_slice %435 {offsets = [0, 8], sizes = [16, 8], strides = [1, 1]} : vector<16x32xf32> to vector<16x8xf32>
    %443 = vector.extract_strided_slice %435 {offsets = [0, 16], sizes = [16, 8], strides = [1, 1]} : vector<16x32xf32> to vector<16x8xf32>
    %444 = vector.extract_strided_slice %435 {offsets = [0, 24], sizes = [16, 8], strides = [1, 1]} : vector<16x32xf32> to vector<16x8xf32>
    %445 = tpu.concatenate %441, %442, %443, %444 in 0 : vector<16x8xf32>, vector<16x8xf32>, vector<16x8xf32>, vector<16x8xf32> -> vector<64x8xf32>
    %446 = vector.extract_strided_slice %439 {offsets = [0, 0], sizes = [8, 8], strides = [1, 1]} : vector<8x32xf32> to vector<8x8xf32>
    %447 = vector.extract_strided_slice %439 {offsets = [0, 8], sizes = [8, 8], strides = [1, 1]} : vector<8x32xf32> to vector<8x8xf32>
    %448 = vector.extract_strided_slice %439 {offsets = [0, 16], sizes = [8, 8], strides = [1, 1]} : vector<8x32xf32> to vector<8x8xf32>
    %449 = vector.extract_strided_slice %439 {offsets = [0, 24], sizes = [8, 8], strides = [1, 1]} : vector<8x32xf32> to vector<8x8xf32>
    %450 = tpu.concatenate %446, %447, %448, %449 in 0 : vector<8x8xf32>, vector<8x8xf32>, vector<8x8xf32>, vector<8x8xf32> -> vector<32x8xf32>
    %451 = vector.extract_strided_slice %440 {offsets = [0, 0], sizes = [8, 8], strides = [1, 1]} : vector<8x32xf32> to vector<8x8xf32>
    %452 = vector.extract_strided_slice %440 {offsets = [0, 8], sizes = [8, 8], strides = [1, 1]} : vector<8x32xf32> to vector<8x8xf32>
    %453 = vector.extract_strided_slice %440 {offsets = [0, 16], sizes = [8, 8], strides = [1, 1]} : vector<8x32xf32> to vector<8x8xf32>
    %454 = vector.extract_strided_slice %440 {offsets = [0, 24], sizes = [8, 8], strides = [1, 1]} : vector<8x32xf32> to vector<8x8xf32>
    %455 = tpu.concatenate %451, %452, %453, %454 in 0 : vector<8x8xf32>, vector<8x8xf32>, vector<8x8xf32>, vector<8x8xf32> -> vector<32x8xf32>
    %cst_223 = arith.constant dense<0.000000e+00> : vector<64x32xf32>
    %456 = tpu.matmul %445, %450, %cst_223 {dimension_numbers = #tpu.dot_dimension_numbers<[1], [1], [0], [0], [0, 0, 1, 0], [], []>} : vector<64x8xf32>, vector<32x8xf32>, vector<64x32xf32> -> vector<64x32xf32>
    %457 = arith.addf %456, %346 : vector<64x32xf32>
    %cst_224 = arith.constant dense<0xFF800000> : vector<64xf32>
    %458 = vector.multi_reduction <maximumf>, %457, %cst_224 [1] : vector<64x32xf32> to vector<64xf32>
    %459 = vector.shape_cast %458 : vector<64xf32> to vector<64x1xf32>
    %460 = vector.broadcast %459 : vector<64x1xf32> to vector<64x32xf32>
    %461 = arith.subf %457, %460 : vector<64x32xf32>
    %462 = math.exp %461 : vector<64x32xf32>
    %cst_225 = arith.constant dense<0.000000e+00> : vector<64xf32>
    %463 = vector.multi_reduction <add>, %462, %cst_225 [1] : vector<64x32xf32> to vector<64xf32>
    %464 = vector.shape_cast %463 : vector<64xf32> to vector<64x1xf32>
    %465 = vector.broadcast %464 : vector<64x1xf32> to vector<64x32xf32>
    %466 = arith.divf %462, %465 : vector<64x32xf32>
    %cst_226 = arith.constant dense<0.000000e+00> : vector<64x8xf32>
    %467 = tpu.matmul %466, %455, %cst_226 {dimension_numbers = #tpu.dot_dimension_numbers<[1], [0], [0], [1], [0, 0, 1, 1], [], []>} : vector<64x32xf32>, vector<32x8xf32>, vector<64x8xf32> -> vector<64x8xf32>
    %468 = vector.extract_strided_slice %467 {offsets = [0, 0], sizes = [16, 8], strides = [1, 1]} : vector<64x8xf32> to vector<16x8xf32>
    %469 = vector.extract_strided_slice %467 {offsets = [16, 0], sizes = [16, 8], strides = [1, 1]} : vector<64x8xf32> to vector<16x8xf32>
    %470 = vector.extract_strided_slice %467 {offsets = [32, 0], sizes = [16, 8], strides = [1, 1]} : vector<64x8xf32> to vector<16x8xf32>
    %471 = vector.extract_strided_slice %467 {offsets = [48, 0], sizes = [16, 8], strides = [1, 1]} : vector<64x8xf32> to vector<16x8xf32>
    %472 = tpu.concatenate %468, %469, %470, %471 in 1 : vector<16x8xf32>, vector<16x8xf32>, vector<16x8xf32>, vector<16x8xf32> -> vector<16x32xf32>
    %cst_227 = arith.constant dense<0.000000e+00> : vector<16x32xf32>
    %473 = tpu.matmul %472, %357, %cst_227 {dimension_numbers = #tpu.dot_dimension_numbers<[1], [0], [0], [1], [0, 0, 1, 1], [], []>} : vector<16x32xf32>, vector<32x32xf32>, vector<16x32xf32> -> vector<16x32xf32>
    %474 = vector.broadcast %358 : vector<1x32xf32> to vector<16x32xf32>
    %475 = arith.addf %473, %474 : vector<16x32xf32>
    %476 = arith.addf %432, %475 : vector<16x32xf32>
    %cst_228 = arith.constant dense<0.000000e+00> : vector<16xf32>
    %477 = vector.multi_reduction <add>, %476, %cst_228 [1] : vector<16x32xf32> to vector<16xf32>
    %478 = vector.shape_cast %477 : vector<16xf32> to vector<16x1xf32>
    %cst_229 = arith.constant 3.200000e+01 : f32
    %479 = vector.broadcast %cst_229 : f32 to vector<16x1xf32>
    %480 = arith.divf %478, %479 : vector<16x1xf32>
    %481 = vector.broadcast %480 : vector<16x1xf32> to vector<16x32xf32>
    %482 = arith.subf %476, %481 : vector<16x32xf32>
    %483 = arith.mulf %482, %482 : vector<16x32xf32>
    %cst_230 = arith.constant dense<0.000000e+00> : vector<16xf32>
    %484 = vector.multi_reduction <add>, %483, %cst_230 [1] : vector<16x32xf32> to vector<16xf32>
    %485 = vector.shape_cast %484 : vector<16xf32> to vector<16x1xf32>
    %cst_231 = arith.constant 3.200000e+01 : f32
    %486 = vector.broadcast %cst_231 : f32 to vector<16x1xf32>
    %487 = arith.divf %485, %486 : vector<16x1xf32>
    %cst_232 = arith.constant 9.99999974E-6 : f32
    %488 = vector.broadcast %cst_232 : f32 to vector<16x1xf32>
    %489 = arith.addf %487, %488 : vector<16x1xf32>
    %490 = math.rsqrt %489 : vector<16x1xf32>
    %491 = vector.broadcast %490 : vector<16x1xf32> to vector<16x32xf32>
    %492 = arith.mulf %482, %491 : vector<16x32xf32>
    %493 = vector.broadcast %359 : vector<1x32xf32> to vector<16x32xf32>
    %494 = arith.mulf %492, %493 : vector<16x32xf32>
    %495 = vector.broadcast %360 : vector<1x32xf32> to vector<16x32xf32>
    %496 = arith.addf %494, %495 : vector<16x32xf32>
    %cst_233 = arith.constant dense<0.000000e+00> : vector<16x32xf32>
    %497 = tpu.matmul %496, %361, %cst_233 {dimension_numbers = #tpu.dot_dimension_numbers<[1], [0], [0], [1], [0, 0, 1, 1], [], []>} : vector<16x32xf32>, vector<32x32xf32>, vector<16x32xf32> -> vector<16x32xf32>
    %498 = vector.broadcast %362 : vector<1x32xf32> to vector<16x32xf32>
    %499 = arith.addf %497, %498 : vector<16x32xf32>
    %cst_234 = arith.constant 0.707106769 : f32
    %500 = vector.broadcast %cst_234 : f32 to vector<16x32xf32>
    %501 = arith.mulf %499, %500 : vector<16x32xf32>
    %502 = math.absf %501 : vector<16x32xf32>
    %cst_235 = arith.constant 0.327591091 : f32
    %503 = vector.broadcast %cst_235 : f32 to vector<16x32xf32>
    %504 = arith.mulf %503, %502 : vector<16x32xf32>
    %cst_236 = arith.constant 1.000000e+00 : f32
    %505 = vector.broadcast %cst_236 : f32 to vector<16x32xf32>
    %506 = arith.addf %505, %504 : vector<16x32xf32>
    %cst_237 = arith.constant 1.000000e+00 : f32
    %507 = vector.broadcast %cst_237 : f32 to vector<16x32xf32>
    %508 = arith.divf %507, %506 : vector<16x32xf32>
    %cst_238 = arith.constant 1.06140542 : f32
    %509 = vector.broadcast %cst_238 : f32 to vector<16x32xf32>
    %510 = arith.mulf %508, %509 : vector<16x32xf32>
    %cst_239 = arith.constant -1.45315206 : f32
    %511 = vector.broadcast %cst_239 : f32 to vector<16x32xf32>
    %512 = arith.addf %511, %510 : vector<16x32xf32>
    %513 = arith.mulf %508, %512 : vector<16x32xf32>
    %cst_240 = arith.constant 1.42141378 : f32
    %514 = vector.broadcast %cst_240 : f32 to vector<16x32xf32>
    %515 = arith.addf %514, %513 : vector<16x32xf32>
    %516 = arith.mulf %508, %515 : vector<16x32xf32>
    %cst_241 = arith.constant -0.284496725 : f32
    %517 = vector.broadcast %cst_241 : f32 to vector<16x32xf32>
    %518 = arith.addf %517, %516 : vector<16x32xf32>
    %519 = arith.mulf %508, %518 : vector<16x32xf32>
    %cst_242 = arith.constant 0.254829586 : f32
    %520 = vector.broadcast %cst_242 : f32 to vector<16x32xf32>
    %521 = arith.addf %520, %519 : vector<16x32xf32>
    %522 = arith.mulf %508, %521 : vector<16x32xf32>
    %cst_243 = arith.constant 0.000000e+00 : f32
    %523 = vector.broadcast %cst_243 : f32 to vector<16x32xf32>
    %524 = arith.subf %523, %502 : vector<16x32xf32>
    %525 = arith.mulf %524, %502 : vector<16x32xf32>
    %526 = math.exp %525 : vector<16x32xf32>
    %527 = arith.mulf %522, %526 : vector<16x32xf32>
    %cst_244 = arith.constant 1.000000e+00 : f32
    %528 = vector.broadcast %cst_244 : f32 to vector<16x32xf32>
    %529 = arith.subf %528, %527 : vector<16x32xf32>
    %cst_245 = arith.constant 0.000000e+00 : f32
    %530 = vector.broadcast %cst_245 : f32 to vector<16x32xf32>
    %531 = arith.cmpf oge, %501, %530 : vector<16x32xf32>
    %cst_246 = arith.constant 0.000000e+00 : f32
    %532 = vector.broadcast %cst_246 : f32 to vector<16x32xf32>
    %533 = arith.subf %532, %529 : vector<16x32xf32>
    %534 = arith.select %531, %529, %533 : vector<16x32xi1>, vector<16x32xf32>
    %cst_247 = arith.constant 5.000000e-01 : f32
    %535 = vector.broadcast %cst_247 : f32 to vector<16x32xf32>
    %536 = arith.mulf %535, %499 : vector<16x32xf32>
    %cst_248 = arith.constant 1.000000e+00 : f32
    %537 = vector.broadcast %cst_248 : f32 to vector<16x32xf32>
    %538 = arith.addf %537, %534 : vector<16x32xf32>
    %539 = arith.mulf %536, %538 : vector<16x32xf32>
    %cst_249 = arith.constant dense<0.000000e+00> : vector<16x32xf32>
    %540 = tpu.matmul %539, %363, %cst_249 {dimension_numbers = #tpu.dot_dimension_numbers<[1], [0], [0], [1], [0, 0, 1, 1], [], []>} : vector<16x32xf32>, vector<32x32xf32>, vector<16x32xf32> -> vector<16x32xf32>
    %541 = vector.broadcast %364 : vector<1x32xf32> to vector<16x32xf32>
    %542 = arith.addf %540, %541 : vector<16x32xf32>
    %543 = arith.addf %496, %542 : vector<16x32xf32>
    %cst_250 = arith.constant dense<0.000000e+00> : vector<16xf32>
    %544 = vector.multi_reduction <add>, %543, %cst_250 [1] : vector<16x32xf32> to vector<16xf32>
    %545 = vector.shape_cast %544 : vector<16xf32> to vector<16x1xf32>
    %cst_251 = arith.constant 3.200000e+01 : f32
    %546 = vector.broadcast %cst_251 : f32 to vector<16x1xf32>
    %547 = arith.divf %545, %546 : vector<16x1xf32>
    %548 = vector.broadcast %547 : vector<16x1xf32> to vector<16x32xf32>
    %549 = arith.subf %543, %548 : vector<16x32xf32>
    %550 = arith.mulf %549, %549 : vector<16x32xf32>
    %cst_252 = arith.constant dense<0.000000e+00> : vector<16xf32>
    %551 = vector.multi_reduction <add>, %550, %cst_252 [1] : vector<16x32xf32> to vector<16xf32>
    %552 = vector.shape_cast %551 : vector<16xf32> to vector<16x1xf32>
    %cst_253 = arith.constant 3.200000e+01 : f32
    %553 = vector.broadcast %cst_253 : f32 to vector<16x1xf32>
    %554 = arith.divf %552, %553 : vector<16x1xf32>
    %cst_254 = arith.constant 9.99999974E-6 : f32
    %555 = vector.broadcast %cst_254 : f32 to vector<16x1xf32>
    %556 = arith.addf %554, %555 : vector<16x1xf32>
    %557 = math.rsqrt %556 : vector<16x1xf32>
    %558 = vector.broadcast %557 : vector<16x1xf32> to vector<16x32xf32>
    %559 = arith.mulf %549, %558 : vector<16x32xf32>
    %560 = vector.broadcast %365 : vector<1x32xf32> to vector<16x32xf32>
    %561 = arith.mulf %559, %560 : vector<16x32xf32>
    %562 = vector.broadcast %366 : vector<1x32xf32> to vector<16x32xf32>
    %563 = arith.addf %561, %562 : vector<16x32xf32>
    %c0_255 = arith.constant 0 : index
    %c0_256 = arith.constant 0 : index
    %564 = vector.load %arg62[%c0_255, %c0_256] : memref<1x32xf32, #tpu.memory_space<vmem>>, vector<1x32xf32>
    %c0_257 = arith.constant 0 : index
    %c0_258 = arith.constant 0 : index
    %565 = vector.load %arg63[%c0_257, %c0_258] : memref<1x32xf32, #tpu.memory_space<vmem>>, vector<1x32xf32>
    %c0_259 = arith.constant 0 : index
    %c0_260 = arith.constant 0 : index
    %566 = vector.load %arg64[%c0_259, %c0_260] : memref<32x4xf32, #tpu.memory_space<vmem>>, vector<32x4xf32>
    %c0_261 = arith.constant 0 : index
    %c0_262 = arith.constant 0 : index
    %567 = vector.load %arg65[%c0_261, %c0_262] : memref<1x4xf32, #tpu.memory_space<vmem>>, vector<1x4xf32>
    %cst_263 = arith.constant dense<0.000000e+00> : vector<16xf32>
    %568 = vector.multi_reduction <add>, %563, %cst_263 [1] : vector<16x32xf32> to vector<16xf32>
    %569 = vector.shape_cast %568 : vector<16xf32> to vector<16x1xf32>
    %cst_264 = arith.constant 3.200000e+01 : f32
    %570 = vector.broadcast %cst_264 : f32 to vector<16x1xf32>
    %571 = arith.divf %569, %570 : vector<16x1xf32>
    %572 = vector.broadcast %571 : vector<16x1xf32> to vector<16x32xf32>
    %573 = arith.subf %563, %572 : vector<16x32xf32>
    %574 = arith.mulf %573, %573 : vector<16x32xf32>
    %cst_265 = arith.constant dense<0.000000e+00> : vector<16xf32>
    %575 = vector.multi_reduction <add>, %574, %cst_265 [1] : vector<16x32xf32> to vector<16xf32>
    %576 = vector.shape_cast %575 : vector<16xf32> to vector<16x1xf32>
    %cst_266 = arith.constant 3.200000e+01 : f32
    %577 = vector.broadcast %cst_266 : f32 to vector<16x1xf32>
    %578 = arith.divf %576, %577 : vector<16x1xf32>
    %cst_267 = arith.constant 9.99999974E-6 : f32
    %579 = vector.broadcast %cst_267 : f32 to vector<16x1xf32>
    %580 = arith.addf %578, %579 : vector<16x1xf32>
    %581 = math.rsqrt %580 : vector<16x1xf32>
    %582 = vector.broadcast %581 : vector<16x1xf32> to vector<16x32xf32>
    %583 = arith.mulf %573, %582 : vector<16x32xf32>
    %584 = vector.broadcast %564 : vector<1x32xf32> to vector<16x32xf32>
    %585 = arith.mulf %583, %584 : vector<16x32xf32>
    %586 = vector.broadcast %565 : vector<1x32xf32> to vector<16x32xf32>
    %587 = arith.addf %585, %586 : vector<16x32xf32>
    %cst_268 = arith.constant dense<0.000000e+00> : vector<16x4xf32>
    %588 = tpu.matmul %587, %566, %cst_268 {dimension_numbers = #tpu.dot_dimension_numbers<[1], [0], [0], [1], [0, 0, 1, 1], [], []>} : vector<16x32xf32>, vector<32x4xf32>, vector<16x4xf32> -> vector<16x4xf32>
    %589 = vector.broadcast %567 : vector<1x4xf32> to vector<16x4xf32>
    %590 = arith.addf %588, %589 : vector<16x4xf32>
    %c0_269 = arith.constant 0 : index
    %c0_270 = arith.constant 0 : index
    %591 = vector.load %arg66[%c0_269, %c0_270] : memref<16x4xf32, #tpu.memory_space<vmem>>, vector<16x4xf32>
    tpu.vector_store %arg66[%c0_269, %c0_270], %590 {strides = array<i32>} : memref<16x4xf32, #tpu.memory_space<vmem>>, vector<16x4xf32>,
    return
  }
}

</mosaic_0001>

<bundles_post_ra>
// kernel: informer_forward.1
= control target key start
LH: loop header
LB: loop body
LE: loop exit
PB: predicated region body
PF: predicated region fallthrough
CT: control target
= control target key end

     0   :  { %s7376_s6 = smov 1   ;;  %s7377_s10 = smov 2   ;;  %s8614_s0 = inlined_call_operand.smem [shape: u32[68], index: -1, kind: input, shape index: {}] }
   0x1   :  { %s7486_s5 = sld [smem:[%s8614_s0]]   ;;  %s7378_s14 = smov 3  }
   0x2   :  { %s7491_s9 = sld [smem:[%s8614_s0 + %s7376_s6]]   ;;  %s7379_s18 = smov 4  }
   0x3   :  { %s7496_s13 = sld [smem:[%s8614_s0 + %s7377_s10]]   ;;  %s7380_s22 = smov 5  }
   0x4   :  { %s7501_s17 = sld [smem:[%s8614_s0 + %s7378_s14]]   ;;  %s7381_s26 = smov 6  }
   0x5   :  { %s7506_s21 = sld [smem:[%s8614_s0 + %s7379_s18]]   ;;  %s7382_s30 = smov 7  }
   0x6   :  { %s7511_s25 = sld [smem:[%s8614_s0 + %s7380_s22]]   ;;  %s7383_s4 = smov 8  }
   0x7   :  { %8651 = sst [smem:[#allocation48_spill]] %s7486_s5  ;;  %s7384_s10 = smov 9  }
   0x8   :  { %8652 = sst [smem:[#allocation49_spill]] %s7491_s9  ;;  %s7385_s15 = smov 10  }
   0x9   :  { %8653 = sst [smem:[#allocation50_spill]] %s7496_s13  ;;  %s7386_s20 = smov 11  }
   0xa   :  { %8654 = sst [smem:[#allocation51_spill]] %s7501_s17  ;;  %s7388_s1 = smov 13  }
   0xb   :  { %8655 = sst [smem:[#allocation52_spill]] %s7506_s21  ;;  %s7389_s7 = smov 14  }
   0xc   :  { %8656 = sst [smem:[#allocation53_spill]] %s7511_s25  ;;  %s7391_s22 = smov 16  }
   0xd   :  { %s7516_s29 = sld [smem:[%s8614_s0 + %s7381_s26]]   ;;  %s7387_s26 = smov 12  }
   0xe   :  { %s7521_s3 = sld [smem:[%s8614_s0 + %s7382_s30]]   ;;  %s7392_s28 = smov 17  }
   0xf   :  { %s7526_s8 = sld [smem:[%s8614_s0 + %s7383_s4]]  }
  0x10   :  { %s7531_s14 = sld [smem:[%s8614_s0 + %s7384_s10]]  }
  0x11   :  { %s7536_s19 = sld [smem:[%s8614_s0 + %s7385_s15]]   ;;  %s7390_s15 = smov 15  }
  0x12   :  { %s7541_s24 = sld [smem:[%s8614_s0 + %s7386_s20]]  }
  0x13   :  { %8657 = sst [smem:[#allocation54_spill]] %s7516_s29 }
  0x14   :  { %8658 = sst [smem:[#allocation55_spill]] %s7521_s3 }
  0x15   :  { %8659 = sst [smem:[#allocation56_spill]] %s7526_s8 }
  0x16   :  { %8660 = sst [smem:[#allocation57_spill]] %s7531_s14 }
  0x17   :  { %8661 = sst [smem:[#allocation58_spill]] %s7536_s19 }
  0x18   :  { %8662 = sst [smem:[#allocation59_spill]] %s7541_s24 }
  0x19   :  { %s7546_s30 = sld [smem:[%s8614_s0 + %s7387_s26]]  }
  0x1a   :  { %s7551_s6 = sld [smem:[%s8614_s0 + %s7388_s1]]  }
  0x1b   :  { %s7556_s12 = sld [smem:[%s8614_s0 + %s7389_s7]]   ;;  %s7393_s7 = smov 18  }
  0x1c   :  { %s7561_s20 = sld [smem:[%s8614_s0 + %s7390_s15]]   ;;  %s7394_s15 = smov 19  }
  0x1d   :  { %s7566_s27 = sld [smem:[%s8614_s0 + %s7391_s22]]   ;;  %s7395_s22 = smov 20  }
  0x1e   :  { %s7571_s4 = sld [smem:[%s8614_s0 + %s7392_s28]]   ;;  %s7396_s28 = smov 21  }
  0x1f   :  { %8663 = sst [smem:[#allocation60_spill]] %s7546_s30 }
  0x20   :  { %8664 = sst [smem:[#allocation61_spill]] %s7551_s6 }
  0x21   :  { %8665 = sst [smem:[#allocation62_spill]] %s7556_s12 }
  0x22   :  { %8666 = sst [smem:[#allocation63_spill]] %s7561_s20 }
  0x23   :  { %8667 = sst [smem:[#allocation64_spill]] %s7566_s27 }
  0x24   :  { %8668 = sst [smem:[#allocation65_spill]] %s7571_s4 }
  0x25   :  { %s7576_s21 = sld [smem:[%s8614_s0 + %s7393_s7]]   ;;  %s7397_s7 = smov 22  }
  0x26   :  { %s7581_s12 = sld [smem:[%s8614_s0 + %s7394_s15]]   ;;  %s7398_s15 = smov 23  }
  0x27   :  { %s7586_s27 = sld [smem:[%s8614_s0 + %s7395_s22]]   ;;  %s7399_s22 = smov 24  }
  0x28   :  { %s7591_s4 = sld [smem:[%s8614_s0 + %s7396_s28]]   ;;  %s7400_s28 = smov 25  }
  0x2b   :  { %8669 = sst [smem:[#allocation66_spill]] %s7576_s21 }
  0x2c   :  { %8670 = sst [smem:[#allocation67_spill]] %s7581_s12 }
  0x2d   :  { %8671 = sst [smem:[#allocation68_spill]] %s7586_s27 }
  0x2e   :  { %8672 = sst [smem:[#allocation69_spill]] %s7591_s4 }
  0x2f   :  { %s7596_s21 = sld [smem:[%s8614_s0 + %s7397_s7]]   ;;  %s7401_s7 = smov 26  }
  0x30   :  { %s7601_s12 = sld [smem:[%s8614_s0 + %s7398_s15]]   ;;  %s7402_s15 = smov 27  }
  0x31   :  { %s7606_s27 = sld [smem:[%s8614_s0 + %s7399_s22]]   ;;  %s7403_s22 = smov 28  }
  0x32   :  { %s7611_s4 = sld [smem:[%s8614_s0 + %s7400_s28]]   ;;  %s7404_s28 = smov 29  }
  0x35   :  { %8673 = sst [smem:[#allocation70_spill]] %s7596_s21 }
  0x36   :  { %8674 = sst [smem:[#allocation71_spill]] %s7601_s12 }
  0x37   :  { %8675 = sst [smem:[#allocation72_spill]] %s7606_s27 }
  0x38   :  { %8676 = sst [smem:[#allocation73_spill]] %s7611_s4 }
  0x39   :  { %s7616_s21 = sld [smem:[%s8614_s0 + %s7401_s7]]   ;;  %s7405_s7 = smov 30  }
  0x3a   :  { %s7621_s12 = sld [smem:[%s8614_s0 + %s7402_s15]]   ;;  %s7406_s15 = smov 31  }
  0x3b   :  { %s7626_s27 = sld [smem:[%s8614_s0 + %s7403_s22]]   ;;  %s7407_s22 = smov 32  }
  0x3c   :  { %s7631_s4 = sld [smem:[%s8614_s0 + %s7404_s28]]   ;;  %s7408_s28 = smov 33  }
  0x3f   :  { %8677 = sst [smem:[#allocation74_spill]] %s7616_s21 }
  0x40   :  { %8678 = sst [smem:[#allocation75_spill]] %s7621_s12 }
  0x41   :  { %8679 = sst [smem:[#allocation76_spill]] %s7626_s27 }
  0x42   :  { %8680 = sst [smem:[#allocation77_spill]] %s7631_s4 }
  0x43   :  { %s7636_s21 = sld [smem:[%s8614_s0 + %s7405_s7]]   ;;  %s7409_s7 = smov 34  }
  0x44   :  { %s7641_s12 = sld [smem:[%s8614_s0 + %s7406_s15]]   ;;  %s7410_s15 = smov 35  }
  0x45   :  { %s7646_s27 = sld [smem:[%s8614_s0 + %s7407_s22]]   ;;  %s7411_s22 = smov 36  }
  0x46   :  { %s7651_s4 = sld [smem:[%s8614_s0 + %s7408_s28]]   ;;  %s7412_s28 = smov 37  }
  0x47   :  { %s7656_s20 = sld [smem:[%s8614_s0 + %s7409_s7]]   ;;  %s7413_s7 = smov 38  }
  0x48   :  { %s7666_s30 = sld [smem:[%s8614_s0 + %s7411_s22]]   ;;  %s7415_s22 = smov 40  }
  0x49   :  { %s7676_s24 = sld [smem:[%s8614_s0 + %s7413_s7]]   ;;  %s7417_s7 = smov 42  }
  0x4a   :  { %8681 = sst [smem:[#allocation78_spill]] %s7641_s12 }
  0x4b   :  { %s7661_s12 = sld [smem:[%s8614_s0 + %s7410_s15]]   ;;  %s7414_s15 = smov 39  }
  0x4c   :  { %8682 = sst [smem:[#allocation79_spill]] %s7651_s4 }
  0x4d   :  { %s7671_s4 = sld [smem:[%s8614_s0 + %s7412_s28]]   ;;  %s7416_s28 = smov 41  }
  0x4e   :  { %s7681_s6 = sld [smem:[%s8614_s0 + %s7414_s15]]   ;;  %s7418_s15 = smov 43  }
  0x4f   :  { %s7686_s19 = sld [smem:[%s8614_s0 + %s7415_s22]]   ;;  %s7419_s22 = smov 44  }
  0x50   :  { %s7691_s14 = sld [smem:[%s8614_s0 + %s7416_s28]]   ;;  %s7420_s28 = smov 45  }
  0x51   :  { %s7696_s29 = sld [smem:[%s8614_s0 + %s7417_s7]]   ;;  %s7421_s7 = smov 46  }
  0x54   :  { %8683 = sst [smem:[#allocation80_spill]] %s7681_s6 }
  0x55   :  { %8684 = sst [smem:[#allocation81_spill]] %s7686_s19 }
  0x56   :  { %8685 = sst [smem:[#allocation82_spill]] %s7691_s14 }
  0x57   :  { %8686 = sst [smem:[#allocation83_spill]] %s7696_s29 }
  0x58   :  { %s7701_s6 = sld [smem:[%s8614_s0 + %s7418_s15]]   ;;  %s7422_s15 = smov 47  }
  0x59   :  { %s7706_s19 = sld [smem:[%s8614_s0 + %s7419_s22]]   ;;  %s7423_s22 = smov 48  }
  0x5a   :  { %s7711_s14 = sld [smem:[%s8614_s0 + %s7420_s28]]   ;;  %s7424_s28 = smov 49  }
  0x5b   :  { %s7716_s29 = sld [smem:[%s8614_s0 + %s7421_s7]]   ;;  %s7425_s7 = smov 50  }
  0x5c   :  { %s7731_s8 = sld [smem:[%s8614_s0 + %s7424_s28]]   ;;  %s7428_s28 = smov 53  }
  0x5d   :  { %s7736_s17 = sld [smem:[%s8614_s0 + %s7425_s7]]   ;;  %s7429_s7 = smov 54  }
  0x5e   :  { %8687 = sst [smem:[#allocation84_spill]] %s7701_s6 }
  0x5f   :  { %8688 = sst [smem:[#allocation85_spill]] %s7706_s19 }
  0x60   :  { %s7721_s6 = sld [smem:[%s8614_s0 + %s7422_s15]]   ;;  %s7426_s15 = smov 51  }
  0x61   :  { %8689 = sst [smem:[#allocation86_spill]] %s7716_s29 }
  0x62   :  { %s7726_s19 = sld [smem:[%s8614_s0 + %s7423_s22]]   ;;  %s7427_s22 = smov 52  }
  0x63   :  { %8691 = sst [smem:[#allocation88_spill]] %s7731_s8 }
  0x64   :  { %8692 = sst [smem:[#allocation89_spill]] %s7736_s17 }
  0x65   :  { %s7741_s9 = sld [smem:[%s8614_s0 + %s7426_s15]]   ;;  %s7430_s15 = smov 55  }
  0x66   :  { %s7751_s8 = sld [smem:[%s8614_s0 + %s7428_s28]]   ;;  %s7432_s28 = smov 57  }
  0x67   :  { %s7756_s17 = sld [smem:[%s8614_s0 + %s7429_s7]]   ;;  %s7433_s7 = smov 58  }
  0x68   :  { %8690 = sst [smem:[#allocation87_spill]] %s7726_s19 }
  0x69   :  { %s7746_s19 = sld [smem:[%s8614_s0 + %s7427_s22]]   ;;  %s7431_s22 = smov 56  }
  0x6a   :  { %s7761_s25 = sld [smem:[%s8614_s0 + %s7430_s15]]   ;;  %s7434_s15 = smov 59  }
  0x6b   :  { %8693 = sst [smem:[#allocation90_spill]] %s7741_s9 }
  0x6c   :  { %s7771_s3 = sld [smem:[%s8614_s0 + %s7432_s28]]   ;;  %s7436_s28 = smov 61  }
  0x6d   :  { %8695 = sst [smem:[#allocation92_spill]] %s7756_s17 }
  0x6e   :  { %s7776_s5 = sld [smem:[%s8614_s0 + %s7433_s7]]   ;;  %s7437_s7 = smov 62  }
  0x6f   :  { %8694 = sst [smem:[#allocation91_spill]] %s7746_s19 }
  0x70   :  { %s7766_s19 = sld [smem:[%s8614_s0 + %s7431_s22]]   ;;  %s7435_s22 = smov 60  }
  0x71   :  { %s7781_s13 = sld [smem:[%s8614_s0 + %s7434_s15]]   ;;  %s7438_s15 = smov 63  }
  0x72   :  { %8697 = sst [smem:[#allocation94_spill]] %s7771_s3 }
  0x73   :  { %s7791_s3 = sld [smem:[%s8614_s0 + %s7436_s28]]   ;;  %s7440_s28 = smov 65  }
  0x74   :  { %8698 = sst [smem:[#allocation95_spill]] %s7776_s5 }
  0x75   :  { %s7796_s5 = sld [smem:[%s8614_s0 + %s7437_s7]]   ;;  %s7441_s7 = smov 66  }
  0x76   :  { %8696 = sst [smem:[#allocation93_spill]] %s7766_s19 }
  0x77   :  { %s7786_s19 = sld [smem:[%s8614_s0 + %s7435_s22]]   ;;  %s7439_s22 = smov 64  }
  0x78   :  { %s7801_s17 = sld [smem:[%s8614_s0 + %s7438_s15]]   ;;  %s7442_s15 = smov 67  }
  0x79   :  { %s7811_s9 = sld [smem:[%s8614_s0 + %s7440_s28]]  }
  0x7a   :  { %s7821_s29 = sld [smem:[%s8614_s0 + %s7442_s15]]  }
  0x7b   :  { %8700 = sst [smem:[#allocation97_spill]] %s7796_s5 }
  0x7c   :  { %s7816_s5 = sld [smem:[%s8614_s0 + %s7441_s7]]  }
  0x7d   :  { %8699 = sst [smem:[#allocation96_spill]] %s7786_s19 }
  0x7e   :  { %s7806_s19 = sld [smem:[%s8614_s0 + %s7439_s22]]  }
  0x7f   :  { %141 = vsyncpa [#allocation3], 0 }
  0x80   :  { %142 = vsyncpa [#allocation6], 0 }
  0x81   :  { %143 = vsyncpa [#allocation9], 0 }
  0x82   :  { %144 = vsyncpa [#allocation12], 0 }
  0x83   :  { %145 = vsyncpa [#allocation15], 0 }
  0x84   :  { %146 = vsyncpa [#allocation18], 0 }
  0x85   :  { %147 = vsyncpa [#allocation21], 0 }
  0x86   :  { %148 = vsyncpa [#allocation24], 0 }
  0x87   :  { %149 = vsyncpa [#allocation27], 0 }
  0x88   :  { %150 = vsyncpa [#allocation30], 0 }
  0x89   :  { %151 = vsyncpa [#allocation33], 0 }
  0x8a   :  { %152 = vsyncpa [#allocation4], 0  ;;  %s7443_s22 = smov [#allocation5]   ;;  %s7444_s26 = smov [#allocation8]  }
  0x8b   :  { %s231_s23 = sshll.u32 %s7443_s22, 4  ;;  %s253_s0 = sshll.u32 %s7444_s26, 4  ;;  %s232_s23 = int_to_ptr.vmem [resolvable:$true] %s231_s23  ;;  %s254_s0 = int_to_ptr.vmem [resolvable:$true] %s253_s0 }
  0x8c   :  { %s6868_s28 = scalar_lea.hbm %s7646_s27, 16 }
  0x8d   :  { %p6869_p0 = scmp.ne.s32.totalorder %s7646_s27, %s6868_s28  ;;  %p6872_p1 = scmp.lt.u32.totalorder %s6868_s28, %s7646_s27 }
  0x8f   :  { %p6874_p2 = pnand %p6872_p1, %p6869_p0 }
  0x91   :  { %6877 = shalt.err (!%p6874_p2)
}
  0x92   :  { %s6878_s1 = scalar_lea.vmem %s232_s23, 16  ;;  %s6882_s2 = scalar_lea.vmem %s232_s23, 32 }
  0x93   :  { %p6879_p3 = scmp.ne.s32.totalorder %s232_s23, %s6878_s1  ;;  %p6883_p4 = scmp.lt.s32.totalorder %s232_s23, %s232_s23 }
  0x94   :  { %p6884_p5 = scmp.lt.s32.totalorder %s6882_s2, %s6878_s1 }
  0x96   :  { %p6885_p6 = por %p6884_p5, %p6883_p4 }
  0x98   :  { %p6886_p7 = pnand %p6885_p6, %p6879_p3 }
  0x9a   :  { %6889 = shalt.err (!%p6886_p7)
}
  0x9b   :  { %234 = dma.hbm_to_vmem [thread:$0]  %s7646_s27, 16, %s232_s23, [#allocation6]  }
  0x9c   :  { %s6890_s7 = scalar_lea.hbm %s7661_s12, 16 }
  0x9d   :  { %p6891_p8 = scmp.ne.s32.totalorder %s7661_s12, %s6890_s7  ;;  %p6894_p9 = scmp.lt.u32.totalorder %s6890_s7, %s7661_s12 }
  0x9f   :  { %p6896_p10 = pnand %p6894_p9, %p6891_p8 }
  0xa1   :  { %6899 = shalt.err (!%p6896_p10)
}
  0xa2   :  { %s6900_s10 = scalar_lea.vmem %s254_s0, 16  ;;  %s6904_s11 = scalar_lea.vmem %s254_s0, 32 }
  0xa3   :  { %p6901_p11 = scmp.ne.s32.totalorder %s254_s0, %s6900_s10  ;;  %p6905_p12 = scmp.lt.s32.totalorder %s254_s0, %s254_s0 }
  0xa4   :  { %p6906_p13 = scmp.lt.s32.totalorder %s6904_s11, %s6900_s10 }
  0xa6   :  { %p6907_p0 = por %p6906_p13, %p6905_p12 }
  0xa8   :  { %p6908_p1 = pnand %p6907_p0, %p6901_p11 }
  0xaa   :  { %6911 = shalt.err (!%p6908_p1)
}
  0xab   :  { %256 = dma.hbm_to_vmem [thread:$0]  %s7661_s12, 16, %s254_s0, [#allocation9]  }
  0xac   :  { %s7445_s15 = smov [#allocation11]   ;;  %s7446_s16 = smov [#allocation14]  }
  0xad   :  { %s273_s27 = sshll.u32 %s7445_s15, 4  ;;  %s305_s18 = sshll.u32 %s7446_s16, 4  ;;  %s274_s27 = int_to_ptr.vmem [resolvable:$true] %s273_s27  ;;  %s306_s18 = int_to_ptr.vmem [resolvable:$true] %s305_s18 }
  0xae   :  { %s6912_s22 = scalar_lea.hbm %s7671_s4, 16 }
  0xaf   :  { %p6913_p2 = scmp.ne.s32.totalorder %s7671_s4, %s6912_s22  ;;  %p6916_p3 = scmp.lt.u32.totalorder %s6912_s22, %s7671_s4 }
  0xb1   :  { %p6918_p4 = pnand %p6916_p3, %p6913_p2 }
  0xb3   :  { %6921 = shalt.err (!%p6918_p4)
}
  0xb4   :  { %s6922_s23 = scalar_lea.vmem %s274_s27, 16  ;;  %s6926_s26 = scalar_lea.vmem %s274_s27, 32 }
  0xb5   :  { %p6923_p5 = scmp.ne.s32.totalorder %s274_s27, %s6922_s23  ;;  %p6927_p6 = scmp.lt.s32.totalorder %s274_s27, %s274_s27 }
  0xb6   :  { %p6928_p7 = scmp.lt.s32.totalorder %s6926_s26, %s6922_s23 }
  0xb8   :  { %p6929_p8 = por %p6928_p7, %p6927_p6 }
  0xba   :  { %p6930_p9 = pnand %p6929_p8, %p6923_p5 }
  0xbc   :  { %6933 = shalt.err (!%p6930_p9)
}
  0xbd   :  { %276 = dma.hbm_to_vmem [thread:$0]  %s7671_s4, 16, %s274_s27, [#allocation12]  }
  0xbe   :  { %s6934_s12 = scalar_lea.hbm %s7711_s14, 16 }
  0xbf   :  { %p6935_p10 = scmp.ne.s32.totalorder %s7711_s14, %s6934_s12  ;;  %p6938_p11 = scmp.lt.u32.totalorder %s6934_s12, %s7711_s14 }
  0xc1   :  { %p6940_p12 = pnand %p6938_p11, %p6935_p10 }
  0xc3   :  { %6943 = shalt.err (!%p6940_p12)
}
  0xc4   :  { %s6944_s0 = scalar_lea.vmem %s306_s18, 16  ;;  %s6948_s28 = scalar_lea.vmem %s306_s18, 32 }
  0xc5   :  { %p6945_p13 = scmp.ne.s32.totalorder %s306_s18, %s6944_s0  ;;  %p6949_p0 = scmp.lt.s32.totalorder %s306_s18, %s306_s18 }
  0xc6   :  { %p6950_p1 = scmp.lt.s32.totalorder %s6948_s28, %s6944_s0 }
  0xc8   :  { %p6951_p2 = por %p6950_p1, %p6949_p0 }
  0xca   :  { %p6952_p3 = pnand %p6951_p2, %p6945_p13 }
  0xcc   :  { %6955 = shalt.err (!%p6952_p3)
}
  0xcd   :  { %308 = dma.hbm_to_vmem [thread:$0]  %s7711_s14, 16, %s306_s18, [#allocation15]  }
  0xce   :  { %s7447_s1 = smov [#allocation17]   ;;  %s7448_s2 = smov [#allocation20]  }
  0xcf   :  { %s325_s4 = sshll.u32 %s7447_s1, 4  ;;  %s353_s7 = sshll.u32 %s7448_s2, 4  ;;  %s326_s4 = int_to_ptr.vmem [resolvable:$true] %s325_s4  ;;  %s354_s7 = int_to_ptr.vmem [resolvable:$true] %s353_s7 }
  0xd0   :  { %s6956_s10 = scalar_lea.hbm %s7721_s6, 16 }
  0xd1   :  { %p6957_p4 = scmp.ne.s32.totalorder %s7721_s6, %s6956_s10  ;;  %p6960_p5 = scmp.lt.u32.totalorder %s6956_s10, %s7721_s6 }
  0xd3   :  { %p6962_p6 = pnand %p6960_p5, %p6957_p4 }
  0xd5   :  { %6965 = shalt.err (!%p6962_p6)
}
  0xd6   :  { %s6966_s11 = scalar_lea.vmem %s326_s4, 16  ;;  %s6970_s15 = scalar_lea.vmem %s326_s4, 32 }
  0xd7   :  { %p6967_p7 = scmp.ne.s32.totalorder %s326_s4, %s6966_s11  ;;  %p6971_p8 = scmp.lt.s32.totalorder %s326_s4, %s326_s4 }
  0xd8   :  { %p6972_p9 = scmp.lt.s32.totalorder %s6970_s15, %s6966_s11 }
  0xda   :  { %p6973_p10 = por %p6972_p9, %p6971_p8 }
  0xdc   :  { %p6974_p11 = pnand %p6973_p10, %p6967_p7 }
  0xde   :  { %6977 = shalt.err (!%p6974_p11)
}
  0xdf   :  { %328 = dma.hbm_to_vmem [thread:$0]  %s7721_s6, 16, %s326_s4, [#allocation18]  }
  0xe0   :  { %s6978_s14 = scalar_lea.hbm %s7751_s8, 16 }
  0xe1   :  { %p6979_p12 = scmp.ne.s32.totalorder %s7751_s8, %s6978_s14  ;;  %p6982_p13 = scmp.lt.u32.totalorder %s6978_s14, %s7751_s8 }
  0xe3   :  { %p6984_p0 = pnand %p6982_p13, %p6979_p12 }
  0xe5   :  { %6987 = shalt.err (!%p6984_p0)
}
  0xe6   :  { %s6988_s27 = scalar_lea.vmem %s354_s7, 16  ;;  %s6992_s16 = scalar_lea.vmem %s354_s7, 32 }
  0xe7   :  { %p6989_p1 = scmp.ne.s32.totalorder %s354_s7, %s6988_s27  ;;  %p6993_p2 = scmp.lt.s32.totalorder %s354_s7, %s354_s7 }
  0xe8   :  { %p6994_p3 = scmp.lt.s32.totalorder %s6992_s16, %s6988_s27 }
  0xea   :  { %p6995_p4 = por %p6994_p3, %p6993_p2 }
  0xec   :  { %p6996_p5 = pnand %p6995_p4, %p6989_p1 }
  0xee   :  { %6999 = shalt.err (!%p6996_p5)
}
  0xef   :  { %356 = dma.hbm_to_vmem [thread:$0]  %s7751_s8, 16, %s354_s7, [#allocation21]  }
  0xf0   :  { %s7449_s18 = smov [#allocation23]   ;;  %s7450_s22 = smov [#allocation26]  }
  0xf1   :  { %s373_s6 = sshll.u32 %s7449_s18, 4  ;;  %s397_s23 = sshll.u32 %s7450_s22, 4  ;;  %s374_s6 = int_to_ptr.vmem [resolvable:$true] %s373_s6  ;;  %s398_s23 = int_to_ptr.vmem [resolvable:$true] %s397_s23 }
  0xf2   :  { %s7000_s26 = scalar_lea.hbm %s7761_s25, 16 }
  0xf3   :  { %p7001_p6 = scmp.ne.s32.totalorder %s7761_s25, %s7000_s26  ;;  %p7004_p7 = scmp.lt.u32.totalorder %s7000_s26, %s7761_s25 }
  0xf5   :  { %p7006_p8 = pnand %p7004_p7, %p7001_p6 }
  0xf7   :  { %7009 = shalt.err (!%p7006_p8)
}
  0xf8   :  { %s7010_s12 = scalar_lea.vmem %s374_s6, 16  ;;  %s7014_s0 = scalar_lea.vmem %s374_s6, 32 }
  0xf9   :  { %p7011_p9 = scmp.ne.s32.totalorder %s374_s6, %s7010_s12  ;;  %p7015_p10 = scmp.lt.s32.totalorder %s374_s6, %s374_s6 }
  0xfa   :  { %p7016_p11 = scmp.lt.s32.totalorder %s7014_s0, %s7010_s12 }
  0xfc   :  { %p7017_p12 = por %p7016_p11, %p7015_p10 }
  0xfe   :  { %p7018_p13 = pnand %p7017_p12, %p7011_p9 }
 0x100   :  { %7021 = shalt.err (!%p7018_p13)
}
 0x101   :  { %376 = dma.hbm_to_vmem [thread:$0]  %s7761_s25, 16, %s374_s6, [#allocation24]  }
 0x102   :  { %s7022_s8 = scalar_lea.hbm %s7781_s13, 16 }
 0x103   :  { %p7023_p0 = scmp.ne.s32.totalorder %s7781_s13, %s7022_s8  ;;  %p7026_p1 = scmp.lt.u32.totalorder %s7022_s8, %s7781_s13 }
 0x105   :  { %p7028_p2 = pnand %p7026_p1, %p7023_p0 }
 0x107   :  { %7031 = shalt.err (!%p7028_p2)
}
 0x108   :  { %s7032_s28 = scalar_lea.vmem %s398_s23, 16  ;;  %s7036_s1 = scalar_lea.vmem %s398_s23, 32 }
 0x109   :  { %p7033_p3 = scmp.ne.s32.totalorder %s398_s23, %s7032_s28  ;;  %p7037_p4 = scmp.lt.s32.totalorder %s398_s23, %s398_s23 }
 0x10a   :  { %p7038_p5 = scmp.lt.s32.totalorder %s7036_s1, %s7032_s28 }
 0x10c   :  { %p7039_p6 = por %p7038_p5, %p7037_p4 }
 0x10e   :  { %p7040_p7 = pnand %p7039_p6, %p7033_p3 }
 0x110   :  { %7043 = shalt.err (!%p7040_p7)
}
 0x111   :  { %400 = dma.hbm_to_vmem [thread:$0]  %s7781_s13, 16, %s398_s23, [#allocation27]  }
 0x112   :  { %s7451_s4 = smov [#allocation29]   ;;  %s7452_s2 = smov [#allocation32]  }
 0x113   :  { %s417_s25 = sshll.u32 %s7451_s4, 4  ;;  %s437_s7 = sshll.u32 %s7452_s2, 4  ;;  %s418_s25 = int_to_ptr.vmem [resolvable:$true] %s417_s25  ;;  %s438_s7 = int_to_ptr.vmem [resolvable:$true] %s437_s7 }
 0x114   :  { %s7044_s10 = scalar_lea.hbm %s7791_s3, 16 }
 0x115   :  { %p7045_p8 = scmp.ne.s32.totalorder %s7791_s3, %s7044_s10  ;;  %p7048_p9 = scmp.lt.u32.totalorder %s7044_s10, %s7791_s3 }
 0x117   :  { %p7050_p10 = pnand %p7048_p9, %p7045_p8 }
 0x119   :  { %7053 = shalt.err (!%p7050_p10)
}
 0x11a   :  { %s7054_s11 = scalar_lea.vmem %s418_s25, 16  ;;  %s7058_s15 = scalar_lea.vmem %s418_s25, 32 }
 0x11b   :  { %p7055_p11 = scmp.ne.s32.totalorder %s418_s25, %s7054_s11  ;;  %p7059_p12 = scmp.lt.s32.totalorder %s418_s25, %s418_s25 }
 0x11c   :  { %p7060_p13 = scmp.lt.s32.totalorder %s7058_s15, %s7054_s11 }
 0x11e   :  { %p7061_p0 = por %p7060_p13, %p7059_p12 }
 0x120   :  { %p7062_p1 = pnand %p7061_p0, %p7055_p11 }
 0x122   :  { %7065 = shalt.err (!%p7062_p1)
}
 0x123   :  { %420 = dma.hbm_to_vmem [thread:$0]  %s7791_s3, 16, %s418_s25, [#allocation30]  }
 0x124   :  { %s7066_s13 = scalar_lea.hbm %s7801_s17, 16 }
 0x125   :  { %p7067_p2 = scmp.ne.s32.totalorder %s7801_s17, %s7066_s13  ;;  %p7070_p3 = scmp.lt.u32.totalorder %s7066_s13, %s7801_s17 }
 0x127   :  { %p7072_p4 = pnand %p7070_p3, %p7067_p2 }
 0x129   :  { %7075 = shalt.err (!%p7072_p4)
}
 0x12a   :  { %s7076_s14 = scalar_lea.vmem %s438_s7, 16  ;;  %s7080_s27 = scalar_lea.vmem %s438_s7, 32 }
 0x12b   :  { %p7077_p5 = scmp.ne.s32.totalorder %s438_s7, %s7076_s14  ;;  %p7081_p6 = scmp.lt.s32.totalorder %s438_s7, %s438_s7 }
 0x12c   :  { %p7082_p7 = scmp.lt.s32.totalorder %s7080_s27, %s7076_s14 }
 0x12e   :  { %p7083_p8 = por %p7082_p7, %p7081_p6 }
 0x130   :  { %p7084_p9 = pnand %p7083_p8, %p7077_p5 }
 0x132   :  { %7087 = shalt.err (!%p7084_p9)
}
 0x133   :  { %440 = dma.hbm_to_vmem [thread:$0]  %s7801_s17, 16, %s438_s7, [#allocation33]  }
 0x134   :  { %s7453_s16 = smov [#allocation2]   ;;  %s7454_s18 = smov [#allocation7]  }
 0x135   :  { %s219_s3 = sshll.u32 %s7453_s16, 4  ;;  %s243_s6 = sshll.u32 %s7454_s18, 4  ;;  %s220_s3 = int_to_ptr.vmem [resolvable:$true] %s219_s3  ;;  %s244_s6 = int_to_ptr.vmem [resolvable:$true] %s243_s6 }
 0x136   :  { %s7088_s22 = scalar_lea.hbm %s7636_s21, 16 }
 0x137   :  { %p7089_p10 = scmp.ne.s32.totalorder %s7636_s21, %s7088_s22  ;;  %p7092_p11 = scmp.lt.u32.totalorder %s7088_s22, %s7636_s21 }
 0x139   :  { %p7094_p12 = pnand %p7092_p11, %p7089_p10 }
 0x13b   :  { %7097 = shalt.err (!%p7094_p12)
}
 0x13c   :  { %s7098_s23 = scalar_lea.vmem %s220_s3, 16  ;;  %s7102_s26 = scalar_lea.vmem %s220_s3, 32 }
 0x13d   :  { %p7099_p13 = scmp.ne.s32.totalorder %s220_s3, %s7098_s23  ;;  %p7103_p0 = scmp.lt.s32.totalorder %s220_s3, %s220_s3 }
 0x13e   :  { %p7104_p1 = scmp.lt.s32.totalorder %s7102_s26, %s7098_s23 }
 0x140   :  { %p7105_p2 = por %p7104_p1, %p7103_p0 }
 0x142   :  { %p7106_p3 = pnand %p7105_p2, %p7099_p13 }
 0x144   :  { %7109 = shalt.err (!%p7106_p3)
}
 0x145   :  { %222 = dma.hbm_to_vmem [thread:$0]  %s7636_s21, 16, %s220_s3, [#allocation3]  }
 0x146   :  { %s7110_s17 = scalar_lea.hbm %s7656_s20, 16 }
 0x147   :  { %p7111_p4 = scmp.ne.s32.totalorder %s7656_s20, %s7110_s17  ;;  %p7114_p5 = scmp.lt.u32.totalorder %s7110_s17, %s7656_s20 }
 0x149   :  { %p7116_p6 = pnand %p7114_p5, %p7111_p4 }
 0x14b   :  { %7119 = shalt.err (!%p7116_p6)
}
 0x14c   :  { %s7120_s12 = scalar_lea.vmem %s244_s6, 16  ;;  %s7124_s0 = scalar_lea.vmem %s244_s6, 32 }
 0x14d   :  { %p7121_p7 = scmp.ne.s32.totalorder %s244_s6, %s7120_s12  ;;  %p7125_p8 = scmp.lt.s32.totalorder %s244_s6, %s244_s6 }
 0x14e   :  { %p7126_p9 = scmp.lt.s32.totalorder %s7124_s0, %s7120_s12 }
 0x150   :  { %p7127_p10 = por %p7126_p9, %p7125_p8 }
 0x152   :  { %p7128_p11 = pnand %p7127_p10, %p7121_p7 }
 0x154   :  { %7131 = shalt.err (!%p7128_p11)
}
 0x155   :  { %246 = dma.hbm_to_vmem [thread:$0]  %s7656_s20, 16, %s244_s6, [#allocation6]  }
 0x156   :  { %s7455_s8 = smov [#allocation10]   ;;  %s7456_s28 = smov [#allocation13]  }
 0x157   :  { %s263_s21 = sshll.u32 %s7455_s8, 4  ;;  %s283_s1 = sshll.u32 %s7456_s28, 4  ;;  %s264_s21 = int_to_ptr.vmem [resolvable:$true] %s263_s21  ;;  %s284_s1 = int_to_ptr.vmem [resolvable:$true] %s283_s1 }
 0x158   :  { %s7132_s4 = scalar_lea.hbm %s7666_s30, 16 }
 0x159   :  { %p7133_p12 = scmp.ne.s32.totalorder %s7666_s30, %s7132_s4  ;;  %p7136_p13 = scmp.lt.u32.totalorder %s7132_s4, %s7666_s30 }
 0x15b   :  { %p7138_p0 = pnand %p7136_p13, %p7133_p12 }
 0x15d   :  { %7141 = shalt.err (!%p7138_p0)
}
 0x15e   :  { %s7142_s25 = scalar_lea.vmem %s264_s21, 16  ;;  %s7146_s2 = scalar_lea.vmem %s264_s21, 32 }
 0x15f   :  { %p7143_p1 = scmp.ne.s32.totalorder %s264_s21, %s7142_s25  ;;  %p7147_p2 = scmp.lt.s32.totalorder %s264_s21, %s264_s21 }
 0x160   :  { %p7148_p3 = scmp.lt.s32.totalorder %s7146_s2, %s7142_s25 }
 0x162   :  { %p7149_p4 = por %p7148_p3, %p7147_p2 }
 0x164   :  { %p7150_p5 = pnand %p7149_p4, %p7143_p1 }
 0x166   :  { %7153 = shalt.err (!%p7150_p5)
}
 0x167   :  { %266 = dma.hbm_to_vmem [thread:$0]  %s7666_s30, 16, %s264_s21, [#allocation9]  }
 0x168   :  { %s7154_s20 = scalar_lea.hbm %s7676_s24, 16 }
 0x169   :  { %p7155_p6 = scmp.ne.s32.totalorder %s7676_s24, %s7154_s20  ;;  %p7158_p7 = scmp.lt.u32.totalorder %s7154_s20, %s7676_s24 }
 0x16b   :  { %p7160_p8 = pnand %p7158_p7, %p7155_p6 }
 0x16d   :  { %7163 = shalt.err (!%p7160_p8)
}
 0x16e   :  { %s7164_s7 = scalar_lea.vmem %s284_s1, 16  ;;  %s7168_s10 = scalar_lea.vmem %s284_s1, 32 }
 0x16f   :  { %p7165_p9 = scmp.ne.s32.totalorder %s284_s1, %s7164_s7  ;;  %p7169_p10 = scmp.lt.s32.totalorder %s284_s1, %s284_s1 }
 0x170   :  { %p7170_p11 = scmp.lt.s32.totalorder %s7168_s10, %s7164_s7 }
 0x172   :  { %p7171_p12 = por %p7170_p11, %p7169_p10 }
 0x174   :  { %p7172_p13 = pnand %p7171_p12, %p7165_p9 }
 0x176   :  { %7175 = shalt.err (!%p7172_p13)
}
 0x177   :  { %s8701_s11 = sld [smem:[#allocation86_spill]]  ;;  %s7457_s15 = smov [#allocation16]  }
 0x178   :  { %286 = dma.hbm_to_vmem [thread:$0]  %s7676_s24, 16, %s284_s1, [#allocation12]  }
 0x179   :  { %s315_s30 = sshll.u32 %s7457_s15, 4  ;;  %s7458_s13 = smov [#allocation19]   ;;  %s316_s30 = int_to_ptr.vmem [resolvable:$true] %s315_s30 }
 0x17a   :  { %s341_s14 = sshll.u32 %s7458_s13, 4  ;;  %s342_s14 = int_to_ptr.vmem [resolvable:$true] %s341_s14 }
 0x17d   :  { %s7176_s27 = scalar_lea.hbm %s8701_s11, 16 }
 0x17e   :  { %p7177_p0 = scmp.ne.s32.totalorder %s8701_s11, %s7176_s27  ;;  %p7180_p1 = scmp.lt.u32.totalorder %s7176_s27, %s8701_s11 }
 0x180   :  { %p7182_p2 = pnand %p7180_p1, %p7177_p0 }
 0x182   :  { %7185 = shalt.err (!%p7182_p2)
}
 0x183   :  { %s7186_s16 = scalar_lea.vmem %s316_s30, 16  ;;  %s7190_s3 = scalar_lea.vmem %s316_s30, 32 }
 0x184   :  { %p7187_p3 = scmp.ne.s32.totalorder %s316_s30, %s7186_s16  ;;  %p7191_p4 = scmp.lt.s32.totalorder %s316_s30, %s316_s30 }
 0x185   :  { %p7192_p5 = scmp.lt.s32.totalorder %s7190_s3, %s7186_s16 }
 0x187   :  { %p7193_p6 = por %p7192_p5, %p7191_p4 }
 0x189   :  { %p7194_p7 = pnand %p7193_p6, %p7187_p3 }
 0x18b   :  { %7197 = shalt.err (!%p7194_p7)
}
 0x18c   :  { %s8702_s24 = sld [smem:[#allocation90_spill]] }
 0x18d   :  { %318 = dma.hbm_to_vmem [thread:$0]  %s8701_s11, 16, %s316_s30, [#allocation15]  }
 0x192   :  { %s7198_s18 = scalar_lea.hbm %s8702_s24, 16 }
 0x193   :  { %p7199_p8 = scmp.ne.s32.totalorder %s8702_s24, %s7198_s18  ;;  %p7202_p9 = scmp.lt.u32.totalorder %s7198_s18, %s8702_s24 }
 0x195   :  { %p7204_p10 = pnand %p7202_p9, %p7199_p8 }
 0x197   :  { %7207 = shalt.err (!%p7204_p10)
}
 0x198   :  { %s7208_s6 = scalar_lea.vmem %s342_s14, 16  ;;  %s7212_s22 = scalar_lea.vmem %s342_s14, 32 }
 0x199   :  { %p7209_p11 = scmp.ne.s32.totalorder %s342_s14, %s7208_s6  ;;  %p7213_p12 = scmp.lt.s32.totalorder %s342_s14, %s342_s14 }
 0x19a   :  { %p7214_p13 = scmp.lt.s32.totalorder %s7212_s22, %s7208_s6 }
 0x19c   :  { %p7215_p0 = por %p7214_p13, %p7213_p12 }
 0x19e   :  { %p7216_p1 = pnand %p7215_p0, %p7209_p11 }
 0x1a0   :  { %7219 = shalt.err (!%p7216_p1)
}
 0x1a1   :  { %s8703_s23 = sld [smem:[#allocation92_spill]]  ;;  %s7459_s26 = smov [#allocation22]  }
 0x1a2   :  { %344 = dma.hbm_to_vmem [thread:$0]  %s8702_s24, 16, %s342_s14, [#allocation18]  }
 0x1a3   :  { %s363_s17 = sshll.u32 %s7459_s26, 4  ;;  %s7460_s12 = smov [#allocation25]   ;;  %s364_s17 = int_to_ptr.vmem [resolvable:$true] %s363_s17 }
 0x1a4   :  { %s385_s0 = sshll.u32 %s7460_s12, 4  ;;  %s386_s0 = int_to_ptr.vmem [resolvable:$true] %s385_s0 }
 0x1a7   :  { %s7220_s8 = scalar_lea.hbm %s8703_s23, 16 }
 0x1a8   :  { %p7221_p2 = scmp.ne.s32.totalorder %s8703_s23, %s7220_s8  ;;  %p7224_p3 = scmp.lt.u32.totalorder %s7220_s8, %s8703_s23 }
 0x1aa   :  { %p7226_p4 = pnand %p7224_p3, %p7221_p2 }
 0x1ac   :  { %7229 = shalt.err (!%p7226_p4)
}
 0x1ad   :  { %s7230_s21 = scalar_lea.vmem %s364_s17, 16  ;;  %s7234_s28 = scalar_lea.vmem %s364_s17, 32 }
 0x1ae   :  { %p7231_p5 = scmp.ne.s32.totalorder %s364_s17, %s7230_s21  ;;  %p7235_p6 = scmp.lt.s32.totalorder %s364_s17, %s364_s17 }
 0x1af   :  { %p7236_p7 = scmp.lt.s32.totalorder %s7234_s28, %s7230_s21 }
 0x1b1   :  { %p7237_p8 = por %p7236_p7, %p7235_p6 }
 0x1b3   :  { %p7238_p9 = pnand %p7237_p8, %p7231_p5 }
 0x1b5   :  { %7241 = shalt.err (!%p7238_p9)
}
 0x1b6   :  { %s8704_s1 = sld [smem:[#allocation94_spill]] }
 0x1b7   :  { %366 = dma.hbm_to_vmem [thread:$0]  %s8703_s23, 16, %s364_s17, [#allocation21]  }
 0x1bc   :  { %s7242_s4 = scalar_lea.hbm %s8704_s1, 16 }
 0x1bd   :  { %p7243_p10 = scmp.ne.s32.totalorder %s8704_s1, %s7242_s4  ;;  %p7246_p11 = scmp.lt.u32.totalorder %s7242_s4, %s8704_s1 }
 0x1bf   :  { %p7248_p12 = pnand %p7246_p11, %p7243_p10 }
 0x1c1   :  { %7251 = shalt.err (!%p7248_p12)
}
 0x1c2   :  { %s7252_s25 = scalar_lea.vmem %s386_s0, 16  ;;  %s7256_s2 = scalar_lea.vmem %s386_s0, 32 }
 0x1c3   :  { %p7253_p13 = scmp.ne.s32.totalorder %s386_s0, %s7252_s25  ;;  %p7257_p0 = scmp.lt.s32.totalorder %s386_s0, %s386_s0 }
 0x1c4   :  { %p7258_p1 = scmp.lt.s32.totalorder %s7256_s2, %s7252_s25 }
 0x1c6   :  { %p7259_p2 = por %p7258_p1, %p7257_p0 }
 0x1c8   :  { %p7260_p3 = pnand %p7259_p2, %p7253_p13 }
 0x1ca   :  { %7263 = shalt.err (!%p7260_p3)
}
 0x1cb   :  { %s8705_s20 = sld [smem:[#allocation96_spill]]  ;;  %s7461_s7 = smov [#allocation28]  }
 0x1cc   :  { %388 = dma.hbm_to_vmem [thread:$0]  %s8704_s1, 16, %s386_s0, [#allocation24]  }
 0x1cd   :  { %s407_s10 = sshll.u32 %s7461_s7, 4  ;;  %s7462_s11 = smov [#allocation31]   ;;  %s408_s10 = int_to_ptr.vmem [resolvable:$true] %s407_s10 }
 0x1ce   :  { %s427_s15 = sshll.u32 %s7462_s11, 4  ;;  %s428_s15 = int_to_ptr.vmem [resolvable:$true] %s427_s15 }
 0x1d1   :  { %s7264_s30 = scalar_lea.hbm %s8705_s20, 16 }
 0x1d2   :  { %p7265_p4 = scmp.ne.s32.totalorder %s8705_s20, %s7264_s30  ;;  %p7268_p5 = scmp.lt.u32.totalorder %s7264_s30, %s8705_s20 }
 0x1d4   :  { %p7270_p6 = pnand %p7268_p5, %p7265_p4 }
 0x1d6   :  { %7273 = shalt.err (!%p7270_p6)
}
 0x1d7   :  { %s7274_s13 = scalar_lea.vmem %s408_s10, 16  ;;  %s7278_s14 = scalar_lea.vmem %s408_s10, 32 }
 0x1d8   :  { %p7275_p7 = scmp.ne.s32.totalorder %s408_s10, %s7274_s13  ;;  %p7279_p8 = scmp.lt.s32.totalorder %s408_s10, %s408_s10 }
 0x1d9   :  { %p7280_p9 = scmp.lt.s32.totalorder %s7278_s14, %s7274_s13 }
 0x1db   :  { %p7281_p10 = por %p7280_p9, %p7279_p8 }
 0x1dd   :  { %p7282_p11 = pnand %p7281_p10, %p7275_p7 }
 0x1df   :  { %7285 = shalt.err (!%p7282_p11)
}
 0x1e0   :  { %s8706_s27 = sld [smem:[#allocation97_spill]] }
 0x1e1   :  { %410 = dma.hbm_to_vmem [thread:$0]  %s8705_s20, 16, %s408_s10, [#allocation27]  }
 0x1e6   :  { %s7286_s16 = scalar_lea.hbm %s8706_s27, 16 }
 0x1e7   :  { %p7287_p12 = scmp.ne.s32.totalorder %s8706_s27, %s7286_s16  ;;  %p7290_p13 = scmp.lt.u32.totalorder %s7286_s16, %s8706_s27 }
 0x1e9   :  { %p7292_p0 = pnand %p7290_p13, %p7287_p12 }
 0x1eb   :  { %7295 = shalt.err (!%p7292_p0)
}
 0x1ec   :  { %s7296_s3 = scalar_lea.vmem %s428_s15, 16  ;;  %s7300_s24 = scalar_lea.vmem %s428_s15, 32 }
 0x1ed   :  { %p7297_p1 = scmp.ne.s32.totalorder %s428_s15, %s7296_s3  ;;  %p7301_p2 = scmp.lt.s32.totalorder %s428_s15, %s428_s15 }
 0x1ee   :  { %p7302_p3 = scmp.lt.s32.totalorder %s7300_s24, %s7296_s3 }
 0x1f0   :  { %p7303_p4 = por %p7302_p3, %p7301_p2 }
 0x1f2   :  { %p7304_p5 = pnand %p7303_p4, %p7297_p1 }
 0x1f4   :  { %7307 = shalt.err (!%p7304_p5)
}
 0x1f5   :  { %430 = dma.hbm_to_vmem [thread:$0]  %s8706_s27, 16, %s428_s15, [#allocation30]  }
 0x1f6   :  { %s7463_s18 = smov [#allocation34]   ;;  %s7308_s22 = scalar_lea.hbm %s7811_s9, 16 }
 0x1f7   :  { %s449_s6 = sshll.u32 %s7463_s18, 4  ;;  %p7309_p6 = scmp.ne.s32.totalorder %s7811_s9, %s7308_s22  ;;  %s450_s6 = int_to_ptr.vmem [resolvable:$true] %s449_s6 }
 0x1f8   :  { %p7312_p7 = scmp.lt.u32.totalorder %s7308_s22, %s7811_s9 }
 0x1fa   :  { %p7314_p8 = pnand %p7312_p7, %p7309_p6 }
 0x1fc   :  { %7317 = shalt.err (!%p7314_p8)
}
 0x1fd   :  { %s7318_s23 = scalar_lea.vmem %s450_s6, 16  ;;  %s7322_s26 = scalar_lea.vmem %s450_s6, 32 }
 0x1fe   :  { %p7319_p9 = scmp.ne.s32.totalorder %s450_s6, %s7318_s23  ;;  %p7323_p10 = scmp.lt.s32.totalorder %s450_s6, %s450_s6 }
 0x1ff   :  { %p7324_p11 = scmp.lt.s32.totalorder %s7322_s26, %s7318_s23 }
 0x201   :  { %p7325_p12 = por %p7324_p11, %p7323_p10 }
 0x203   :  { %p7326_p13 = pnand %p7325_p12, %p7319_p9 }
 0x205   :  { %7329 = shalt.err (!%p7326_p13)
}
 0x206   :  { %452 = dma.hbm_to_vmem [thread:$0]  %s7811_s9, 16, %s450_s6, [#allocation33]  }
 0x207   :  { %7352 = dma.done.wait [#allocation3], 16  }
 0x208   :  { %7353 = vsyncadd [#allocation3], 4294967280 }
 0x209   :  { %7354 = dma.done.wait [#allocation6], 32  }
 0x20a   :  { %7355 = vsyncadd [#allocation6], 4294967264 }
 0x20b   :  { %7356 = dma.done.wait [#allocation9], 32  }
 0x20c   :  { %7357 = vsyncadd [#allocation9], 4294967264 }
 0x20d   :  { %7358 = dma.done.wait [#allocation12], 32  }
 0x20e   :  { %7359 = vsyncadd [#allocation12], 4294967264 }
 0x20f   :  { %7360 = dma.done.wait [#allocation15], 32  }
 0x210   :  { %7361 = vsyncadd [#allocation15], 4294967264 }
 0x211   :  { %7362 = dma.done.wait [#allocation18], 32  }
 0x212   :  { %7363 = vsyncadd [#allocation18], 4294967264 }
 0x213   :  { %7364 = dma.done.wait [#allocation21], 32  }
 0x214   :  { %7365 = vsyncadd [#allocation21], 4294967264 }
 0x215   :  { %7366 = dma.done.wait [#allocation24], 32  }
 0x216   :  { %7367 = vsyncadd [#allocation24], 4294967264 }
 0x217   :  { %7368 = dma.done.wait [#allocation27], 32  }
 0x218   :  { %7369 = vsyncadd [#allocation27], 4294967264 }
 0x219   :  { %7370 = dma.done.wait [#allocation30], 32  }
 0x21a   :  { %7371 = vsyncadd [#allocation30], 4294967264 }
 0x21b   :  { %7372 = dma.done.wait [#allocation33], 32  }
 0x21c   :  { %7373 = vsyncadd [#allocation33], 4294967264  ;;  %s8707_s9 = sld [smem:[#allocation50_spill]]  ;;  %s8708_s17 = sld [smem:[#allocation48_spill]]  ;;  %vm529_vm0 = vcmask 1043456   ;;  %vm522_vm1 = vcmask 97280  }
 0x21d   :  { %s8709_s12 = sld [smem:[#allocation55_spill]]  ;;  %vm7464_vm2 = vmmov 1   ;;  %s8712_s0 = sld [smem:[#allocation53_spill]]  ;;  %vm736_vm4 = vcmask 261120   ;;  %vm848_vm5 = vcmask 64512   ;;  %vm986_vm7 = vcmask 523264  }
 0x21e   :  { %vm7907_vm3 = vmpackc.low %vm529_vm0, %vm7464_vm2  ;;  %s8713_s8 = sld [smem:[#allocation49_spill]]  ;;  %s8714_s21 = sld [smem:[#allocation51_spill]]  ;;  %vm1254_vm8 = vcmask 130048   ;;  %vm1257_vm9 = vcmask 195584   ;;  %vm1872_vm12 = vcmask 785408   ;;  %vm7475_vm13 = vmmov 0  }
 0x21f   :  { %s8715_s28 = sld [smem:[#allocation56_spill]]  ;;  %s7465_s1 = smov 112   ;;  %vm7971_vm6 = vmpackc.low %vm848_vm5, %vm848_vm5 }
 0x220   :  { %s7466_s4 = smov 120   ;;  %s7467_s25 = smov 104  }
 0x221   :  { %s7468_s2 = smov 96   ;;  %s8718_s20 = sld [smem:[#allocation54_spill]] }
 0x222   :  { %v520_v1 = vld [vmem:[%s8707_s9] sm:$0xff]  ;;  %v521_v2 = vld [vmem:[%s8707_s9 + $0x8] sm:$0xf]  ;;  %s7469_s7 = smov 64   ;;  %s8719_s10 = sld [smem:[#allocation57_spill]] }
 0x223   :  { %v516_v3 = vld [vmem:[%s8708_s17] sm:$0xff]  ;;  %v6135_v4 = vpack.c.bf16 %v521_v2, %v520_v1  ;;  %v707_v6 = vld [vmem:[%s8709_s12 + $0x8] sm:$0xff]  ;;  %v708_v9 = vld [vmem:[%s8709_s12 + $0x10] sm:$0xff]  ;;  %s7470_s11 = smov 8   ;;  %s7471_s15 = smov 16  }
 0x224   :  { %5631 = vmatprep.mubr.msk.f32.mxu0 %vm522_vm1, %v516_v3  ;;  %v706_v5 = vld [vmem:[%s8709_s12] sm:$0xff]  ;;  %v517_v8 = vld [vmem:[%s8708_s17 + $0x8] sm:$0xff]  ;;  %v709_v10 = vld [vmem:[%s8709_s12 + $0x18] sm:$0xff]  ;;  %s7472_s30 = smov 24   ;;  %s8720_s13 = sld [smem:[#allocation58_spill]] }
 0x225   :  { %v6147_v7 = vpack.c.bf16 %v707_v6, %v706_v5  ;;  %6137 = vmatprep.subr.msk.bf16.mxu0 %vm7907_vm3, %v6135_v4  ;;  %v6151_v11 = vpack.c.bf16 %v709_v10, %v708_v9  ;;  %v612_v12 = vld [vmem:[%s8712_s0] sm:$0xff]  ;;  %v613_v13 = vld [vmem:[%s8712_s0 + $0x8] sm:$0xf]  ;;  %s8721_s14 = sld [smem:[#allocation61_spill]]  ;;  %s8722_s27 = sld [smem:[#allocation59_spill]] }
 0x226   :  { %6140 = vmatpush3.bf16.msk.msra.mxu0 %vm7907_vm3, %v6135_v4  ;;  %v6141_v14 = vpack.c.bf16 %v613_v13, %v612_v12  ;;  %v518_v15 = vld [vmem:[%s8713_s8] sm:$0xff]  ;;  %v519_v16 = vld [vmem:[%s8713_s8 + $0x8] sm:$0xff]  ;;  %s8723_s16 = sld [smem:[#allocation60_spill]]  ;;  %s8724_s3 = sld [smem:[#allocation63_spill]] }
 0x227   :  { %6148 = vmatprep.subr.bf16.mxu0 %v6147_v7  ;;  %v608_v21 = vld [vmem:[%s8714_s21] sm:$0xff]  ;;  %v609_v22 = vld [vmem:[%s8714_s21 + $0x8] sm:$0xff]  ;;  %v700_v0 = vld [vmem:[%s8718_s20 + $0x10] sm:$0xff]  ;;  %s8725_s24 = sld [smem:[#allocation62_spill]]  ;;  %s8726_s18 = sld [smem:[#allocation64_spill]] }
 0x228   :  { %6143 = vmatprep.subr.msk.bf16.mxu1 %vm7907_vm3, %v6141_v14  ;;  %5638 = vmatprep.mubr.msk.f32.mxu1 %vm522_vm1, %v608_v21  ;;  %v5192_v23 = vld [vmem:[%s8715_s28] ss:$0 sm:$0xff]  ;;  %v699_v57 = vld [vmem:[%s8718_s20 + $0x8] sm:$0xff]  ;;  %v701_v3 = vld [vmem:[%s8718_s20 + $0x18] sm:$0xff]  ;;  %s8727_s6 = sld [smem:[#allocation67_spill]]  ;;  %s8728_s22 = sld [smem:[#allocation68_spill]] }
 0x229   :  { %5632 = vmatmul.mubr.msk.f32.vlgmr.msra.gmra.mrb[0].mxu0 %vm522_vm1, %v517_v8  ;;  %6146 = vmatpush3.bf16.msk.msra.mxu1 %vm7907_vm3, %v6141_v14  ;;  %v698_v58 = vld [vmem:[%s8718_s20] sm:$0xff]  ;;  %v703_v10 = vld [vmem:[%s8718_s20 + $0x28] sm:$0xff]  ;;  %v704_v13 = vld [vmem:[%s8718_s20 + $0x30] sm:$0xff]  ;;  %s8729_s23 = sld [smem:[#allocation65_spill]]  ;;  %s8730_s26 = sld [smem:[#allocation66_spill]] }
 0x22a   :  { %6150 = vmatpush3.bf16.msra.mxu0 %v6147_v7  ;;  %v702_v6 = vld [vmem:[%s8718_s20 + $0x20] sm:$0xff]  ;;  %s8731_s9 = sld [smem:[#allocation69_spill]]  ;;  %s7473_s17 = smov 32  }
 0x22b   :  { %6152 = vmatprep.subr.bf16.mxu0 %v6151_v11  ;;  %s8732_s12 = sld [smem:[#allocation70_spill]]  ;;  %s8733_s0 = sld [smem:[#allocation71_spill]] }
 0x22c   :  { %5639 = vmatmul.mubr.msk.f32.vlgmr.msra.gmra.mrb[0].mxu1 %vm522_vm1, %v609_v22  ;;  %s8734_s8 = sld [smem:[#allocation73_spill]]  ;;  %s8735_s21 = sld [smem:[#allocation74_spill]] }
 0x22d   :  { %s8736_s28 = sld [smem:[#allocation72_spill]] }
 0x22e   :  { %6154 = vmatpush3.bf16.msra.mxu0 %v6151_v11 }
 0x2fc   :  { %v5633_v17 = vpop.f32.mrb[0].mxu0 }
 0x2fd   :  { %v599_v18 = vpop.f32.mrb[1].mxu0  ;;  %v7935_v20 = vadd.f32 %v5633_v17, %v519_v16 }
 0x2fe   :  { %v7933_v19 = vadd.f32 %v599_v18, %v518_v15  ;;  %v705_v18 = vld [vmem:[%s8718_s20 + $0x38] sm:$0xff]  ;;  %s8737_s20 = sld [smem:[#allocation75_spill]] }
 0x2ff   :  { %v7979_v43 = vpop.f32.mrb[0].mxu1 }
 0x300   :  { %5649 = vmatprep.mubr.msk.f32.mxu0 %vm736_vm4, %v7933_v19  ;;  %v7981_v44 = vpop.f32.mrb[1].mxu1 }
 0x301   :  { %5650 = vmatmul.mubr.msk.f32.vlgmr.msra.gmra.mrb[2].mxu0 %vm736_vm4, %v7935_v20 }
 0x3d4   :  { %v5651_v24 = vpop.f32.mrb[2].mxu0 }
 0x3d5   :  { %v809_v25 = vpop.f32.mrb[3].mxu0  ;;  %v815_v27 = vadd.f32 %v5651_v24, %v5192_v23 }
 0x3d6   :  { %v810_v26 = vadd.f32 %v5192_v23, %v809_v25 }
 0x3d8   :  { %824 = vrot.lane.b32.xlu1 %v810_v26, %s7465_s1  ;;  %820 = vrot.lane.b32.xlu0 %v810_v26, %s7466_s4  ;;  %v7953_v28 = vpack.i.bf16 %v815_v27, %v810_v26 }
 0x3d9   :  { %5668 = vmatprep.mubr.msk.f32.mxu1 %vm848_vm5, %v810_v26 }
 0x3dc   :  { %826 = vrot.lane.b32.xlu1 %v815_v27, %s7465_s1  ;;  %822 = vrot.lane.b32.xlu0 %v815_v27, %s7466_s4 }
 0x3e0   :  { %830 = vrot.lane.b32.xlu1 %v815_v27, %s7467_s25  ;;  %828 = vrot.lane.b32.xlu0 %v810_v26, %s7467_s25 }
 0x3e4   :  { %6593 = vrot.lane.b32.xlu0 %v7953_v28, %s7468_s2 }
 0x44a   :  { %v825_v29 = vpop.permute.xlu1 %824  ;;  %v821_v30 = vpop.permute.xlu0 %820 }
 0x44e   :  { %v827_v31 = vpop.permute.xlu1 %826  ;;  %v823_v32 = vpop.permute.xlu0 %822 }
 0x44f   :  { %v7957_v33 = vpack.i.bf16 %v827_v31, %v825_v29  ;;  %v7959_v34 = vpack.i.bf16 %v823_v32, %v821_v30 }
 0x451   :  { %6603 = vrot.lane.b32.xlu0 %v7957_v33, %s7468_s2  ;;  %6598 = vrot.lane.b32.xlu1 %v7959_v34, %s7468_s2 }
 0x452   :  { %v831_v35 = vpop.permute.xlu1 %830  ;;  %v829_v36 = vpop.permute.xlu0 %828 }
 0x453   :  { %v7965_v37 = vpack.i.bf16 %v831_v35, %v829_v36 }
 0x455   :  { %6608 = vrot.lane.b32.xlu1 %v7965_v37, %s7468_s2 }
 0x456   :  { %v6594_v38 = vpop.permute.xlu0 %6593 }
 0x457   :  { %v6596_v39 = vunpack.i.h.bf16 %v6594_v38  ;;  %v6595_v40 = vunpack.i.l.bf16 %v6594_v38 }
 0x459   :  { %v6155_v42 = vpack.c.bf16 %v6596_v39, %v6595_v40 }
 0x45b   :  { %6157 = vmatprep.subr.msk.bf16.mxu1 %vm7971_vm6, %v6155_v42 }
 0x45c   :  { %6160 = vmatpush3.bf16.xpose.msk.msra.mxu1 %vm7971_vm6, %v6155_v42 }
 0x4c3   :  { %v6599_v45 = vpop.permute.xlu1 %6598  ;;  %v6604_v46 = vpop.permute.xlu0 %6603 }
 0x4c4   :  { %v6601_v47 = vunpack.i.h.bf16 %v6599_v45  ;;  %v6600_v48 = vunpack.i.l.bf16 %v6599_v45  ;;  %v6606_v49 = vunpack.i.h.bf16 %v6604_v46  ;;  %v6605_v50 = vunpack.i.l.bf16 %v6604_v46 }
 0x4c6   :  { %v6161_v51 = vpack.c.bf16 %v6601_v47, %v6600_v48  ;;  %v6167_v52 = vpack.c.bf16 %v6606_v49, %v6605_v50 }
 0x4c7   :  { %v6609_v53 = vpop.permute.xlu1 %6608 }
 0x4c8   :  { %6163 = vmatprep.subr.msk.bf16.mxu1 %vm7971_vm6, %v6161_v51  ;;  %v6611_v54 = vunpack.i.h.bf16 %v6609_v53  ;;  %v6610_v55 = vunpack.i.l.bf16 %v6609_v53 }
 0x4c9   :  { %6166 = vmatpush3.bf16.xpose.msk.msra.mxu1 %vm7971_vm6, %v6161_v51 }
 0x4ca   :  { %6169 = vmatprep.subr.msk.bf16.mxu1 %vm7971_vm6, %v6167_v52  ;;  %v6173_v56 = vpack.c.bf16 %v6611_v54, %v6610_v55 }
 0x4d1   :  { %6172 = vmatpush3.bf16.xpose.msk.msra.mxu1 %vm7971_vm6, %v6167_v52 }
 0x4d2   :  { %6175 = vmatprep.subr.msk.bf16.mxu1 %vm7971_vm6, %v6173_v56 }
 0x4d9   :  { %6178 = vmatpush3.bf16.xpose.msk.msra.mxu1 %vm7971_vm6, %v6173_v56 }
 0x4e0   :  { %5669 = vmatmul.mubr.msk.f32.vlgmr.msra.gmra.mrb[2].mxu1 %vm848_vm5, %v815_v27 }
 0x4e1   :  { %5671 = vmatprep.mubr.msk.f32.mxu1 %vm848_vm5, %v821_v30 }
 0x4e4   :  { %5672 = vmatmul.mubr.msk.f32.gmra.mrb[4].mxu1 %vm848_vm5, %v823_v32 }
 0x4e5   :  { %5674 = vmatprep.mubr.msk.f32.mxu1 %vm848_vm5, %v825_v29 }
 0x4e8   :  { %5675 = vmatmul.mubr.msk.f32.gmra.mrb[6].mxu1 %vm848_vm5, %v827_v31 }
 0x4e9   :  { %5677 = vmatprep.mubr.msk.f32.mxu1 %vm848_vm5, %v829_v36 }
 0x4ec   :  { %5678 = vmatmul.mubr.msk.f32.gmra.mrb[8].mxu1 %vm848_vm5, %v831_v35 }
 0x5b3   :  { %v5670_v59 = vpop.f32.mrb[2].mxu1 }
 0x5b4   :  { %v953_v60 = vadd.f32 %v5670_v59, %v699_v57  ;;  %v947_v61 = vpop.f32.mrb[3].mxu1 }
 0x5b5   :  { %v948_v62 = vadd.f32 %v947_v61, %v698_v58 }
 0x5b6   :  { %v990_v63 = vsel %vm986_vm7, %v953_v60, -inf }
 0x5b7   :  { %991 = vmax.xlane.f32.xlu1 %v990_v63  ;;  %v5673_v1 = vpop.f32.mrb[4].mxu1  ;;  %v987_v2 = vsel %vm986_vm7, %v948_v62, -inf }
 0x5b8   :  { %v957_v4 = vpop.f32.mrb[5].mxu1  ;;  %988 = vmax.xlane.f32.xlu0 %v987_v2  ;;  %v963_v7 = vadd.f32 %v5673_v1, %v701_v3 }
 0x5b9   :  { %v958_v5 = vadd.f32 %v957_v4, %v700_v0 }
 0x5ba   :  { %v996_v17 = vsel %vm986_vm7, %v963_v7, -inf }
 0x5bb   :  { %v5676_v8 = vpop.f32.mrb[6].mxu1  ;;  %v993_v9 = vsel %vm986_vm7, %v958_v5, -inf }
 0x5bc   :  { %v967_v11 = vpop.f32.mrb[7].mxu1  ;;  %994 = vmax.xlane.f32.xlu0 %v993_v9  ;;  %v973_v14 = vadd.f32 %v5676_v8, %v703_v10 }
 0x5bd   :  { %v968_v12 = vadd.f32 %v967_v11, %v702_v6 }
 0x5be   :  { %v1002_v25 = vsel %vm986_vm7, %v973_v14, -inf }
 0x5bf   :  { %v5679_v15 = vpop.f32.mrb[8].mxu1  ;;  %v999_v16 = vsel %vm986_vm7, %v968_v12, -inf }
 0x5c0   :  { %v977_v21 = vpop.f32.mrb[9].mxu1  ;;  %1000 = vmax.xlane.f32.xlu1 %v999_v16  ;;  %997 = vmax.xlane.f32.xlu0 %v996_v17  ;;  %v983_v23 = vadd.f32 %v5679_v15, %v705_v18 }
 0x5c1   :  { %v978_v22 = vadd.f32 %v977_v21, %v704_v13 }
 0x5c2   :  { %v1008_v26 = vsel %vm986_vm7, %v983_v23, -inf }
 0x5c3   :  { %v1005_v24 = vsel %vm986_vm7, %v978_v22, -inf }
 0x5c4   :  { %1006 = vmax.xlane.f32.xlu1 %v1005_v24  ;;  %1003 = vmax.xlane.f32.xlu0 %v1002_v25 }
 0x5c8   :  { %1009 = vmax.xlane.f32.xlu0 %v1008_v26 }
 0x5d5   :  { %6613 = vrot.lane.b32.xlu1 %v7953_v28, %s7469_s7 }
 0x644   :  { %v992_v27 = vpop.xlane.xlu1 %991 }
 0x645   :  { %v1012_v29 = vsub.f32 %v953_v60, %v992_v27  ;;  %v989_v30 = vpop.xlane.xlu0 %988 }
 0x646   :  { %v1011_v31 = vsub.f32 %v948_v62, %v989_v30 }
 0x647   :  { %v1021_v32 = vmul.f32 1.442695, %v1012_v29 }
 0x648   :  { %v1019_v35 = vmul.f32 1.442695, %v1011_v31 }
 0x649   :  { %6702 = vpow2.f32 %v1021_v32  ;;  %v995_v36 = vpop.xlane.xlu0 %994 }
 0x64a   :  { %6704 = vpow2.f32 %v1019_v35  ;;  %v1013_v38 = vsub.f32 %v958_v5, %v995_v36 }
 0x64c   :  { %v1023_v39 = vmul.f32 1.442695, %v1013_v38 }
 0x64d   :  { %v1001_v40 = vpop.xlane.xlu1 %1000  ;;  %v998_v42 = vpop.xlane.xlu0 %997 }
 0x64e   :  { %6706 = vpow2.f32 %v1023_v39  ;;  %v1015_v45 = vsub.f32 %v968_v12, %v1001_v40  ;;  %v1014_v46 = vsub.f32 %v963_v7, %v998_v42 }
 0x650   :  { %v1027_v47 = vmul.f32 1.442695, %v1015_v45  ;;  %v1025_v48 = vmul.f32 1.442695, %v1014_v46 }
 0x651   :  { %v1007_v49 = vpop.xlane.xlu1 %1006  ;;  %v1004_v28 = vpop.xlane.xlu0 %1003 }
 0x652   :  { %6708 = vpow2.f32 %v1027_v47  ;;  %v1016_v50 = vsub.f32 %v973_v14, %v1004_v28  ;;  %v1017_v55 = vsub.f32 %v978_v22, %v1007_v49 }
 0x653   :  { %v8020_v51 = vpop.eup %6702  ;;  %6710 = vpow2.f32 %v1025_v48 }
 0x654   :  { %v6705_v52 = vpop.eup %6704  ;;  %v1029_v53 = vmul.f32 1.442695, %v1016_v50  ;;  %v1038_v54 = vsel %vm986_vm7, %v8020_v51, 0.0  ;;  %v1031_v1 = vmul.f32 1.442695, %v1017_v55  ;;  %v712_v55 = vld [vmem:[%s8719_s10 + $0x8] sm:$0xff] }
 0x655   :  { %v6614_v56 = vpop.permute.xlu1 %6613  ;;  %1039 = vadd.xlane.f32.xlu0 %v1038_v54  ;;  %v1010_v57 = vpop.xlane.xlu0 %1009  ;;  %v1035_v58 = vsel %vm986_vm7, %v6705_v52, 0.0  ;;  %v711_v54 = vld [vmem:[%s8719_s10] sm:$0xff] }
 0x656   :  { %v6616_v59 = vunpack.i.h.bf16 %v6614_v56  ;;  %v6615_v60 = vunpack.i.l.bf16 %v6614_v56  ;;  %v1018_v61 = vsub.f32 %v983_v23, %v1010_v57  ;;  %1036 = vadd.xlane.f32.xlu1 %v1035_v58  ;;  %6712 = vpow2.f32 %v1029_v53  ;;  %v713_v57 = vld [vmem:[%s8719_s10 + $0x10] sm:$0xff]  ;;  %v714_v58 = vld [vmem:[%s8719_s10 + $0x18] sm:$0xff]  ;;  %s8738_s10 = sld [smem:[#allocation76_spill]] }
 0x657   :  { %v6195_v56 = vpack.c.bf16 %v712_v55, %v711_v54 }
 0x658   :  { %v8025_v62 = vpop.eup %6706  ;;  %v1033_v63 = vmul.f32 1.442695, %v1018_v61  ;;  %v6179_v0 = vpack.c.bf16 %v6616_v59, %v6615_v60  ;;  %v6199_v59 = vpack.c.bf16 %v714_v58, %v713_v57 }
 0x659   :  { %v1041_v2 = vsel %vm986_vm7, %v8025_v62, 0.0 }
 0x65a   :  { %6714 = vpow2.f32 %v1033_v63  ;;  %6180 = vmatprep.subr.bf16.mxu0 %v6179_v0  ;;  %1042 = vadd.xlane.f32.xlu1 %v1041_v2 }
 0x65b   :  { %6182 = vmatpush3.bf16.msra.mxu0 %v6179_v0  ;;  %6716 = vpow2.f32 %v1031_v1 }
 0x65c   :  { %v8029_v3 = vpop.eup %6708 }
 0x65d   :  { %v8031_v4 = vpop.eup %6710  ;;  %v1047_v5 = vsel %vm986_vm7, %v8029_v3, 0.0 }
 0x65e   :  { %1048 = vadd.xlane.f32.xlu1 %v1047_v5  ;;  %v1044_v6 = vsel %vm986_vm7, %v8031_v4, 0.0 }
 0x65f   :  { %1045 = vadd.xlane.f32.xlu0 %v1044_v6 }
 0x660   :  { %v8037_v7 = vpop.eup %6712 }
 0x661   :  { %v1050_v8 = vsel %vm986_vm7, %v8037_v7, 0.0 }
 0x663   :  { %1051 = vadd.xlane.f32.xlu0 %v1050_v8 }
 0x664   :  { %v8041_v9 = vpop.eup %6714 }
 0x665   :  { %v1056_v10 = vsel %vm986_vm7, %v8041_v9, 0.0  ;;  %v6717_v11 = vpop.eup %6716 }
 0x666   :  { %v1053_v12 = vsel %vm986_vm7, %v6717_v11, 0.0 }
 0x667   :  { %1057 = vadd.xlane.f32.xlu0 %v1056_v10 }
 0x66b   :  { %1054 = vadd.xlane.f32.xlu0 %v1053_v12 }
 0x66f   :  { %6623 = vrot.lane.b32.xlu1 %v7957_v33, %s7469_s7 }
 0x673   :  { %6628 = vrot.lane.b32.xlu1 %v7965_v37, %s7469_s7 }
 0x681   :  { %6618 = vrot.lane.b32.xlu0 %v7959_v34, %s7469_s7 }
 0x6e2   :  { %v1040_v14 = vpop.xlane.xlu0 %1039 }
 0x6e3   :  { %v1037_v13 = vpop.xlane.xlu1 %1036 }
 0x6e4   :  { %6718 = vrcp.f32 %v1037_v13 }
 0x6e5   :  { %6720 = vrcp.f32 %v1040_v14 }
 0x6e7   :  { %v1043_v15 = vpop.xlane.xlu1 %1042 }
 0x6e8   :  { %6722 = vrcp.f32 %v1043_v15 }
 0x6eb   :  { %v1049_v22 = vpop.xlane.xlu1 %1048 }
 0x6ec   :  { %v1046_v16 = vpop.xlane.xlu0 %1045 }
 0x6ed   :  { %6724 = vrcp.f32 %v1046_v16  ;;  %v5219_v16 = vld [vmem:[%s8720_s13] ss:$0 sm:$0xff]  ;;  %s8739_s13 = sld [smem:[#allocation78_spill]] }
 0x6ee   :  { %v6719_v17 = vpop.eup %6718  ;;  %6726 = vrcp.f32 %v1049_v22 }
 0x6ef   :  { %v1060_v18 = vmul.f32 %v6719_v17, %v6705_v52  ;;  %v6624_v24 = vpop.permute.xlu1 %6623  ;;  %v6721_v38 = vpop.eup %6720 }
 0x6f0   :  { %v1052_v21 = vpop.xlane.xlu0 %1051  ;;  %v6626_v26 = vunpack.i.h.bf16 %v6624_v24  ;;  %v6625_v37 = vunpack.i.l.bf16 %v6624_v24  ;;  %v1062_v40 = vmul.f32 %v6721_v38, %v8020_v51  ;;  %v720_v38 = vld [vmem:[%s8721_s14 + $0x10] sm:$0xff] }
 0x6f1   :  { %5696 = vmatprep.mubr.msk.f32.mxu0 %vm986_vm7, %v1060_v18  ;;  %6728 = vrcp.f32 %v1052_v21 }
 0x6f2   :  { %v6187_v35 = vpack.c.bf16 %v6626_v26, %v6625_v37  ;;  %v6723_v39 = vpop.eup %6722 }
 0x6f3   :  { %v6629_v34 = vpop.permute.xlu1 %6628  ;;  %v1064_v45 = vmul.f32 %v6723_v39, %v8025_v62 }
 0x6f4   :  { %v1058_v23 = vpop.xlane.xlu0 %1057  ;;  %v6631_v31 = vunpack.i.h.bf16 %v6629_v34  ;;  %v6630_v32 = vunpack.i.l.bf16 %v6629_v34 }
 0x6f6   :  { %v6191_v36 = vpack.c.bf16 %v6631_v31, %v6630_v32 }
 0x6f7   :  { %v6725_v42 = vpop.eup %6724 }
 0x6f8   :  { %v1055_v33 = vpop.xlane.xlu0 %1054  ;;  %v6727_v46 = vpop.eup %6726  ;;  %v1066_v47 = vmul.f32 %v6725_v42, %v8031_v4 }
 0x6f9   :  { %6730 = vrcp.f32 %v1055_v33  ;;  %v1068_v49 = vmul.f32 %v6727_v46, %v8029_v3 }
 0x6fa   :  { %6732 = vrcp.f32 %v1058_v23 }
 0x6fb   :  { %v6729_v48 = vpop.eup %6728 }
 0x6fc   :  { %v6619_v25 = vpop.permute.xlu0 %6618  ;;  %v1070_v50 = vmul.f32 %v6729_v48, %v8037_v7 }
 0x6fd   :  { %v6621_v27 = vunpack.i.h.bf16 %v6619_v25  ;;  %v6620_v29 = vunpack.i.l.bf16 %v6619_v25 }
 0x6ff   :  { %v6183_v30 = vpack.c.bf16 %v6621_v27, %v6620_v29 }
 0x701   :  { %6184 = vmatprep.subr.bf16.mxu0 %v6183_v30 }
 0x702   :  { %6186 = vmatpush3.bf16.msra.mxu0 %v6183_v30 }
 0x703   :  { %6188 = vmatprep.subr.bf16.mxu0 %v6187_v35  ;;  %v6731_v28 = vpop.eup %6730 }
 0x704   :  { %v6733_v51 = vpop.eup %6732  ;;  %v1072_v52 = vmul.f32 %v6731_v28, %v6717_v11 }
 0x705   :  { %v1074_v53 = vmul.f32 %v6733_v51, %v8041_v9  ;;  %v5222_v51 = vld [vmem:[%s8722_s27] ss:$0 sm:$0xff]  ;;  %s8741_s27 = sld [smem:[#allocation77_spill]] }
 0x706   :  { %6190 = vmatpush3.bf16.msra.mxu0 %v6187_v35  ;;  %v718_v35 = vld [vmem:[%s8721_s14] sm:$0xff] }
 0x707   :  { %6192 = vmatprep.subr.bf16.mxu0 %v6191_v36 }
 0x70a   :  { %6194 = vmatpush3.bf16.msra.mxu0 %v6191_v36  ;;  %v719_v36 = vld [vmem:[%s8721_s14 + $0x8] sm:$0xff] }
 0x70b   :  { %6196 = vmatprep.subr.bf16.mxu0 %v6195_v56  ;;  %v6203_v39 = vpack.c.bf16 %v719_v36, %v718_v35 }
 0x70d   :  { %5697 = vmatmul.mubr.msk.f32.vlgmr.msra.gmra.mrb[4].mxu0 %vm986_vm7, %v1062_v40  ;;  %v721_v40 = vld [vmem:[%s8721_s14 + $0x18] sm:$0xff]  ;;  %s8740_s14 = sld [smem:[#allocation83_spill]] }
 0x70e   :  { %5699 = vmatprep.mubr.msk.f32.mxu0 %vm986_vm7, %v1064_v45  ;;  %6198 = vmatpush3.bf16.msra.mxu0 %v6195_v56  ;;  %v6207_v42 = vpack.c.bf16 %v721_v40, %v720_v38 }
 0x70f   :  { %6200 = vmatprep.subr.bf16.mxu0 %v6199_v59 }
 0x711   :  { %5700 = vmatmul.mubr.msk.f32.gmra.mrb[6].mxu0 %vm986_vm7, %v1066_v47 }
 0x712   :  { %5702 = vmatprep.mubr.msk.f32.mxu0 %vm986_vm7, %v1068_v49  ;;  %6202 = vmatpush3.bf16.msra.mxu0 %v6199_v59 }
 0x713   :  { %6204 = vmatprep.subr.bf16.mxu0 %v6203_v39 }
 0x715   :  { %5703 = vmatmul.mubr.msk.f32.gmra.mrb[8].mxu0 %vm986_vm7, %v1070_v50 }
 0x716   :  { %5705 = vmatprep.mubr.msk.f32.mxu0 %vm986_vm7, %v1072_v52 }
 0x719   :  { %5706 = vmatmul.mubr.msk.f32.gmra.mrb[10].mxu0 %vm986_vm7, %v1074_v53  ;;  %v5223_v53 = vld [vmem:[%s8723_s16] ss:$0 sm:$0xff]  ;;  %s8742_s16 = sld [smem:[#allocation52_spill]] }
 0x7e0   :  { %v5698_v60 = vpop.f32.mrb[4].mxu0 }
 0x7e1   :  { %v1189_v61 = vpop.f32.mrb[5].mxu0 }
 0x7e4   :  { %v5701_v62 = vpop.f32.mrb[6].mxu0 }
 0x7e5   :  { %1232 = vrot.lane.b32.xlu1 %v5701_v62, %s7470_s11  ;;  %v1199_v63 = vpop.f32.mrb[7].mxu0 }
 0x7e8   :  { %v5704_v0 = vpop.f32.mrb[8].mxu0 }
 0x7e9   :  { %1230 = vrot.lane.b32.xlu1 %v1199_v63, %s7470_s11  ;;  %v1209_v1 = vpop.f32.mrb[9].mxu0  ;;  %v725_v63 = vld [vmem:[%s8724_s3 + $0x10] sm:$0xff] }
 0x7ea   :  { %1238 = vrot.lane.b32.xlu0 %v1209_v1, %s7471_s15 }
 0x7ec   :  { %v5707_v2 = vpop.f32.mrb[10].mxu0 }
 0x7ed   :  { %1240 = vrot.lane.b32.xlu1 %v5704_v0, %s7471_s15  ;;  %v1219_v3 = vpop.f32.mrb[11].mxu0  ;;  %v726_v0 = vld [vmem:[%s8724_s3 + $0x18] sm:$0xff] }
 0x7ee   :  { %1246 = vrot.lane.b32.xlu0 %v1219_v3, %s7472_s30  ;;  %v6215_v1 = vpack.c.bf16 %v726_v0, %v725_v63 }
 0x7f1   :  { %1248 = vrot.lane.b32.xlu1 %v5707_v2, %s7472_s30  ;;  %v5224_v2 = vld [vmem:[%s8725_s24] ss:$0 sm:$0xff]  ;;  %s8744_s24 = sld [smem:[#allocation84_spill]] }
 0x857   :  { %v1233_v4 = vpop.permute.xlu1 %1232 }
 0x858   :  { %v1253_v12 = vsel %vm848_vm5, %v5698_v60, %v1233_v4  ;;  %v723_v60 = vld [vmem:[%s8724_s3] sm:$0xff] }
 0x85b   :  { %v1231_v5 = vpop.permute.xlu1 %1230 }
 0x85c   :  { %v1239_v6 = vpop.permute.xlu0 %1238  ;;  %v1252_v7 = vsel %vm848_vm5, %v1189_v61, %v1231_v5  ;;  %v724_v61 = vld [vmem:[%s8724_s3 + $0x8] sm:$0xff]  ;;  %s8743_s3 = sld [smem:[#allocation79_spill]] }
 0x85d   :  { %v1255_v9 = vsel %vm1254_vm8, %v1252_v7, %v1239_v6  ;;  %v6211_v62 = vpack.c.bf16 %v724_v61, %v723_v60 }
 0x85f   :  { %v1241_v8 = vpop.permute.xlu1 %1240  ;;  %6212 = vmatprep.subr.bf16.mxu1 %v6211_v62 }
 0x860   :  { %v1247_v10 = vpop.permute.xlu0 %1246  ;;  %v1256_v13 = vsel %vm1254_vm8, %v1253_v12, %v1241_v8  ;;  %6214 = vmatpush3.bf16.msra.mxu1 %v6211_v62  ;;  %v5227_v62 = vld [vmem:[%s8726_s18] ss:$0 sm:$0xff]  ;;  %s8745_s18 = sld [smem:[#allocation80_spill]] }
 0x861   :  { %v1258_v11 = vsel %vm1257_vm9, %v1255_v9, %v1247_v10  ;;  %6216 = vmatprep.subr.bf16.mxu1 %v6215_v1 }
 0x862   :  { %5716 = vmatprep.mubr.msk.f32.mxu0 %vm736_vm4, %v1258_v11 }
 0x863   :  { %v1249_v14 = vpop.permute.xlu1 %1248 }
 0x864   :  { %v1259_v15 = vsel %vm1257_vm9, %v1256_v13, %v1249_v14  ;;  %6218 = vmatpush3.bf16.msra.mxu1 %v6215_v1 }
 0x865   :  { %5717 = vmatmul.mubr.msk.f32.vlgmr.msra.gmra.mrb[12].mxu0 %vm736_vm4, %v1259_v15 }
 0x866   :  { %6206 = vmatpush3.bf16.msra.mxu0 %v6203_v39 }
 0x867   :  { %6208 = vmatprep.subr.bf16.mxu0 %v6207_v42 }
 0x86a   :  { %6210 = vmatpush3.bf16.msra.mxu0 %v6207_v42 }
 0x938   :  { %v5718_v17 = vpop.f32.mrb[12].mxu0 }
 0x939   :  { %v1344_v18 = vadd.f32 %v5718_v17, %v5219_v16  ;;  %v1338_v21 = vpop.f32.mrb[13].mxu0 }
 0x93a   :  { %v1339_v22 = vadd.f32 %v5219_v16, %v1338_v21 }
 0x93b   :  { %v1348_v23 = vadd.f32 %v1344_v18, %v7935_v20 }
 0x93c   :  { %v1347_v24 = vadd.f32 %v1339_v22, %v7933_v19 }
 0x93d   :  { %v1352_v33 = vsel %vm736_vm4, %v1348_v23, 0.0 }
 0x93e   :  { %1353 = vadd.xlane.f32.xlu1 %v1352_v33  ;;  %v1349_v25 = vsel %vm736_vm4, %v1347_v24, 0.0 }
 0x93f   :  { %1350 = vadd.xlane.f32.xlu0 %v1349_v25 }
 0x9cb   :  { %v1354_v26 = vpop.xlane.xlu1 %1353 }
 0x9cc   :  { %v1357_v37 = vmul.f32 0.03125, %v1354_v26  ;;  %v1351_v27 = vpop.xlane.xlu0 %1350 }
 0x9cd   :  { %v1356_v29 = vmul.f32 0.03125, %v1351_v27 }
 0x9ce   :  { %v1359_v34 = vsub.f32 %v1348_v23, %v1357_v37 }
 0x9cf   :  { %v1358_v30 = vsub.f32 %v1347_v24, %v1356_v29 }
 0x9d0   :  { %v1361_v19 = vmul.f32 %v1359_v34, %v1359_v34 }
 0x9d1   :  { %v1360_v31 = vmul.f32 %v1358_v30, %v1358_v30 }
 0x9d2   :  { %v1365_v32 = vsel %vm736_vm4, %v1361_v19, 0.0 }
 0x9d3   :  { %v1362_v20 = vsel %vm736_vm4, %v1360_v31, 0.0 }
 0x9d4   :  { %1363 = vadd.xlane.f32.xlu0 %v1362_v20 }
 0x9d8   :  { %1366 = vadd.xlane.f32.xlu0 %v1365_v32 }
 0xa61   :  { %v1364_v45 = vpop.xlane.xlu0 %1363 }
 0xa62   :  { %v1368_v46 = vmul.f32 0.03125, %v1364_v45 }
 0xa64   :  { %v1370_v47 = vadd.f32 1e-05, %v1368_v46 }
 0xa65   :  { %v1367_v48 = vpop.xlane.xlu0 %1366 }
 0xa66   :  { %6734 = vrsqrt.f32 %v1370_v47  ;;  %v1369_v49 = vmul.f32 0.03125, %v1367_v48 }
 0xa68   :  { %v1371_v28 = vadd.f32 1e-05, %v1369_v49 }
 0xa6a   :  { %6736 = vrsqrt.f32 %v1371_v28 }
 0xa70   :  { %v6735_v50 = vpop.eup %6734 }
 0xa71   :  { %v1374_v52 = vmul.f32 %v6735_v50, %v1358_v30 }
 0xa73   :  { %v1382_v54 = vmul.f32 %v5222_v51, %v1374_v52 }
 0xa74   :  { %v6737_v55 = vpop.eup %6736 }
 0xa75   :  { %v1375_v56 = vmul.f32 %v6737_v55, %v1359_v34  ;;  %v8097_v57 = vadd.f32 %v5223_v53, %v1382_v54 }
 0xa77   :  { %v1383_v58 = vmul.f32 %v5222_v51, %v1375_v56  ;;  %5727 = vmatprep.mubr.msk.f32.mxu0 %vm736_vm4, %v8097_v57 }
 0xa79   :  { %v8101_v59 = vadd.f32 %v5223_v53, %v1383_v58 }
 0xa7b   :  { %5728 = vmatmul.mubr.msk.f32.vlgmr.msra.gmra.mrb[14].mxu0 %vm736_vm4, %v8101_v59 }
 0xb4e   :  { %v5729_v3 = vpop.f32.mrb[14].mxu0 }
 0xb4f   :  { %v1476_v4 = vadd.f32 %v5729_v3, %v5224_v2  ;;  %v1470_v5 = vpop.f32.mrb[15].mxu0 }
 0xb50   :  { %v1471_v6 = vadd.f32 %v5224_v2, %v1470_v5 }
 0xb51   :  { %v1480_v7 = vmul.f32 0.70710677, %v1476_v4  ;;  %v1528_v58 = vmul.f32 0.5, %v1476_v4 }
 0xb52   :  { %v1479_v8 = vmul.f32 0.70710677, %v1471_v6  ;;  %v1527_v55 = vmul.f32 0.5, %v1471_v6 }
 0xb53   :  { %v1482_v9 = vand.u32 2147483647, %v1480_v7  ;;  %vm1522_vm10 = vcmp.ge.f32.partialorder %v1480_v7, 0.0 }
 0xb54   :  { %v1481_v10 = vand.u32 2147483647, %v1479_v8  ;;  %vm1521_vm11 = vcmp.ge.f32.partialorder %v1479_v8, 0.0 }
 0xb55   :  { %v1484_v11 = vmul.f32 0.3275911, %v1482_v9  ;;  %v1510_v15 = vsub.f32 0.0, %v1482_v9 }
 0xb56   :  { %v1483_v12 = vmul.f32 0.3275911, %v1481_v10  ;;  %v1509_v16 = vsub.f32 0.0, %v1481_v10 }
 0xb57   :  { %v1486_v13 = vadd.f32 1.0, %v1484_v11  ;;  %v1512_v18 = vmul.f32 %v1510_v15, %v1482_v9  ;;  %v1664_v15 = vld [vmem:[%s8727_s6] sm:$0xff] }
 0xb58   :  { %v1485_v14 = vadd.f32 1.0, %v1483_v12  ;;  %v1511_v23 = vmul.f32 %v1509_v16, %v1481_v10  ;;  %v1666_v16 = vld [vmem:[%s8728_s22] sm:$0xff]  ;;  %5745 = vmatprep.mubr.msk.f32.mxu0 %vm1254_vm8, %v1664_v15 }
 0xb59   :  { %6738 = vrcp.f32 %v1486_v13  ;;  %v1515_v25 = vmul.f32 1.442695, %v1512_v18 }
 0xb5a   :  { %6740 = vrcp.f32 %v1485_v14  ;;  %v1513_v27 = vmul.f32 1.442695, %v1511_v23 }
 0xb5b   :  { %6742 = vpow2.f32 %v1515_v25  ;;  %v5230_v25 = vld [vmem:[%s8729_s23] ss:$0 sm:$0xff]  ;;  %s8749_s23 = sld [smem:[#allocation87_spill]] }
 0xb5c   :  { %6744 = vpow2.f32 %v1513_v27  ;;  %v5231_v27 = vld [vmem:[%s8730_s26] ss:$0 sm:$0xff]  ;;  %s8750_s26 = sld [smem:[#allocation88_spill]] }
 0xb63   :  { %v6739_v17 = vpop.eup %6738 }
 0xb64   :  { %v6741_v21 = vpop.eup %6740  ;;  %v1492_v22 = vmul.f32 1.0614054, %v6739_v17 }
 0xb65   :  { %v1491_v24 = vmul.f32 1.0614054, %v6741_v21  ;;  %v6743_v42 = vpop.eup %6742 }
 0xb66   :  { %v1494_v33 = vadd.f32 -1.4531521, %v1492_v22  ;;  %v6745_v46 = vpop.eup %6744 }
 0xb67   :  { %v1493_v26 = vadd.f32 -1.4531521, %v1491_v24 }
 0xb68   :  { %v1496_v37 = vmul.f32 %v6739_v17, %v1494_v33 }
 0xb69   :  { %v1495_v29 = vmul.f32 %v6741_v21, %v1493_v26 }
 0xb6a   :  { %v1498_v34 = vadd.f32 1.4214138, %v1496_v37 }
 0xb6b   :  { %v1497_v30 = vadd.f32 1.4214138, %v1495_v29 }
 0xb6c   :  { %v1500_v31 = vmul.f32 %v6739_v17, %v1498_v34 }
 0xb6d   :  { %v1499_v20 = vmul.f32 %v6741_v21, %v1497_v30 }
 0xb6e   :  { %v1502_v19 = vadd.f32 -0.28449672, %v1500_v31 }
 0xb6f   :  { %v1501_v32 = vadd.f32 -0.28449672, %v1499_v20 }
 0xb70   :  { %v1504_v35 = vmul.f32 %v6739_v17, %v1502_v19 }
 0xb71   :  { %v1503_v36 = vmul.f32 %v6741_v21, %v1501_v32  ;;  %v1665_v32 = vld [vmem:[%s8727_s6 + $0x8] sm:$0xff]  ;;  %s8747_s6 = sld [smem:[#allocation85_spill]] }
 0xb72   :  { %v1506_v38 = vadd.f32 0.2548296, %v1504_v35  ;;  %v1667_v35 = vld [vmem:[%s8728_s22 + $0x8] sm:$0xff]  ;;  %s8748_s22 = sld [smem:[#allocation89_spill]] }
 0xb73   :  { %v1505_v39 = vadd.f32 0.2548296, %v1503_v36  ;;  %v1668_v36 = vld [vmem:[%s8731_s9] sm:$0xff] }
 0xb74   :  { %v1508_v40 = vmul.f32 %v6739_v17, %v1506_v38  ;;  %v1669_v38 = vld [vmem:[%s8731_s9 + $0x8] sm:$0xff] }
 0xb75   :  { %v1507_v45 = vmul.f32 %v6741_v21, %v1505_v39  ;;  %v1670_v39 = vld [vmem:[%s8731_s9 + $0x10] sm:$0xff] }
 0xb76   :  { %v1518_v47 = vmul.f32 %v6743_v42, %v1508_v40  ;;  %v6227_v40 = vpack.c.bf16 %v1669_v38, %v1668_v36  ;;  %v1671_v42 = vld [vmem:[%s8731_s9 + $0x18] sm:$0xff] }
 0xb77   :  { %v1517_v48 = vmul.f32 %v6745_v46, %v1507_v45  ;;  %v6231_v45 = vpack.c.bf16 %v1671_v42, %v1670_v39  ;;  %v1672_v46 = vld [vmem:[%s8731_s9 + $0x20] sm:$0xff] }
 0xb78   :  { %v1520_v49 = vsub.f32 1.0, %v1518_v47  ;;  %v1673_v47 = vld [vmem:[%s8731_s9 + $0x28] sm:$0xff]  ;;  %v5244_v42 = vld [vmem:[%s8735_s21] ss:$0 sm:$0xff] }
 0xb79   :  { %v1519_v28 = vsub.f32 1.0, %v1517_v48  ;;  %v6235_v48 = vpack.c.bf16 %v1673_v47, %v1672_v46 }
 0xb7a   :  { %v1524_v50 = vsub.f32 0.0, %v1520_v49 }
 0xb7b   :  { %v1523_v51 = vsub.f32 0.0, %v1519_v28 }
 0xb7c   :  { %v1526_v52 = vsel %vm1522_vm10, %v1520_v49, %v1524_v50  ;;  %v1674_v49 = vld [vmem:[%s8731_s9 + $0x30] sm:$0xff] }
 0xb7d   :  { %v1530_v53 = vadd.f32 1.0, %v1526_v52  ;;  %v1525_v54 = vsel %vm1521_vm11, %v1519_v28, %v1523_v51  ;;  %v1675_v28 = vld [vmem:[%s8731_s9 + $0x38] sm:$0xff]  ;;  %v1676_v51 = vld [vmem:[%s8731_s9 + $0x40] sm:$0xff]  ;;  %v1677_v52 = vld [vmem:[%s8731_s9 + $0x48] sm:$0xff] }
 0xb7e   :  { %v1529_v56 = vadd.f32 1.0, %v1525_v54  ;;  %v6239_v50 = vpack.c.bf16 %v1675_v28, %v1674_v49  ;;  %v1678_v54 = vld [vmem:[%s8731_s9 + $0x50] sm:$0xff] }
 0xb7f   :  { %v1532_v61 = vmul.f32 %v1530_v53, %v1528_v58  ;;  %v6243_v53 = vpack.c.bf16 %v1677_v52, %v1676_v51 }
 0xb80   :  { %v1531_v60 = vmul.f32 %v1529_v56, %v1527_v55  ;;  %v1679_v55 = vld [vmem:[%s8731_s9 + $0x58] sm:$0xff] }
 0xb81   :  { %v6247_v56 = vpack.c.bf16 %v1679_v55, %v1678_v54 }
 0xb82   :  { %5738 = vmatprep.mubr.msk.f32.mxu1 %vm736_vm4, %v1531_v60 }
 0xb83   :  { %5739 = vmatmul.mubr.msk.f32.vlgmr.msra.gmra.mrb[10].mxu1 %vm736_vm4, %v1532_v61 }
 0xb84   :  { %5752 = vmatprep.mubr.msk.f32.mxu1 %vm1254_vm8, %v1666_v16 }
 0xc56   :  { %v5740_v63 = vpop.f32.mrb[10].mxu1 }
 0xc57   :  { %v1617_v0 = vadd.f32 %v5740_v63, %v5227_v62  ;;  %v1611_v1 = vpop.f32.mrb[11].mxu1 }
 0xc58   :  { %v1612_v2 = vadd.f32 %v5227_v62, %v1611_v1 }
 0xc59   :  { %v1621_v3 = vadd.f32 %v1617_v0, %v8101_v59 }
 0xc5a   :  { %v1620_v5 = vadd.f32 %v1612_v2, %v8097_v57 }
 0xc5b   :  { %v1625_v7 = vsel %vm736_vm4, %v1621_v3, 0.0 }
 0xc5c   :  { %1626 = vadd.xlane.f32.xlu0 %v1625_v7  ;;  %v1622_v4 = vsel %vm736_vm4, %v1620_v5, 0.0 }
 0xc5d   :  { %1623 = vadd.xlane.f32.xlu1 %v1622_v4 }
 0xce9   :  { %v1627_v6 = vpop.xlane.xlu0 %1626 }
 0xcea   :  { %v1629_v8 = vmul.f32 0.03125, %v1627_v6  ;;  %v1624_v9 = vpop.xlane.xlu1 %1623  ;;  %v7474_v6 = vmov 0.0|0.0  }
 0xceb   :  { %v1628_v10 = vmul.f32 0.03125, %v1624_v9  ;;  %v5236_v9 = vld [vmem:[%s8732_s12] ss:$0 sm:$0xff] }
 0xcec   :  { %v1631_v11 = vsub.f32 %v1621_v3, %v1629_v8  ;;  %v7476_v8 = vmov 0.0  }
 0xced   :  { %v1630_v12 = vsub.f32 %v1620_v5, %v1628_v10 }
 0xcee   :  { %v1633_v13 = vmul.f32 %v1631_v11, %v1631_v11 }
 0xcef   :  { %v1632_v14 = vmul.f32 %v1630_v12, %v1630_v12 }
 0xcf0   :  { %v1637_v59 = vsel %vm736_vm4, %v1633_v13, 0.0 }
 0xcf1   :  { %1638 = vadd.xlane.f32.xlu0 %v1637_v59  ;;  %v1634_v57 = vsel %vm736_vm4, %v1632_v14, 0.0 }
 0xcf2   :  { %1635 = vadd.xlane.f32.xlu1 %v1634_v57 }
 0xd7e   :  { %v1639_v17 = vpop.xlane.xlu0 %1638 }
 0xd7f   :  { %v1641_v18 = vmul.f32 0.03125, %v1639_v17  ;;  %v1636_v21 = vpop.xlane.xlu1 %1635 }
 0xd80   :  { %v1640_v22 = vmul.f32 0.03125, %v1636_v21 }
 0xd81   :  { %v1643_v23 = vadd.f32 1e-05, %v1641_v18 }
 0xd82   :  { %v1642_v24 = vadd.f32 1e-05, %v1640_v22 }
 0xd83   :  { %6746 = vrsqrt.f32 %v1643_v23 }
 0xd84   :  { %6748 = vrsqrt.f32 %v1642_v24 }
 0xd8d   :  { %v6747_v33 = vpop.eup %6746 }
 0xd8e   :  { %v6749_v26 = vpop.eup %6748  ;;  %v1647_v37 = vmul.f32 %v6747_v33, %v1631_v11  ;;  %v1681_v33 = vld [vmem:[%s8733_s0] sm:$0xff] }
 0xd8f   :  { %v1646_v29 = vmul.f32 %v6749_v26, %v1630_v12  ;;  %v1683_v26 = vld [vmem:[%s8733_s0 + $0x10] sm:$0xff] }
 0xd90   :  { %v1655_v34 = vmul.f32 %v5230_v25, %v1647_v37  ;;  %v2191_v37 = vld [vmem:[%s8734_s8] sm:$0xff] }
 0xd91   :  { %v1654_v30 = vmul.f32 %v5230_v25, %v1646_v29  ;;  %v1682_v25 = vld [vmem:[%s8733_s0 + $0x8] sm:$0xff] }
 0xd92   :  { %v1663_v31 = vadd.f32 %v5231_v27, %v1655_v34  ;;  %v2193_v34 = vld [vmem:[%s8734_s8 + $0x10] sm:$0xff] }
 0xd93   :  { %v1662_v20 = vadd.f32 %v5231_v27, %v1654_v30  ;;  %v2192_v27 = vld [vmem:[%s8734_s8 + $0x8] sm:$0xff]  ;;  %v2194_v30 = vld [vmem:[%s8734_s8 + $0x18] sm:$0xff] }
 0xd94   :  { %1850 = vrot.lane.b32.xlu0 %v1663_v31, %s7473_s17  ;;  %v6261_v29 = vpack.c.bf16 %v2192_v27, %v2191_v37 }
 0xd95   :  { %1848 = vrot.lane.b32.xlu1 %v1662_v20, %s7473_s17  ;;  %v6219_v19 = vpack.c.bf16 %v1663_v31, %v1662_v20  ;;  %v6264_v31 = vpack.c.bf16 %v2194_v30, %v2193_v34 }
 0xd97   :  { %6220 = vmatprep.subr.bf16.mxu0 %v6219_v19  ;;  %6224 = vmatprep.subr.bf16.mxu1 %v6219_v19 }
 0xd98   :  { %6222 = vmatpush3.bf16.msra.mxu0 %v6219_v19  ;;  %6226 = vmatpush3.bf16.msra.mxu1 %v6219_v19 }
 0xd99   :  { %6228 = vmatprep.subr.bf16.mxu0 %v6227_v40  ;;  %6251 = vmatprep.subr.bf16.mxu1 %v7474_v6 }
 0xd9b   :  { %5746 = vmatmul.mubr.msk.f32.vlgmr.msra.gmra.mrb[16].mxu0 %vm1254_vm8, %v1665_v32  ;;  %5753 = vmatmul.mubr.msk.f32.vlgmr.msra.gmra.mrb[12].mxu1 %vm1254_vm8, %v1667_v35 }
 0xd9c   :  { %6230 = vmatpush3.bf16.msra.mxu0 %v6227_v40  ;;  %5786 = vmatprep.mubr.msk.f32.mxu1 %vm7475_vm13, %v7476_v8 }
 0xd9d   :  { %6232 = vmatprep.subr.bf16.mxu0 %v6231_v45 }
 0xda0   :  { %6234 = vmatpush3.bf16.msra.mxu0 %v6231_v45 }
 0xda1   :  { %6236 = vmatprep.subr.bf16.mxu0 %v6235_v48 }
 0xda4   :  { %6238 = vmatpush3.bf16.msra.mxu0 %v6235_v48 }
 0xda5   :  { %6240 = vmatprep.subr.bf16.mxu0 %v6239_v50 }
 0xda8   :  { %6242 = vmatpush3.bf16.msra.mxu0 %v6239_v50 }
 0xda9   :  { %6244 = vmatprep.subr.bf16.mxu0 %v6243_v53 }
 0xdac   :  { %6246 = vmatpush3.bf16.msra.mxu0 %v6243_v53 }
 0xdad   :  { %6248 = vmatprep.subr.bf16.mxu0 %v6247_v56 }
 0xdb0   :  { %6250 = vmatpush3.bf16.msra.mxu0 %v6247_v56 }
 0xe06   :  { %v1851_v3 = vpop.permute.xlu0 %1850 }
 0xe07   :  { %v1849_v63 = vpop.permute.xlu1 %1848 }
 0xe6e   :  { %v5747_v58 = vpop.f32.mrb[16].mxu0  ;;  %v5754_v60 = vpop.f32.mrb[12].mxu1 }
 0xe6f   :  { %v1756_v61 = vpop.f32.mrb[17].mxu0  ;;  %v1837_v62 = vpop.f32.mrb[13].mxu1  ;;  %v1863_v5 = vsel %vm736_vm4, %v5747_v58, %v1851_v3 }
 0xe70   :  { %1856 = vrot.lane.b32.xlu1 %v1837_v62, %s7469_s7  ;;  %v1862_v0 = vsel %vm736_vm4, %v1756_v61, %v1849_v63  ;;  %v2188_v62 = vld [vmem:[%s8736_s28 + $0x8] sm:$0xff]  ;;  %v2187_v63 = vld [vmem:[%s8736_s28] sm:$0xff] }
 0xe74   :  { %1858 = vrot.lane.b32.xlu1 %v5754_v60, %s7469_s7 }
 0xee2   :  { %v1857_v1 = vpop.permute.xlu1 %1856 }
 0xee3   :  { %v1864_v2 = vsel %vm986_vm7, %v1862_v0, %v1857_v1 }
 0xee4   :  { %5779 = vmatprep.mubr.msk.f32.mxu0 %vm1872_vm12, %v1864_v2 }
 0xee6   :  { %v1859_v7 = vpop.permute.xlu1 %1858 }
 0xee7   :  { %v1865_v4 = vsel %vm986_vm7, %v1863_v5, %v1859_v7  ;;  %v2190_v5 = vld [vmem:[%s8736_s28 + $0x18] sm:$0xff] }
 0xee8   :  { %5780 = vmatmul.mubr.msk.f32.vlgmr.msra.gmra.mrb[18].mxu0 %vm1872_vm12, %v1865_v4  ;;  %v2189_v4 = vld [vmem:[%s8736_s28 + $0x10] sm:$0xff] }
 0xfbb   :  { %v5781_v10 = vpop.f32.mrb[18].mxu0 }
 0xfbc   :  { %v1951_v11 = vadd.f32 %v5781_v10, %v5236_v9  ;;  %v1945_v12 = vpop.f32.mrb[19].mxu0 }
 0xfbd   :  { %v1946_v13 = vadd.f32 %v5236_v9, %v1945_v12 }
 0xfbe   :  { %v1957_v14 = vmin.f32 %v1951_v11, 0.0  ;;  %vm1955_vm14 = vcmp.gt.f32.partialorder %v1951_v11, 0.0 }
 0xfbf   :  { %v1956_v59 = vmin.f32 %v1946_v13, 0.0  ;;  %vm1954_vm15 = vcmp.gt.f32.partialorder %v1946_v13, 0.0 }
 0xfc0   :  { %v1960_v57 = vmul.f32 1.442695, %v1957_v14 }
 0xfc1   :  { %v1958_v15 = vmul.f32 1.442695, %v1956_v59 }
 0xfc2   :  { %6750 = vpow2.f32 %v1960_v57 }
 0xfc3   :  { %6752 = vpow2.f32 %v1958_v15 }
 0xfcc   :  { %v6751_v16 = vpop.eup %6750 }
 0xfcd   :  { %v6753_v17 = vpop.eup %6752  ;;  %v5240_v18 = vadd.f32 -1.0, %v6751_v16 }
 0xfce   :  { %v5239_v21 = vadd.f32 -1.0, %v6753_v17 }
 0xfcf   :  { %v1965_v22 = vsel %vm1955_vm14, %v1951_v11, %v5240_v18 }
 0xfd0   :  { %v1964_v23 = vsel %vm1954_vm15, %v1946_v13, %v5239_v21 }
 0xfd1   :  { %v6252_v24 = vpack.c.bf16 %v1965_v22, %v1964_v23 }
 0xfd3   :  { %6253 = vmatpush3.bf16.msra.mxu1 %v6252_v24 }
 0xfd4   :  { %6254 = vmatprep.subr.bf16.mxu1 %v7474_v6 }
 0xfd6   :  { %5787 = vmatmul.mubr.msk.f32.vlgmr.msra.gmra.mrb[14].mxu1 %vm1254_vm8, %v1681_v33 }
 0xfd7   :  { %6256 = vmatpush3.bf16.msra.mxu1 %v6252_v24  ;;  %5793 = vmatprep.mubr.msk.f32.mxu1 %vm7475_vm13, %v7476_v8 }
 0xfd8   :  { %6257 = vmatprep.subr.bf16.mxu1 %v7474_v6 }
 0xfda   :  { %5794 = vmatmul.mubr.msk.f32.vlgmr.msra.gmra.mrb[16].mxu1 %vm1254_vm8, %v1682_v25 }
 0xfdb   :  { %6259 = vmatpush3.bf16.msra.mxu1 %v6252_v24  ;;  %5800 = vmatprep.mubr.msk.f32.mxu1 %vm7475_vm13, %v7476_v8 }
 0xfdc   :  { %6260 = vmatprep.subr.bf16.mxu1 %v7474_v6 }
 0xfde   :  { %5801 = vmatmul.mubr.msk.f32.vlgmr.msra.gmra.mrb[18].mxu1 %vm1254_vm8, %v1683_v26 }
 0xfdf   :  { %5811 = vmatprep.mubr.msk.f32.mxu1 %vm7475_vm13, %v7476_v8  ;;  %6262 = vmatpush3.bf16.msra.mxu1 %v6261_v29 }
 0xfe0   :  { %6263 = vmatprep.subr.bf16.mxu1 %v7474_v6 }
 0xfe3   :  { %6265 = vmatpush3.bf16.msra.mxu1 %v6264_v31 }
0x10a9   :  { %v2035_v20 = vpop.f32.mrb[14].mxu1 }
0x10aa   :  { %v5788_v19 = vpop.f32.mrb[15].mxu1 }
0x10ad   :  { %v2108_v32 = vpop.f32.mrb[16].mxu1 }
0x10ae   :  { %v2112_v35 = vmax.f32 %v2035_v20, %v2108_v32  ;;  %v5795_v36 = vpop.f32.mrb[17].mxu1 }
0x10b1   :  { %v2182_v38 = vpop.f32.mrb[18].mxu1 }
0x10b2   :  { %v8171_v39 = vmax.f32 %v2112_v35, %v2182_v38  ;;  %v5802_v40 = vpop.f32.mrb[19].mxu1 }
0x10b4   :  { %5812 = vmatmul.mubr.msk.f32.vlgmr.msra.gmra.mrb[20].mxu1 %vm736_vm4, %v8171_v39 }
0x1187   :  { %v2290_v45 = vpop.f32.mrb[20].mxu1 }
0x1188   :  { %v2291_v46 = vadd.f32 %v5244_v42, %v2290_v45  ;;  %v5813_v47 = vpop.f32.mrb[21].mxu1 }
0x118a   :  { %2297 = vrot.lane.b32.xlu1 %v2291_v46, %s7465_s1  ;;  %2295 = vrot.lane.b32.xlu0 %v2291_v46, %s7466_s4 }
0x118b   :  { %5822 = vmatprep.mubr.msk.f32.mxu1 %vm848_vm5, %v2291_v46 }
0x118e   :  { %2299 = vrot.lane.b32.xlu0 %v2291_v46, %s7467_s25 }
0x11fc   :  { %v2296_v48 = vpop.permute.xlu0 %2295  ;;  %v2298_v28 = vpop.permute.xlu1 %2297 }
0x11fd   :  { %v8180_v49 = vpack.i.bf16 %v2296_v48, %v2291_v46 }
0x11ff   :  { %6633 = vrot.lane.b32.xlu1 %v8180_v49, %s7468_s2 }
0x1200   :  { %v2300_v50 = vpop.permute.xlu0 %2299 }
0x1201   :  { %v8184_v51 = vpack.i.bf16 %v2300_v50, %v2298_v28 }
0x1203   :  { %6638 = vrot.lane.b32.xlu0 %v8184_v51, %s7468_s2 }
0x1271   :  { %v6634_v52 = vpop.permute.xlu1 %6633 }
0x1272   :  { %v6636_v53 = vunpack.i.h.bf16 %v6634_v52  ;;  %v6635_v54 = vunpack.i.l.bf16 %v6634_v52 }
0x1274   :  { %v6266_v55 = vpack.c.bf16 %v6636_v53, %v6635_v54 }
0x1275   :  { %v6639_v56 = vpop.permute.xlu0 %6638 }
0x1276   :  { %v6641_v58 = vunpack.i.h.bf16 %v6639_v56  ;;  %v6640_v60 = vunpack.i.l.bf16 %v6639_v56  ;;  %6268 = vmatprep.subr.msk.bf16.mxu1 %vm7971_vm6, %v6266_v55 }
0x1277   :  { %6271 = vmatpush3.bf16.xpose.msk.msra.mxu1 %vm7971_vm6, %v6266_v55 }
0x1278   :  { %v6272_v61 = vpack.c.bf16 %v6641_v58, %v6640_v60  ;;  %v2196_v60 = vld [vmem:[%s8737_s20] sm:$0xff] }
0x127a   :  { %6274 = vmatprep.subr.msk.bf16.mxu1 %vm7971_vm6, %v6272_v61 }
0x127f   :  { %6277 = vmatpush3.bf16.xpose.msk.msra.mxu1 %vm7971_vm6, %v6272_v61  ;;  %v2197_v61 = vld [vmem:[%s8737_s20 + $0x8] sm:$0xff] }
0x1280   :  { %6292 = vmatprep.subr.bf16.mxu1 %v7474_v6 }
0x1286   :  { %5823 = vmatmul.mubr.msk.f32.vlgmr.msra.gmra.mrb[22].mxu1 %vm848_vm5, %v2296_v48 }
0x1287   :  { %5825 = vmatprep.mubr.msk.f32.mxu1 %vm848_vm5, %v2298_v28 }
0x128a   :  { %5826 = vmatmul.mubr.msk.f32.gmra.mrb[24].mxu1 %vm848_vm5, %v2300_v50 }
0x128b   :  { %5861 = vmatprep.mubr.msk.f32.mxu1 %vm7475_vm13, %v7476_v8 }
0x1359   :  { %v5824_v0 = vpop.f32.mrb[22].mxu1 }
0x135a   :  { %v2397_v1 = vadd.f32 %v5824_v0, %v2188_v62  ;;  %v2391_v2 = vpop.f32.mrb[23].mxu1  ;;  %v6287_v62 = vpack.c.bf16 %v2197_v61, %v2196_v60  ;;  %v2199_v0 = vld [vmem:[%s8737_s20 + $0x18] sm:$0xff] }
0x135b   :  { %v2392_v3 = vadd.f32 %v2391_v2, %v2187_v63  ;;  %v2198_v63 = vld [vmem:[%s8737_s20 + $0x10] sm:$0xff] }
0x135c   :  { %v2413_v7 = vsel %vm736_vm4, %v2397_v1, -inf }
0x135d   :  { %2414 = vmax.xlane.f32.xlu0 %v2413_v7  ;;  %v5827_v9 = vpop.f32.mrb[24].mxu1  ;;  %v2410_v10 = vsel %vm736_vm4, %v2392_v3, -inf }
0x135e   :  { %v2407_v11 = vadd.f32 %v5827_v9, %v2190_v5  ;;  %v2401_v12 = vpop.f32.mrb[25].mxu1  ;;  %2411 = vmax.xlane.f32.xlu1 %v2410_v10 }
0x135f   :  { %v2402_v13 = vadd.f32 %v2401_v12, %v2189_v4 }
0x1360   :  { %v2419_v14 = vsel %vm736_vm4, %v2407_v11, -inf }
0x1361   :  { %v2416_v59 = vsel %vm736_vm4, %v2402_v13, -inf }
0x1362   :  { %2417 = vmax.xlane.f32.xlu0 %v2416_v59  ;;  %2420 = vmax.xlane.f32.xlu1 %v2419_v14  ;;  %v5258_v14 = vld [vmem:[%s8738_s10] ss:$0 sm:$0xff] }
0x13ea   :  { %v2415_v57 = vpop.xlane.xlu0 %2414 }
0x13eb   :  { %v2423_v15 = vsub.f32 %v2397_v1, %v2415_v57  ;;  %v2412_v16 = vpop.xlane.xlu1 %2411  ;;  %v6290_v1 = vpack.c.bf16 %v2199_v0, %v2198_v63  ;;  %v5270_v63 = vld [vmem:[%s8744_s24] ss:$0 sm:$0xff] }
0x13ec   :  { %v2422_v17 = vsub.f32 %v2392_v3, %v2412_v16 }
0x13ed   :  { %v2428_v18 = vmul.f32 1.442695, %v2423_v15 }
0x13ee   :  { %v2426_v21 = vmul.f32 1.442695, %v2422_v17 }
0x13ef   :  { %6754 = vpow2.f32 %v2428_v18  ;;  %v2418_v22 = vpop.xlane.xlu0 %2417  ;;  %v2421_v23 = vpop.xlane.xlu1 %2420 }
0x13f0   :  { %6756 = vpow2.f32 %v2426_v21  ;;  %v2424_v24 = vsub.f32 %v2402_v13, %v2418_v22  ;;  %v2425_v33 = vsub.f32 %v2407_v11, %v2421_v23 }
0x13f2   :  { %v2430_v25 = vmul.f32 1.442695, %v2424_v24  ;;  %v2432_v26 = vmul.f32 1.442695, %v2425_v33  ;;  %v2203_v33 = vld [vmem:[%s8739_s13] sm:$0xff] }
0x13f4   :  { %6758 = vpow2.f32 %v2430_v25  ;;  %v2204_v25 = vld [vmem:[%s8739_s13 + $0x8] sm:$0xff] }
0x13f5   :  { %6760 = vpow2.f32 %v2432_v26  ;;  %v6293_v26 = vpack.c.bf16 %v2204_v25, %v2203_v33 }
0x13f7   :  { %6294 = vmatpush3.bf16.msra.mxu1 %v6293_v26 }
0x13f8   :  { %6295 = vmatprep.subr.bf16.mxu1 %v7474_v6 }
0x13f9   :  { %v6755_v37 = vpop.eup %6754 }
0x13fa   :  { %v6757_v27 = vpop.eup %6756  ;;  %v2437_v29 = vsel %vm736_vm4, %v6755_v37, 0.0 }
0x13fb   :  { %2438 = vadd.xlane.f32.xlu1 %v2437_v29  ;;  %v2434_v34 = vsel %vm736_vm4, %v6757_v27, 0.0  ;;  %v2952_v29 = vld [vmem:[%s8740_s14] sm:$0xff] }
0x13fc   :  { %2435 = vadd.xlane.f32.xlu0 %v2434_v34  ;;  %v2953_v34 = vld [vmem:[%s8740_s14 + $0x8] sm:$0xff] }
0x13fe   :  { %v6759_v30 = vpop.eup %6758 }
0x13ff   :  { %v6761_v31 = vpop.eup %6760  ;;  %v2440_v20 = vsel %vm736_vm4, %v6759_v30, 0.0 }
0x1400   :  { %2441 = vadd.xlane.f32.xlu0 %v2440_v20  ;;  %v2443_v19 = vsel %vm736_vm4, %v6761_v31, 0.0 }
0x1401   :  { %2444 = vadd.xlane.f32.xlu1 %v2443_v19 }
0x1412   :  { %6648 = vrot.lane.b32.xlu1 %v8184_v51, %s7469_s7 }
0x1416   :  { %6643 = vrot.lane.b32.xlu0 %v8180_v49, %s7469_s7 }
0x1488   :  { %v2439_v32 = vpop.xlane.xlu1 %2438 }
0x1489   :  { %v2436_v35 = vpop.xlane.xlu0 %2435 }
0x148a   :  { %6762 = vrcp.f32 %v2436_v35  ;;  %v5260_v35 = vld [vmem:[%s8741_s27] ss:$0 sm:$0xff] }
0x148b   :  { %6764 = vrcp.f32 %v2439_v32 }
0x148d   :  { %v2442_v36 = vpop.xlane.xlu0 %2441 }
0x148e   :  { %v2445_v38 = vpop.xlane.xlu1 %2444  ;;  %6766 = vrcp.f32 %v2442_v36 }
0x148f   :  { %6768 = vrcp.f32 %v2445_v38  ;;  %v5261_v38 = vld [vmem:[#allocation2] ss:$0 sm:$0xff] }
0x1491   :  { %v6644_v40 = vpop.permute.xlu0 %6643 }
0x1492   :  { %v6646_v42 = vunpack.i.h.bf16 %v6644_v40  ;;  %v6645_v45 = vunpack.i.l.bf16 %v6644_v40  ;;  %v6649_v46 = vpop.permute.xlu1 %6648  ;;  %v2954_v40 = vld [vmem:[%s8740_s14 + $0x10] sm:$0xff] }
0x1493   :  { %v6651_v47 = vunpack.i.h.bf16 %v6649_v46  ;;  %v6650_v48 = vunpack.i.l.bf16 %v6649_v46 }
0x1494   :  { %v6763_v28 = vpop.eup %6762  ;;  %v6278_v50 = vpack.c.bf16 %v6646_v42, %v6645_v45  ;;  %v2955_v42 = vld [vmem:[%s8740_s14 + $0x18] sm:$0xff]  ;;  %v610_v45 = vld [vmem:[%s8742_s16] sm:$0xff] }
0x1495   :  { %v2447_v51 = vmul.f32 %v6763_v28, %v6757_v27  ;;  %v6282_v52 = vpack.c.bf16 %v6651_v47, %v6650_v48  ;;  %v6765_v49 = vpop.eup %6764  ;;  %v6308_v48 = vpack.c.bf16 %v2955_v42, %v2954_v40  ;;  %v8258_v28 = vadd.f32 %v7981_v44, %v610_v45  ;;  %v2209_v44 = vld [vmem:[%s8743_s3 + $0x8] sm:$0xff] }
0x1496   :  { %6279 = vmatprep.subr.bf16.mxu0 %v6278_v50  ;;  %v2449_v54 = vmul.f32 %v6765_v49, %v6755_v37  ;;  %v2206_v37 = vld [vmem:[%s8739_s13 + $0x18] sm:$0xff] }
0x1497   :  { %6281 = vmatpush3.bf16.msra.mxu0 %v6278_v50  ;;  %5836 = vmatprep.mubr.msk.f32.mxu0 %vm736_vm4, %v2447_v51  ;;  %v611_v50 = vld [vmem:[%s8742_s16 + $0x8] sm:$0xff] }
0x1498   :  { %6283 = vmatprep.subr.bf16.mxu0 %v6282_v52  ;;  %v6767_v53 = vpop.eup %6766  ;;  %v8266_v51 = vadd.f32 %v7979_v43, %v611_v50 }
0x1499   :  { %v6769_v55 = vpop.eup %6768  ;;  %v2451_v56 = vmul.f32 %v6767_v53, %v6759_v30  ;;  %v6304_v30 = vpack.c.bf16 %v2953_v34, %v2952_v29  ;;  %v2210_v53 = vld [vmem:[%s8743_s3 + $0x10] sm:$0xff] }
0x149a   :  { %v2453_v58 = vmul.f32 %v6769_v55, %v6761_v31 }
0x149b   :  { %6285 = vmatpush3.bf16.msra.mxu0 %v6282_v52  ;;  %v2208_v52 = vld [vmem:[%s8743_s3] sm:$0xff] }
0x149c   :  { %6286 = vmatprep.subr.bf16.mxu0 %v7474_v6  ;;  %v6299_v49 = vpack.c.bf16 %v2209_v44, %v2208_v52 }
0x149e   :  { %5837 = vmatmul.mubr.msk.f32.vlgmr.msra.gmra.mrb[20].mxu0 %vm736_vm4, %v2449_v54  ;;  %v2211_v54 = vld [vmem:[%s8743_s3 + $0x18] sm:$0xff] }
0x149f   :  { %5839 = vmatprep.mubr.msk.f32.mxu0 %vm736_vm4, %v2451_v56  ;;  %6288 = vmatpush3.bf16.msra.mxu0 %v6287_v62  ;;  %v6302_v55 = vpack.c.bf16 %v2211_v54, %v2210_v53  ;;  %v5262_v56 = vld [vmem:[#allocation5] ss:$0 sm:$0xff] }
0x14a0   :  { %6289 = vmatprep.subr.bf16.mxu0 %v7474_v6 }
0x14a2   :  { %5840 = vmatmul.mubr.msk.f32.gmra.mrb[22].mxu0 %vm736_vm4, %v2453_v58 }
0x14a3   :  { %5850 = vmatprep.mubr.msk.f32.mxu0 %vm7475_vm13, %v7476_v8  ;;  %6291 = vmatpush3.bf16.msra.mxu0 %v6290_v1 }
0x14a4   :  { %6298 = vmatprep.subr.bf16.mxu0 %v7474_v6 }
0x1571   :  { %v5838_v2 = vpop.f32.mrb[20].mxu0 }
0x1572   :  { %2564 = vrot.lane.b32.xlu1 %v5838_v2, %s7470_s11  ;;  %v2544_v3 = vpop.f32.mrb[21].mxu0 }
0x1575   :  { %v5841_v5 = vpop.f32.mrb[22].mxu0 }
0x1576   :  { %2572 = vrot.lane.b32.xlu1 %v5841_v5, %s7472_s30  ;;  %v2554_v7 = vpop.f32.mrb[23].mxu0 }
0x1577   :  { %2568 = vrot.lane.b32.xlu0 %v2554_v7, %s7471_s15 }
0x15e4   :  { %v2565_v4 = vpop.permute.xlu1 %2564 }
0x15e5   :  { %v2575_v9 = vsel %vm848_vm5, %v2544_v3, %v2565_v4 }
0x15e8   :  { %v2573_v11 = vpop.permute.xlu1 %2572 }
0x15e9   :  { %v2569_v10 = vpop.permute.xlu0 %2568 }
0x15ea   :  { %v2576_v12 = vsel %vm1254_vm8, %v2575_v9, %v2569_v10 }
0x15eb   :  { %v2577_v13 = vsel %vm1257_vm9, %v2576_v12, %v2573_v11 }
0x15ec   :  { %5851 = vmatmul.mubr.msk.f32.vlgmr.msra.gmra.mrb[24].mxu0 %vm736_vm4, %v2577_v13 }
0x15ed   :  { %5872 = vmatprep.mubr.msk.f32.mxu0 %vm7475_vm13, %v7476_v8  ;;  %6300 = vmatpush3.bf16.msra.mxu0 %v6299_v49 }
0x15ee   :  { %6301 = vmatprep.subr.bf16.mxu0 %v7474_v6 }
0x15f1   :  { %6303 = vmatpush3.bf16.msra.mxu0 %v6302_v55 }
0x16bf   :  { %v2653_v59 = vpop.f32.mrb[24].mxu0 }
0x16c0   :  { %v2654_v57 = vadd.f32 %v5258_v14, %v2653_v59  ;;  %v5852_v15 = vpop.f32.mrb[25].mxu0 }
0x16c2   :  { %v2657_v16 = vadd.f32 %v2654_v57, %v8171_v39  ;;  %v2205_v39 = vld [vmem:[%s8739_s13 + $0x10] sm:$0xff] }
0x16c3   :  { %v6296_v27 = vpack.c.bf16 %v2206_v37, %v2205_v39 }
0x16c4   :  { %v2658_v17 = vsel %vm736_vm4, %v2657_v16, 0.0 }
0x16c5   :  { %2659 = vadd.xlane.f32.xlu0 %v2658_v17  ;;  %6297 = vmatpush3.bf16.msra.mxu1 %v6296_v27 }
0x16c6   :  { %6305 = vmatprep.subr.bf16.mxu1 %v6304_v30 }
0x1752   :  { %v2660_v18 = vpop.xlane.xlu0 %2659 }
0x1753   :  { %v2661_v21 = vmul.f32 0.03125, %v2660_v18 }
0x1755   :  { %v2662_v22 = vsub.f32 %v2657_v16, %v2661_v21 }
0x1757   :  { %v2663_v23 = vmul.f32 %v2662_v22, %v2662_v22 }
0x1759   :  { %v2664_v24 = vsel %vm736_vm4, %v2663_v23, 0.0 }
0x175a   :  { %2665 = vadd.xlane.f32.xlu1 %v2664_v24 }
0x17e7   :  { %v2666_v31 = vpop.xlane.xlu1 %2665 }
0x17e8   :  { %v2667_v20 = vmul.f32 0.03125, %v2666_v31 }
0x17ea   :  { %v2668_v19 = vadd.f32 1e-05, %v2667_v20 }
0x17ec   :  { %6770 = vrsqrt.f32 %v2668_v19 }
0x17f6   :  { %v6771_v32 = vpop.eup %6770 }
0x17f7   :  { %v2670_v36 = vmul.f32 %v6771_v32, %v2662_v22 }
0x17f9   :  { %v2677_v46 = vmul.f32 %v5260_v35, %v2670_v36 }
0x17fb   :  { %v8255_v47 = vadd.f32 %v5261_v38, %v2677_v46 }
0x17fd   :  { %5862 = vmatmul.mubr.msk.f32.vlgmr.msra.gmra.mrb[26].mxu1 %vm736_vm4, %v8255_v47 }
0x17fe   :  { %6307 = vmatpush3.bf16.msra.mxu1 %v6304_v30  ;;  %5883 = vmatprep.mubr.msk.f32.mxu1 %vm736_vm4, %v8258_v28 }
0x17ff   :  { %6309 = vmatprep.subr.bf16.mxu1 %v6308_v48 }
0x1802   :  { %6311 = vmatpush3.bf16.msra.mxu1 %v6308_v48 }
0x1805   :  { %5884 = vmatmul.mubr.msk.f32.vlgmr.msra.gmra.mrb[28].mxu1 %vm736_vm4, %v8266_v51 }
0x18d0   :  { %v2760_v58 = vpop.f32.mrb[26].mxu1 }
0x18d1   :  { %v2761_v60 = vadd.f32 %v5262_v56, %v2760_v58  ;;  %v5863_v61 = vpop.f32.mrb[27].mxu1 }
0x18d3   :  { %v2764_v43 = vmul.f32 0.70710677, %v2761_v60  ;;  %v2788_v26 = vmul.f32 0.5, %v2761_v60 }
0x18d5   :  { %v2765_v62 = vand.u32 2147483647, %v2764_v43  ;;  %vm2785_vm0 = vcmp.ge.f32.partialorder %v2764_v43, 0.0  ;;  %v2929_v43 = vld [vmem:[%s8745_s18 + $0x8] sm:$0xff] }
0x18d7   :  { %v2766_v0 = vmul.f32 0.3275911, %v2765_v62  ;;  %v2779_v4 = vsub.f32 0.0, %v2765_v62 }
0x18d8   :  { %v5885_v1 = vpop.f32.mrb[28].mxu1 }
0x18d9   :  { %v2767_v2 = vadd.f32 1.0, %v2766_v0  ;;  %v8276_v3 = vadd.f32 %v5885_v1, %v5270_v63  ;;  %v3071_v5 = vpop.f32.mrb[29].mxu1  ;;  %v2780_v10 = vmul.f32 %v2779_v4, %v2765_v62  ;;  %v2928_v62 = vld [vmem:[%s8745_s18] sm:$0xff] }
0x18da   :  { %v3072_v7 = vadd.f32 %v5270_v63, %v3071_v5  ;;  %v2930_v5 = vld [vmem:[%s8745_s18 + $0x10] sm:$0xff] }
0x18db   :  { %6772 = vrcp.f32 %v2767_v2  ;;  %3084 = vrot.lane.b32.xlu1 %v8276_v3, %s7466_s4  ;;  %v2781_v14 = vmul.f32 1.442695, %v2780_v10 }
0x18dc   :  { %3082 = vrot.lane.b32.xlu0 %v3072_v7, %s7466_s4  ;;  %v8288_v12 = vpack.i.bf16 %v8276_v3, %v3072_v7 }
0x18dd   :  { %6774 = vpow2.f32 %v2781_v14 }
0x18df   :  { %3088 = vrot.lane.b32.xlu1 %v8276_v3, %s7465_s1 }
0x18e0   :  { %3086 = vrot.lane.b32.xlu0 %v3072_v7, %s7465_s1 }
0x18e3   :  { %3092 = vrot.lane.b32.xlu1 %v8276_v3, %s7467_s25 }
0x18e4   :  { %3090 = vrot.lane.b32.xlu0 %v3072_v7, %s7467_s25 }
0x18e5   :  { %v6773_v9 = vpop.eup %6772 }
0x18e6   :  { %v2770_v11 = vmul.f32 1.0614054, %v6773_v9 }
0x18e7   :  { %v6775_v22 = vpop.eup %6774 }
0x18e8   :  { %v2771_v13 = vadd.f32 -1.4531521, %v2770_v11  ;;  %6653 = vrot.lane.b32.xlu0 %v8288_v12, %s7468_s2 }
0x18ea   :  { %v2772_v59 = vmul.f32 %v6773_v9, %v2771_v13  ;;  %v2932_v13 = vld [vmem:[%s8745_s18 + $0x20] sm:$0xff] }
0x18ec   :  { %v2773_v57 = vadd.f32 1.4214138, %v2772_v59 }
0x18ee   :  { %v2774_v15 = vmul.f32 %v6773_v9, %v2773_v57 }
0x18f0   :  { %v2775_v16 = vadd.f32 -0.28449672, %v2774_v15  ;;  %v2933_v15 = vld [vmem:[%s8745_s18 + $0x28] sm:$0xff] }
0x18f2   :  { %v2776_v17 = vmul.f32 %v6773_v9, %v2775_v16 }
0x18f4   :  { %v2777_v18 = vadd.f32 0.2548296, %v2776_v17 }
0x18f6   :  { %v2778_v21 = vmul.f32 %v6773_v9, %v2777_v18  ;;  %v2931_v9 = vld [vmem:[%s8745_s18 + $0x18] sm:$0xff]  ;;  %v2934_v18 = vld [vmem:[%s8745_s18 + $0x30] sm:$0xff] }
0x18f8   :  { %v2783_v23 = vmul.f32 %v6775_v22, %v2778_v21 }
0x18fa   :  { %v2784_v24 = vsub.f32 1.0, %v2783_v23 }
0x18fc   :  { %v2786_v33 = vsub.f32 0.0, %v2784_v24 }
0x18fe   :  { %v2787_v25 = vsel %vm2785_vm0, %v2784_v24, %v2786_v33  ;;  %v2935_v33 = vld [vmem:[%s8745_s18 + $0x38] sm:$0xff] }
0x18ff   :  { %v2789_v39 = vadd.f32 1.0, %v2787_v25 }
0x1901   :  { %v2790_v37 = vmul.f32 %v2789_v39, %v2788_v26 }
0x1903   :  { %5873 = vmatmul.mubr.msk.f32.vlgmr.msra.gmra.mrb[26].mxu0 %vm736_vm4, %v2790_v37 }
0x1904   :  { %5902 = vmatprep.mubr.msk.f32.mxu0 %vm848_vm5, %v3072_v7 }
0x194d   :  { %v3085_v27 = vpop.permute.xlu1 %3084 }
0x194e   :  { %v3083_v29 = vpop.permute.xlu0 %3082 }
0x194f   :  { %v8294_v34 = vpack.i.bf16 %v3085_v27, %v3083_v29 }
0x1951   :  { %v3089_v30 = vpop.permute.xlu1 %3088  ;;  %6658 = vrot.lane.b32.xlu1 %v8294_v34, %s7468_s2 }
0x1952   :  { %v3087_v31 = vpop.permute.xlu0 %3086 }
0x1953   :  { %v8298_v20 = vpack.i.bf16 %v3089_v30, %v3087_v31 }
0x1955   :  { %v3093_v19 = vpop.permute.xlu1 %3092  ;;  %6663 = vrot.lane.b32.xlu0 %v8298_v20, %s7468_s2 }
0x1956   :  { %v3091_v32 = vpop.permute.xlu0 %3090 }
0x1957   :  { %v8302_v35 = vpack.i.bf16 %v3093_v19, %v3091_v32 }
0x1959   :  { %6668 = vrot.lane.b32.xlu1 %v8302_v35, %s7468_s2 }
0x195a   :  { %v6654_v36 = vpop.permute.xlu0 %6653 }
0x195b   :  { %v6656_v38 = vunpack.i.h.bf16 %v6654_v36  ;;  %v6655_v40 = vunpack.i.l.bf16 %v6654_v36 }
0x195d   :  { %v6312_v42 = vpack.c.bf16 %v6656_v38, %v6655_v40 }
0x195f   :  { %6314 = vmatprep.subr.msk.bf16.mxu0 %vm7971_vm6, %v6312_v42 }
0x1960   :  { %6317 = vmatpush3.bf16.xpose.msk.msra.mxu0 %vm7971_vm6, %v6312_v42 }
0x19c3   :  { %v6659_v45 = vpop.permute.xlu1 %6658 }
0x19c4   :  { %v6661_v46 = vunpack.i.h.bf16 %v6659_v45  ;;  %v6660_v48 = vunpack.i.l.bf16 %v6659_v45 }
0x19c6   :  { %v6318_v50 = vpack.c.bf16 %v6661_v46, %v6660_v48 }
0x19c7   :  { %v6664_v52 = vpop.permute.xlu0 %6663 }
0x19c8   :  { %v6666_v44 = vunpack.i.h.bf16 %v6664_v52  ;;  %v6665_v49 = vunpack.i.l.bf16 %v6664_v52  ;;  %6320 = vmatprep.subr.msk.bf16.mxu0 %vm7971_vm6, %v6318_v50 }
0x19c9   :  { %6323 = vmatpush3.bf16.xpose.msk.msra.mxu0 %vm7971_vm6, %v6318_v50 }
0x19ca   :  { %v6324_v53 = vpack.c.bf16 %v6666_v44, %v6665_v49 }
0x19cb   :  { %v6669_v54 = vpop.permute.xlu1 %6668 }
0x19cc   :  { %v6671_v55 = vunpack.i.h.bf16 %v6669_v54  ;;  %v6670_v56 = vunpack.i.l.bf16 %v6669_v54  ;;  %6326 = vmatprep.subr.msk.bf16.mxu0 %vm7971_vm6, %v6324_v53 }
0x19ce   :  { %v6330_v58 = vpack.c.bf16 %v6671_v55, %v6670_v56 }
0x19d1   :  { %6329 = vmatpush3.bf16.xpose.msk.msra.mxu0 %vm7971_vm6, %v6324_v53 }
0x19d2   :  { %6332 = vmatprep.subr.msk.bf16.mxu0 %vm7971_vm6, %v6330_v58 }
0x19d6   :  { %v8320_v60 = vpop.f32.mrb[26].mxu0 }
0x19d7   :  { %v5874_v61 = vpop.f32.mrb[27].mxu0 }
0x19d9   :  { %6335 = vmatpush3.bf16.xpose.msk.msra.mxu0 %vm7971_vm6, %v6330_v58 }
0x19e0   :  { %5903 = vmatmul.mubr.msk.f32.vlgmr.msra.gmra.mrb[28].mxu0 %vm848_vm5, %v8276_v3 }
0x19e1   :  { %5905 = vmatprep.mubr.msk.f32.mxu0 %vm848_vm5, %v3083_v29 }
0x19e4   :  { %5906 = vmatmul.mubr.msk.f32.gmra.mrb[30].mxu0 %vm848_vm5, %v3085_v27 }
0x19e5   :  { %5908 = vmatprep.mubr.msk.f32.mxu0 %vm848_vm5, %v3087_v31 }
0x19e8   :  { %5909 = vmatmul.mubr.msk.f32.gmra.mrb[32].mxu0 %vm848_vm5, %v3089_v30 }
0x19e9   :  { %5911 = vmatprep.mubr.msk.f32.mxu0 %vm848_vm5, %v3091_v32 }
0x19ec   :  { %5912 = vmatmul.mubr.msk.f32.gmra.mrb[34].mxu0 %vm848_vm5, %v3093_v19 }
0x1ab3   :  { %v5904_v63 = vpop.f32.mrb[28].mxu0 }
0x1ab4   :  { %v3214_v0 = vadd.f32 %v5904_v63, %v2929_v43  ;;  %v3208_v1 = vpop.f32.mrb[29].mxu0 }
0x1ab5   :  { %v3209_v2 = vadd.f32 %v3208_v1, %v2928_v62 }
0x1ab6   :  { %v3250_v3 = vsel %vm986_vm7, %v3214_v0, -inf }
0x1ab7   :  { %3251 = vmax.xlane.f32.xlu1 %v3250_v3  ;;  %v5907_v7 = vpop.f32.mrb[30].mxu0  ;;  %v3247_v4 = vsel %vm986_vm7, %v3209_v2, -inf }
0x1ab8   :  { %v3218_v10 = vpop.f32.mrb[31].mxu0  ;;  %3248 = vmax.xlane.f32.xlu0 %v3247_v4  ;;  %v3224_v14 = vadd.f32 %v5907_v7, %v2931_v9 }
0x1ab9   :  { %v3219_v11 = vadd.f32 %v3218_v10, %v2930_v5 }
0x1aba   :  { %v3256_v24 = vsel %vm986_vm7, %v3224_v14, -inf }
0x1abb   :  { %v5910_v59 = vpop.f32.mrb[32].mxu0  ;;  %v3253_v57 = vsel %vm986_vm7, %v3219_v11, -inf }
0x1abc   :  { %v3228_v16 = vpop.f32.mrb[33].mxu0  ;;  %3254 = vmax.xlane.f32.xlu0 %v3253_v57  ;;  %v3234_v21 = vadd.f32 %v5910_v59, %v2933_v15 }
0x1abd   :  { %v3229_v17 = vadd.f32 %v3228_v16, %v2932_v13 }
0x1abe   :  { %v3262_v27 = vsel %vm986_vm7, %v3234_v21, -inf }
0x1abf   :  { %v5913_v22 = vpop.f32.mrb[34].mxu0  ;;  %v3259_v23 = vsel %vm986_vm7, %v3229_v17, -inf }
0x1ac0   :  { %v3238_v25 = vpop.f32.mrb[35].mxu0  ;;  %3260 = vmax.xlane.f32.xlu1 %v3259_v23  ;;  %3257 = vmax.xlane.f32.xlu0 %v3256_v24  ;;  %v3244_v39 = vadd.f32 %v5913_v22, %v2935_v33 }
0x1ac1   :  { %v3239_v26 = vadd.f32 %v3238_v25, %v2934_v18 }
0x1ac2   :  { %v3268_v29 = vsel %vm986_vm7, %v3244_v39, -inf }
0x1ac3   :  { %v3265_v37 = vsel %vm986_vm7, %v3239_v26, -inf }
0x1ac4   :  { %3266 = vmax.xlane.f32.xlu1 %v3265_v37  ;;  %3263 = vmax.xlane.f32.xlu0 %v3262_v27 }
0x1ac8   :  { %3269 = vmax.xlane.f32.xlu0 %v3268_v29 }
0x1ad5   :  { %6673 = vrot.lane.b32.xlu1 %v8288_v12, %s7469_s7 }
0x1b44   :  { %v3252_v30 = vpop.xlane.xlu1 %3251 }
0x1b45   :  { %v3272_v31 = vsub.f32 %v3214_v0, %v3252_v30  ;;  %v3249_v19 = vpop.xlane.xlu0 %3248 }
0x1b46   :  { %v3271_v32 = vsub.f32 %v3209_v2, %v3249_v19 }
0x1b47   :  { %v3281_v36 = vmul.f32 1.442695, %v3272_v31 }
0x1b48   :  { %v3279_v38 = vmul.f32 1.442695, %v3271_v32 }
0x1b49   :  { %6776 = vpow2.f32 %v3281_v36  ;;  %v3255_v40 = vpop.xlane.xlu0 %3254 }
0x1b4a   :  { %6778 = vpow2.f32 %v3279_v38  ;;  %v3273_v42 = vsub.f32 %v3219_v11, %v3255_v40 }
0x1b4c   :  { %v3283_v45 = vmul.f32 1.442695, %v3273_v42 }
0x1b4d   :  { %v3261_v46 = vpop.xlane.xlu1 %3260  ;;  %v3258_v48 = vpop.xlane.xlu0 %3257 }
0x1b4e   :  { %6780 = vpow2.f32 %v3283_v45  ;;  %v3275_v50 = vsub.f32 %v3229_v17, %v3261_v46  ;;  %v3274_v52 = vsub.f32 %v3224_v14, %v3258_v48 }
0x1b50   :  { %v3287_v44 = vmul.f32 1.442695, %v3275_v50  ;;  %v3285_v49 = vmul.f32 1.442695, %v3274_v52 }
0x1b51   :  { %v3267_v53 = vpop.xlane.xlu1 %3266  ;;  %v3264_v12 = vpop.xlane.xlu0 %3263 }
0x1b52   :  { %6782 = vpow2.f32 %v3287_v44  ;;  %v3276_v54 = vsub.f32 %v3234_v21, %v3264_v12  ;;  %v3277_v43 = vsub.f32 %v3239_v26, %v3267_v53 }
0x1b53   :  { %v8350_v55 = vpop.eup %6776  ;;  %6784 = vpow2.f32 %v3285_v49 }
0x1b54   :  { %v6779_v56 = vpop.eup %6778  ;;  %v3289_v58 = vmul.f32 1.442695, %v3276_v54  ;;  %v3298_v61 = vsel %vm986_vm7, %v8350_v55, 0.0  ;;  %v3291_v9 = vmul.f32 1.442695, %v3277_v43 }
0x1b55   :  { %v6674_v62 = vpop.permute.xlu1 %6673  ;;  %3299 = vadd.xlane.f32.xlu0 %v3298_v61  ;;  %v3270_v63 = vpop.xlane.xlu0 %3269  ;;  %v3295_v0 = vsel %vm986_vm7, %v6779_v56, 0.0 }
0x1b56   :  { %v6676_v1 = vunpack.i.h.bf16 %v6674_v62  ;;  %v6675_v2 = vunpack.i.l.bf16 %v6674_v62  ;;  %v3278_v3 = vsub.f32 %v3244_v39, %v3270_v63  ;;  %3296 = vadd.xlane.f32.xlu1 %v3295_v0  ;;  %6786 = vpow2.f32 %v3289_v58 }
0x1b58   :  { %v8355_v5 = vpop.eup %6780  ;;  %v6336_v7 = vpack.c.bf16 %v6676_v1, %v6675_v2  ;;  %v3293_v4 = vmul.f32 1.442695, %v3278_v3 }
0x1b59   :  { %v3301_v10 = vsel %vm986_vm7, %v8355_v5, 0.0 }
0x1b5a   :  { %6788 = vpow2.f32 %v3293_v4  ;;  %6337 = vmatprep.subr.bf16.mxu1 %v6336_v7  ;;  %3302 = vadd.xlane.f32.xlu1 %v3301_v10 }
0x1b5b   :  { %6339 = vmatpush3.bf16.msra.mxu1 %v6336_v7  ;;  %6790 = vpow2.f32 %v3291_v9 }
0x1b5c   :  { %v8359_v11 = vpop.eup %6782 }
0x1b5d   :  { %v8361_v13 = vpop.eup %6784  ;;  %v3307_v14 = vsel %vm986_vm7, %v8359_v11, 0.0 }
0x1b5e   :  { %3308 = vadd.xlane.f32.xlu1 %v3307_v14  ;;  %v3304_v59 = vsel %vm986_vm7, %v8361_v13, 0.0 }
0x1b5f   :  { %3305 = vadd.xlane.f32.xlu0 %v3304_v59 }
0x1b60   :  { %v8367_v57 = vpop.eup %6786 }
0x1b61   :  { %v3310_v15 = vsel %vm986_vm7, %v8367_v57, 0.0 }
0x1b63   :  { %3311 = vadd.xlane.f32.xlu0 %v3310_v15 }
0x1b64   :  { %v8371_v16 = vpop.eup %6788 }
0x1b65   :  { %v3316_v17 = vsel %vm986_vm7, %v8371_v16, 0.0  ;;  %v6791_v18 = vpop.eup %6790 }
0x1b66   :  { %v3313_v21 = vsel %vm986_vm7, %v6791_v18, 0.0 }
0x1b67   :  { %3317 = vadd.xlane.f32.xlu0 %v3316_v17 }
0x1b6b   :  { %3314 = vadd.xlane.f32.xlu0 %v3313_v21  ;;  %v2957_v21 = vld [vmem:[%s8747_s6] sm:$0xff] }
0x1b6f   :  { %6683 = vrot.lane.b32.xlu1 %v8298_v20, %s7469_s7 }
0x1b73   :  { %6688 = vrot.lane.b32.xlu1 %v8302_v35, %s7469_s7 }
0x1b81   :  { %6678 = vrot.lane.b32.xlu0 %v8294_v34, %s7469_s7  ;;  %s8746_s7 = sld [smem:[#allocation81_spill]] }
0x1b87   :  { %v2938_v62 = vld [vmem:[%s8746_s7 + $0x10] sm:$0xff]  ;;  %v2936_v63 = vld [vmem:[%s8746_s7] sm:$0xff]  ;;  %v2939_v59 = vld [vmem:[%s8746_s7 + $0x18] sm:$0xff] }
0x1b88   :  { %5977 = vmatprep.mubr.msk.f32.mxu0 %vm986_vm7, %v2938_v62  ;;  %v2940_v15 = vld [vmem:[%s8746_s7 + $0x20] sm:$0xff]  ;;  %v2941_v17 = vld [vmem:[%s8746_s7 + $0x28] sm:$0xff] }
0x1be2   :  { %v3300_v23 = vpop.xlane.xlu0 %3299 }
0x1be3   :  { %v3297_v22 = vpop.xlane.xlu1 %3296 }
0x1be4   :  { %6792 = vrcp.f32 %v3297_v22  ;;  %v2958_v22 = vld [vmem:[%s8747_s6 + $0x8] sm:$0xff] }
0x1be5   :  { %6794 = vrcp.f32 %v3300_v23  ;;  %v6416_v23 = vpack.c.bf16 %v2958_v22, %v2957_v21 }
0x1be7   :  { %v3303_v24 = vpop.xlane.xlu1 %3302 }
0x1be8   :  { %6796 = vrcp.f32 %v3303_v24 }
0x1beb   :  { %v3309_v37 = vpop.xlane.xlu1 %3308 }
0x1bec   :  { %v3306_v33 = vpop.xlane.xlu0 %3305 }
0x1bed   :  { %6798 = vrcp.f32 %v3306_v33 }
0x1bee   :  { %v6793_v25 = vpop.eup %6792  ;;  %6800 = vrcp.f32 %v3309_v37  ;;  %v2960_v37 = vld [vmem:[%s8747_s6 + $0x18] sm:$0xff] }
0x1bef   :  { %v3320_v26 = vmul.f32 %v6793_v25, %v6779_v56  ;;  %v6684_v29 = vpop.permute.xlu1 %6683  ;;  %v6795_v46 = vpop.eup %6794 }
0x1bf0   :  { %v3312_v39 = vpop.xlane.xlu0 %3311  ;;  %v6686_v31 = vunpack.i.h.bf16 %v6684_v29  ;;  %v6685_v35 = vunpack.i.l.bf16 %v6684_v29  ;;  %v3322_v50 = vmul.f32 %v6795_v46, %v8350_v55 }
0x1bf1   :  { %5930 = vmatprep.mubr.msk.f32.mxu1 %vm986_vm7, %v3320_v26  ;;  %6802 = vrcp.f32 %v3312_v39  ;;  %v2959_v39 = vld [vmem:[%s8747_s6 + $0x10] sm:$0xff] }
0x1bf2   :  { %v6344_v38 = vpack.c.bf16 %v6686_v31, %v6685_v35  ;;  %v6797_v48 = vpop.eup %6796  ;;  %v5264_v31 = vld [vmem:[#allocation7] ss:$0 sm:$0xff] }
0x1bf3   :  { %v6689_v34 = vpop.permute.xlu1 %6688  ;;  %v3324_v44 = vmul.f32 %v6797_v48, %v8355_v5  ;;  %v2867_v35 = vadd.f32 %v5264_v31, %v8320_v60  ;;  %v2972_v31 = vld [vmem:[%s8748_s22 + $0x18] sm:$0xff] }
0x1bf4   :  { %v3318_v27 = vpop.xlane.xlu0 %3317  ;;  %v6691_v40 = vunpack.i.h.bf16 %v6689_v34  ;;  %v6690_v42 = vunpack.i.l.bf16 %v6689_v34 }
0x1bf6   :  { %v6348_v45 = vpack.c.bf16 %v6691_v40, %v6690_v42 }
0x1bf7   :  { %v6799_v52 = vpop.eup %6798 }
0x1bf8   :  { %v3315_v20 = vpop.xlane.xlu0 %3314  ;;  %v6801_v49 = vpop.eup %6800  ;;  %v3326_v53 = vmul.f32 %v6799_v52, %v8361_v13 }
0x1bf9   :  { %6804 = vrcp.f32 %v3315_v20  ;;  %v3328_v54 = vmul.f32 %v6801_v49, %v8359_v11 }
0x1bfa   :  { %6806 = vrcp.f32 %v3318_v27  ;;  %v6420_v27 = vpack.c.bf16 %v2960_v37, %v2959_v39  ;;  %v2969_v39 = vld [vmem:[%s8748_s22] sm:$0xff]  ;;  %v2970_v37 = vld [vmem:[%s8748_s22 + $0x8] sm:$0xff] }
0x1bfb   :  { %v6803_v12 = vpop.eup %6802 }
0x1bfc   :  { %v6679_v30 = vpop.permute.xlu0 %6678  ;;  %v3330_v55 = vmul.f32 %v6803_v12, %v8367_v57  ;;  %v2937_v57 = vld [vmem:[%s8746_s7 + $0x8] sm:$0xff] }
0x1bfd   :  { %v6681_v19 = vunpack.i.h.bf16 %v6679_v30  ;;  %v6680_v32 = vunpack.i.l.bf16 %v6679_v30 }
0x1bff   :  { %v6340_v36 = vpack.c.bf16 %v6681_v19, %v6680_v32  ;;  %v2870_v19 = vadd.f32 %v2867_v35, %v8255_v47 }
0x1c01   :  { %6341 = vmatprep.subr.bf16.mxu1 %v6340_v36  ;;  %v2871_v32 = vsel %vm736_vm4, %v2870_v19, 0.0 }
0x1c02   :  { %6343 = vmatpush3.bf16.msra.mxu1 %v6340_v36 }
0x1c03   :  { %6345 = vmatprep.subr.bf16.mxu1 %v6344_v38  ;;  %v6805_v56 = vpop.eup %6804 }
0x1c04   :  { %v6807_v58 = vpop.eup %6806  ;;  %v3332_v61 = vmul.f32 %v6805_v56, %v6791_v18  ;;  %v2943_v18 = vld [vmem:[%s8746_s7 + $0x38] sm:$0xff] }
0x1c05   :  { %v3334_v43 = vmul.f32 %v6807_v58, %v8371_v16  ;;  %v2942_v16 = vld [vmem:[%s8746_s7 + $0x30] sm:$0xff] }
0x1c06   :  { %6347 = vmatpush3.bf16.msra.mxu1 %v6344_v38 }
0x1c07   :  { %6349 = vmatprep.subr.bf16.mxu1 %v6348_v45 }
0x1c0a   :  { %6351 = vmatpush3.bf16.msra.mxu1 %v6348_v45 }
0x1c0d   :  { %5931 = vmatmul.mubr.msk.f32.vlgmr.msra.gmra.mrb[30].mxu1 %vm986_vm7, %v3322_v50 }
0x1c0e   :  { %5933 = vmatprep.mubr.msk.f32.mxu1 %vm986_vm7, %v3324_v44 }
0x1c11   :  { %5934 = vmatmul.mubr.msk.f32.gmra.mrb[32].mxu1 %vm986_vm7, %v3326_v53 }
0x1c12   :  { %5936 = vmatprep.mubr.msk.f32.mxu1 %vm986_vm7, %v3328_v54 }
0x1c15   :  { %5937 = vmatmul.mubr.msk.f32.gmra.mrb[34].mxu1 %vm986_vm7, %v3330_v55 }
0x1c16   :  { %5939 = vmatprep.mubr.msk.f32.mxu1 %vm986_vm7, %v3332_v61  ;;  %v5305_v61 = vld [vmem:[#allocation14] ss:$0 sm:$0xff] }
0x1c19   :  { %5940 = vmatmul.mubr.msk.f32.gmra.mrb[36].mxu1 %vm986_vm7, %v3334_v43 }
0x1c1a   :  { %5958 = vmatprep.mubr.msk.f32.mxu1 %vm986_vm7, %v2936_v63 }
0x1ce0   :  { %v5932_v0 = vpop.f32.mrb[30].mxu1 }
0x1ce1   :  { %v3449_v1 = vpop.f32.mrb[31].mxu1 }
0x1ce2   :  { %v6352_v2 = vpack.c.bf16 %v5932_v0, %v3449_v1 }
0x1ce4   :  { %v5935_v3 = vpop.f32.mrb[32].mxu1  ;;  %6353 = vmatprep.subr.bf16.mxu1 %v6352_v2  ;;  %6369 = vmatprep.subr.bf16.mxu0 %v6352_v2 }
0x1ce5   :  { %v3459_v5 = vpop.f32.mrb[33].mxu1  ;;  %6355 = vmatpush3.bf16.msra.mxu1 %v6352_v2  ;;  %6371 = vmatpush3.bf16.msra.mxu0 %v6352_v2 }
0x1ce6   :  { %v6356_v7 = vpack.c.bf16 %v5935_v3, %v3459_v5  ;;  %v5266_v3 = vld [vmem:[#allocation8] ss:$0 sm:$0xff] }
0x1ce8   :  { %v5938_v4 = vpop.f32.mrb[34].mxu1  ;;  %6357 = vmatprep.subr.bf16.mxu1 %v6356_v7  ;;  %6373 = vmatprep.subr.bf16.mxu0 %v6356_v7 }
0x1ce9   :  { %v3469_v9 = vpop.f32.mrb[35].mxu1  ;;  %6359 = vmatpush3.bf16.msra.mxu1 %v6356_v7  ;;  %6375 = vmatpush3.bf16.msra.mxu0 %v6356_v7 }
0x1cea   :  { %v6360_v10 = vpack.c.bf16 %v5938_v4, %v3469_v9 }
0x1cec   :  { %v5941_v11 = vpop.f32.mrb[36].mxu1  ;;  %6361 = vmatprep.subr.bf16.mxu1 %v6360_v10  ;;  %6377 = vmatprep.subr.bf16.mxu0 %v6360_v10 }
0x1ced   :  { %v3479_v13 = vpop.f32.mrb[37].mxu1  ;;  %6363 = vmatpush3.bf16.msra.mxu1 %v6360_v10  ;;  %6379 = vmatpush3.bf16.msra.mxu0 %v6360_v10 }
0x1cee   :  { %v6364_v14 = vpack.c.bf16 %v5941_v11, %v3479_v13 }
0x1cf0   :  { %6365 = vmatprep.subr.bf16.mxu1 %v6364_v14  ;;  %6381 = vmatprep.subr.bf16.mxu0 %v6364_v14 }
0x1cf1   :  { %6367 = vmatpush3.bf16.msra.mxu1 %v6364_v14  ;;  %6383 = vmatpush3.bf16.msra.mxu0 %v6364_v14 }
0x1cf2   :  { %6385 = vmatprep.subr.bf16.mxu1 %v6352_v2  ;;  %6401 = vmatprep.subr.bf16.mxu0 %v6352_v2 }
0x1cf4   :  { %5978 = vmatmul.mubr.msk.f32.vlgmr.msra.gmra.mrb[36].mxu0 %vm986_vm7, %v2939_v59  ;;  %5959 = vmatmul.mubr.msk.f32.vlgmr.msra.gmra.mrb[38].mxu1 %vm986_vm7, %v2937_v57 }
0x1cf5   :  { %6387 = vmatpush3.bf16.msra.mxu1 %v6352_v2  ;;  %6403 = vmatpush3.bf16.msra.mxu0 %v6352_v2 }
0x1cf6   :  { %6389 = vmatprep.subr.bf16.mxu1 %v6356_v7  ;;  %6405 = vmatprep.subr.bf16.mxu0 %v6356_v7 }
0x1cf7   :  { %5996 = vmatprep.mubr.msk.f32.mxu1 %vm986_vm7, %v2940_v15  ;;  %6015 = vmatprep.mubr.msk.f32.mxu0 %vm986_vm7, %v2942_v16 }
0x1cf9   :  { %6391 = vmatpush3.bf16.msra.mxu1 %v6356_v7  ;;  %6407 = vmatpush3.bf16.msra.mxu0 %v6356_v7  ;;  %v5267_v7 = vld [vmem:[#allocation10] ss:$0 sm:$0xff] }
0x1cfa   :  { %6393 = vmatprep.subr.bf16.mxu1 %v6360_v10  ;;  %6409 = vmatprep.subr.bf16.mxu0 %v6360_v10 }
0x1cfd   :  { %6395 = vmatpush3.bf16.msra.mxu1 %v6360_v10  ;;  %6411 = vmatpush3.bf16.msra.mxu0 %v6360_v10 }
0x1cfe   :  { %6397 = vmatprep.subr.bf16.mxu1 %v6364_v14  ;;  %6413 = vmatprep.subr.bf16.mxu0 %v6364_v14 }
0x1d01   :  { %6399 = vmatpush3.bf16.msra.mxu1 %v6364_v14  ;;  %6415 = vmatpush3.bf16.msra.mxu0 %v6364_v14 }
0x1d02   :  { %6432 = vmatprep.subr.bf16.mxu0 %v7474_v6  ;;  %6417 = vmatprep.subr.bf16.mxu1 %v6416_v23 }
0x1d04   :  { %5997 = vmatmul.mubr.msk.f32.vlgmr.msra.gmra.mrb[40].mxu1 %vm986_vm7, %v2941_v17  ;;  %6016 = vmatmul.mubr.msk.f32.vlgmr.msra.gmra.mrb[38].mxu0 %vm986_vm7, %v2943_v18 }
0x1d05   :  { %6048 = vmatprep.mubr.msk.f32.mxu0 %vm7475_vm13, %v7476_v8  ;;  %6419 = vmatpush3.bf16.msra.mxu1 %v6416_v23 }
0x1d06   :  { %6421 = vmatprep.subr.bf16.mxu1 %v6420_v27 }
0x1d09   :  { %6423 = vmatpush3.bf16.msra.mxu1 %v6420_v27  ;;  %v6433_v27 = vpack.c.bf16 %v2970_v37, %v2969_v39 }
0x1d0b   :  { %6434 = vmatpush3.bf16.msra.mxu0 %v6433_v27 }
0x1d0c   :  { %6435 = vmatprep.subr.bf16.mxu0 %v7474_v6 }
0x1dc7   :  { %v5979_v24 = vpop.f32.mrb[36].mxu0  ;;  %v5960_v33 = vpop.f32.mrb[38].mxu1 }
0x1dc8   :  { %3816 = vrot.lane.b32.xlu1 %v5979_v24, %s7470_s11  ;;  %v3560_v25 = vpop.f32.mrb[39].mxu1  ;;  %v3641_v26 = vpop.f32.mrb[37].mxu0 }
0x1dcc   :  { %3814 = vrot.lane.b32.xlu1 %v3641_v26, %s7470_s11 }
0x1dd7   :  { %v5998_v29 = vpop.f32.mrb[40].mxu1  ;;  %v6017_v8 = vpop.f32.mrb[38].mxu0 }
0x1dd8   :  { %3824 = vrot.lane.b32.xlu1 %v5998_v29, %s7471_s15  ;;  %v3722_v20 = vpop.f32.mrb[41].mxu1  ;;  %v3803_v30 = vpop.f32.mrb[39].mxu0  ;;  %v2964_v29 = vld [vmem:[%s8749_s23] sm:$0xff] }
0x1dd9   :  { %3822 = vrot.lane.b32.xlu0 %v3722_v20, %s7471_s15  ;;  %v2971_v20 = vld [vmem:[%s8748_s22 + $0x10] sm:$0xff] }
0x1dda   :  { %v6436_v35 = vpack.c.bf16 %v2972_v31, %v2971_v20 }
0x1ddc   :  { %3832 = vrot.lane.b32.xlu1 %v6017_v8, %s7472_s30  ;;  %v2965_v8 = vld [vmem:[%s8749_s23 + $0x8] sm:$0xff]  ;;  %6437 = vmatpush3.bf16.msra.mxu0 %v6436_v35 }
0x1ddd   :  { %3830 = vrot.lane.b32.xlu0 %v3803_v30, %s7472_s30  ;;  %v6424_v30 = vpack.c.bf16 %v2965_v8, %v2964_v29 }
0x1ddf   :  { %6425 = vmatprep.subr.bf16.mxu1 %v6424_v30 }
0x1dfc   :  { %2872 = vadd.xlane.f32.xlu0 %v2871_v32  ;;  %v2967_v32 = vld [vmem:[%s8749_s23 + $0x18] sm:$0xff] }
0x1e3a   :  { %v3817_v34 = vpop.permute.xlu1 %3816 }
0x1e3b   :  { %v3837_v46 = vsel %vm848_vm5, %v5960_v33, %v3817_v34 }
0x1e3e   :  { %v3815_v36 = vpop.permute.xlu1 %3814 }
0x1e3f   :  { %v3836_v42 = vsel %vm848_vm5, %v3560_v25, %v3815_v36 }
0x1e4a   :  { %v3825_v38 = vpop.permute.xlu1 %3824 }
0x1e4b   :  { %v3823_v40 = vpop.permute.xlu0 %3822  ;;  %v3839_v52 = vsel %vm1254_vm8, %v3837_v46, %v3825_v38 }
0x1e4c   :  { %v3838_v48 = vsel %vm1254_vm8, %v3836_v42, %v3823_v40 }
0x1e4e   :  { %v3833_v45 = vpop.permute.xlu1 %3832 }
0x1e4f   :  { %v3831_v50 = vpop.permute.xlu0 %3830  ;;  %v3841_v47 = vsel %vm1257_vm9, %v3839_v52, %v3833_v45 }
0x1e50   :  { %v3840_v60 = vsel %vm1257_vm9, %v3838_v48, %v3831_v50 }
0x1e51   :  { %6026 = vmatprep.mubr.msk.f32.mxu1 %vm736_vm4, %v3840_v60  ;;  %v5268_v60 = vld [vmem:[#allocation11] ss:$0 sm:$0xff] }
0x1e52   :  { %6027 = vmatmul.mubr.msk.f32.vlgmr.msra.gmra.mrb[42].mxu1 %vm736_vm4, %v3841_v47 }
0x1e53   :  { %6427 = vmatpush3.bf16.msra.mxu1 %v6424_v30 }
0x1e89   :  { %v2873_v44 = vpop.xlane.xlu0 %2872 }
0x1e8a   :  { %v2874_v49 = vmul.f32 0.03125, %v2873_v44  ;;  %v5269_v44 = vld [vmem:[#allocation13] ss:$0 sm:$0xff] }
0x1e8c   :  { %v2875_v53 = vsub.f32 %v2870_v19, %v2874_v49  ;;  %v2966_v19 = vld [vmem:[%s8749_s23 + $0x10] sm:$0xff] }
0x1e8d   :  { %v6428_v34 = vpack.c.bf16 %v2967_v32, %v2966_v19 }
0x1e8e   :  { %v2876_v12 = vmul.f32 %v2875_v53, %v2875_v53 }
0x1e8f   :  { %6429 = vmatprep.subr.bf16.mxu1 %v6428_v34 }
0x1e90   :  { %v2877_v54 = vsel %vm736_vm4, %v2876_v12, 0.0  ;;  %6431 = vmatpush3.bf16.msra.mxu1 %v6428_v34  ;;  %v5308_v12 = vld [vmem:[#allocation16] ss:$0 sm:$0xff] }
0x1e91   :  { %2878 = vadd.xlane.f32.xlu1 %v2877_v54 }
0x1f1e   :  { %v2879_v56 = vpop.xlane.xlu1 %2878 }
0x1f1f   :  { %v2880_v55 = vmul.f32 0.03125, %v2879_v56 }
0x1f21   :  { %v2881_v58 = vadd.f32 1e-05, %v2880_v55 }
0x1f23   :  { %6808 = vrsqrt.f32 %v2881_v58  ;;  %v5309_v58 = vld [vmem:[#allocation17] ss:$0 sm:$0xff] }
0x1f25   :  { %v6028_v43 = vpop.f32.mrb[42].mxu1 }
0x1f26   :  { %v3926_v62 = vadd.f32 %v6028_v43, %v5305_v61  ;;  %v3920_v63 = vpop.f32.mrb[43].mxu1 }
0x1f27   :  { %v3921_v4 = vadd.f32 %v5305_v61, %v3920_v63 }
0x1f28   :  { %v3930_v0 = vadd.f32 %v3926_v62, %v8266_v51 }
0x1f29   :  { %v3929_v11 = vadd.f32 %v3921_v4, %v8258_v28 }
0x1f2a   :  { %v3934_v1 = vsel %vm736_vm4, %v3930_v0, 0.0 }
0x1f2b   :  { %3935 = vadd.xlane.f32.xlu1 %v3934_v1  ;;  %v3931_v14 = vsel %vm736_vm4, %v3929_v11, 0.0  ;;  %v5313_v1 = vld [vmem:[#allocation19] ss:$0 sm:$0xff] }
0x1f2d   :  { %v6809_v2 = vpop.eup %6808 }
0x1f2e   :  { %v2883_v5 = vmul.f32 %v6809_v2, %v2875_v53 }
0x1f30   :  { %v2890_v9 = vmul.f32 %v5266_v3, %v2883_v5 }
0x1f32   :  { %v2897_v10 = vadd.f32 %v5267_v7, %v2890_v9  ;;  %v5310_v7 = vld [vmem:[%s8750_s26] ss:$0 sm:$0xff] }
0x1f34   :  { %v2900_v13 = vsel %vm736_vm4, %v2897_v10, 0.0 }
0x1f35   :  { %2901 = vadd.xlane.f32.xlu0 %v2900_v13 }
0x1f39   :  { %3932 = vadd.xlane.f32.xlu0 %v3931_v14 }
0x1fb8   :  { %v3936_v59 = vpop.xlane.xlu1 %3935 }
0x1fb9   :  { %v3938_v51 = vmul.f32 0.03125, %v3936_v59 }
0x1fbb   :  { %v3940_v16 = vsub.f32 %v3930_v0, %v3938_v51 }
0x1fbd   :  { %v3942_v24 = vmul.f32 %v3940_v16, %v3940_v16 }
0x1fbf   :  { %v3946_v26 = vsel %vm736_vm4, %v3942_v24, 0.0 }
0x1fc2   :  { %v2902_v57 = vpop.xlane.xlu0 %2901 }
0x1fc3   :  { %v2903_v15 = vmul.f32 0.03125, %v2902_v57 }
0x1fc5   :  { %v2904_v17 = vsub.f32 %v2897_v10, %v2903_v15 }
0x1fc6   :  { %v3933_v18 = vpop.xlane.xlu0 %3932 }
0x1fc7   :  { %v3937_v21 = vmul.f32 0.03125, %v3933_v18  ;;  %v2905_v22 = vmul.f32 %v2904_v17, %v2904_v17 }
0x1fc9   :  { %v3939_v28 = vsub.f32 %v3929_v11, %v3937_v21  ;;  %v2906_v23 = vsel %vm736_vm4, %v2905_v22, 0.0 }
0x1fca   :  { %2907 = vadd.xlane.f32.xlu0 %v2906_v23 }
0x1fcb   :  { %v3941_v33 = vmul.f32 %v3939_v28, %v3939_v28 }
0x1fcd   :  { %v3943_v25 = vsel %vm736_vm4, %v3941_v33, 0.0 }
0x1fce   :  { %3944 = vadd.xlane.f32.xlu1 %v3943_v25  ;;  %3947 = vadd.xlane.f32.xlu0 %v3946_v26 }
0x2057   :  { %v2908_v36 = vpop.xlane.xlu0 %2907 }
0x2058   :  { %v2909_v38 = vmul.f32 0.03125, %v2908_v36 }
0x205a   :  { %v2910_v40 = vadd.f32 1e-05, %v2909_v38 }
0x205b   :  { %v3948_v42 = vpop.xlane.xlu0 %3947  ;;  %v3945_v45 = vpop.xlane.xlu1 %3944 }
0x205c   :  { %6810 = vrsqrt.f32 %v2910_v40  ;;  %v3950_v6 = vmul.f32 0.03125, %v3948_v42  ;;  %v3949_v46 = vmul.f32 0.03125, %v3945_v45 }
0x205e   :  { %v3952_v48 = vadd.f32 1e-05, %v3950_v6  ;;  %v3951_v50 = vadd.f32 1e-05, %v3949_v46 }
0x2060   :  { %6812 = vrsqrt.f32 %v3952_v48 }
0x2061   :  { %6814 = vrsqrt.f32 %v3951_v50 }
0x2066   :  { %v6811_v52 = vpop.eup %6810 }
0x2067   :  { %v2912_v47 = vmul.f32 %v6811_v52, %v2904_v17 }
0x2069   :  { %v2919_v49 = vmul.f32 %v5268_v60, %v2912_v47 }
0x206a   :  { %v6813_v53 = vpop.eup %6812 }
0x206b   :  { %v6815_v54 = vpop.eup %6814  ;;  %v3956_v56 = vmul.f32 %v6813_v53, %v3940_v16  ;;  %v2926_v55 = vadd.f32 %v5269_v44, %v2919_v49 }
0x206c   :  { %v3955_v61 = vmul.f32 %v6815_v54, %v3939_v28 }
0x206d   :  { %6049 = vmatmul.mubr.msk.f32.vlgmr.msra.gmra.mrb[40].mxu0 %vm736_vm4, %v2926_v55  ;;  %2927 = vst.msk [vmem:[#allocation35] sm:$0xff] %vm736_vm4, %v2926_v55  ;;  %v3964_v43 = vmul.f32 %v5308_v12, %v3956_v56 }
0x206e   :  { %v3963_v62 = vmul.f32 %v5308_v12, %v3955_v61 }
0x206f   :  { %v8456_v63 = vadd.f32 %v5309_v58, %v3964_v43 }
0x2070   :  { %v8458_v0 = vadd.f32 %v5309_v58, %v3963_v62 }
0x2072   :  { %6037 = vmatprep.mubr.msk.f32.mxu1 %vm736_vm4, %v8458_v0 }
0x2073   :  { %6038 = vmatmul.mubr.msk.f32.vlgmr.msra.gmra.mrb[44].mxu1 %vm736_vm4, %v8456_v63 }
0x2140   :  { %v4135_v2 = vpop.f32.mrb[40].mxu0 }
0x2141   :  { %v8464_v3 = vadd.f32 %v5313_v1, %v4135_v2  ;;  %v6050_v5 = vpop.f32.mrb[41].mxu0 }
0x2143   :  { %4154 = vrot.lane.b32.xlu1 %v8464_v3, %s7466_s4  ;;  %4156 = vrot.lane.b32.xlu0 %v8464_v3, %s7465_s1 }
0x2146   :  { %v6039_v4 = vpop.f32.mrb[44].mxu1 }
0x2147   :  { %v4057_v9 = vadd.f32 %v6039_v4, %v5310_v7  ;;  %v4051_v10 = vpop.f32.mrb[45].mxu1  ;;  %4158 = vrot.lane.b32.xlu1 %v8464_v3, %s7467_s25 }
0x2148   :  { %v4052_v11 = vadd.f32 %v5310_v7, %v4051_v10 }
0x2149   :  { %4143 = vrot.lane.b32.xlu0 %v4057_v9, %s7466_s4 }
0x214a   :  { %6059 = vmatprep.mubr.msk.f32.mxu1 %vm848_vm5, %v4052_v11 }
0x214b   :  { %4141 = vrot.lane.b32.xlu1 %v4052_v11, %s7466_s4  ;;  %s8752_s4 = sld [smem:[#allocation91_spill]] }
0x214d   :  { %4147 = vrot.lane.b32.xlu0 %v4057_v9, %s7465_s1 }
0x214f   :  { %4145 = vrot.lane.b32.xlu1 %v4052_v11, %s7465_s1  ;;  %s8751_s1 = sld [smem:[#allocation82_spill]] }
0x2151   :  { %4151 = vrot.lane.b32.xlu0 %v4057_v9, %s7467_s25 }
0x2153   :  { %4149 = vrot.lane.b32.xlu1 %v4052_v11, %s7467_s25  ;;  %s8753_s25 = sld [smem:[#allocation93_spill]] }
0x2155   :  { %v2945_v28 = vld [vmem:[%s8751_s1 + $0x8] sm:$0xff]  ;;  %v2944_v23 = vld [vmem:[%s8751_s1] sm:$0xff]  ;;  %v2947_v39 = vld [vmem:[%s8751_s1 + $0x18] sm:$0xff] }
0x2156   :  { %v2946_v27 = vld [vmem:[%s8751_s1 + $0x10] sm:$0xff]  ;;  %v2949_v35 = vld [vmem:[%s8751_s1 + $0x28] sm:$0xff]  ;;  %v2948_v32 = vld [vmem:[%s8751_s1 + $0x20] sm:$0xff] }
0x2157   :  { %v2951_v45 = vld [vmem:[%s8751_s1 + $0x38] sm:$0xff]  ;;  %v2950_v46 = vld [vmem:[%s8751_s1 + $0x30] sm:$0xff] }
0x21b5   :  { %v8480_v13 = vpop.permute.xlu1 %4154  ;;  %v8486_v59 = vpop.permute.xlu0 %4156 }
0x21b6   :  { %v6438_v14 = vpack.c.bf16 %v8480_v13, %v8464_v3 }
0x21b8   :  { %6440 = vmatprep.subr.msk.bf16.mxu1 %vm7971_vm6, %v6438_v14 }
0x21b9   :  { %6443 = vmatpush3.bf16.xpose.msk.msra.mxu1 %vm7971_vm6, %v6438_v14  ;;  %v8490_v51 = vpop.permute.xlu1 %4158 }
0x21ba   :  { %v6444_v57 = vpack.c.bf16 %v8490_v51, %v8486_v59  ;;  %v6697_v15 = vpack.i.bf16 %v8490_v51, %v8486_v59 }
0x21bb   :  { %v4144_v17 = vpop.permute.xlu0 %4143 }
0x21bc   :  { %6446 = vmatprep.subr.msk.bf16.mxu1 %vm7971_vm6, %v6444_v57 }
0x21bd   :  { %v4142_v16 = vpop.permute.xlu1 %4141 }
0x21bf   :  { %v4148_v21 = vpop.permute.xlu0 %4147 }
0x21c1   :  { %6449 = vmatpush3.bf16.xpose.msk.msra.mxu1 %vm7971_vm6, %v6444_v57  ;;  %v4146_v18 = vpop.permute.xlu1 %4145 }
0x21c3   :  { %v4152_v41 = vpop.permute.xlu0 %4151 }
0x21c5   :  { %v4150_v22 = vpop.permute.xlu1 %4149 }
0x21c8   :  { %6060 = vmatmul.mubr.msk.f32.vlgmr.msra.gmra.mrb[46].mxu1 %vm848_vm5, %v4057_v9 }
0x21c9   :  { %6062 = vmatprep.mubr.msk.f32.mxu1 %vm848_vm5, %v4142_v16 }
0x21cc   :  { %6063 = vmatmul.mubr.msk.f32.gmra.mrb[48].mxu1 %vm848_vm5, %v4144_v17 }
0x21cd   :  { %6065 = vmatprep.mubr.msk.f32.mxu1 %vm848_vm5, %v4146_v18 }
0x21d0   :  { %6066 = vmatmul.mubr.msk.f32.gmra.mrb[50].mxu1 %vm848_vm5, %v4148_v21 }
0x21d1   :  { %6068 = vmatprep.mubr.msk.f32.mxu1 %vm848_vm5, %v4150_v22 }
0x21d4   :  { %6069 = vmatmul.mubr.msk.f32.gmra.mrb[52].mxu1 %vm848_vm5, %v4152_v41 }
0x229b   :  { %v6061_v24 = vpop.f32.mrb[46].mxu1 }
0x229c   :  { %v4256_v33 = vadd.f32 %v6061_v24, %v2945_v28  ;;  %v4250_v25 = vpop.f32.mrb[47].mxu1 }
0x229d   :  { %v4251_v26 = vadd.f32 %v4250_v25, %v2944_v23 }
0x229e   :  { %v4292_v37 = vsel %vm736_vm4, %v4256_v33, -inf }
0x229f   :  { %4293 = vmax.xlane.f32.xlu0 %v4292_v37  ;;  %v6064_v29 = vpop.f32.mrb[48].mxu1  ;;  %v4289_v8 = vsel %vm736_vm4, %v4251_v26, -inf }
0x22a0   :  { %v4266_v20 = vadd.f32 %v6064_v29, %v2947_v39  ;;  %4290 = vmax.xlane.f32.xlu1 %v4289_v8  ;;  %v4260_v30 = vpop.f32.mrb[49].mxu1 }
0x22a1   :  { %v4261_v31 = vadd.f32 %v4260_v30, %v2946_v27 }
0x22a2   :  { %v4298_v19 = vsel %vm736_vm4, %v4266_v20, -inf }
0x22a3   :  { %v6067_v34 = vpop.f32.mrb[50].mxu1  ;;  %v4295_v36 = vsel %vm736_vm4, %v4261_v31, -inf }
0x22a4   :  { %v4276_v38 = vadd.f32 %v6067_v34, %v2949_v35  ;;  %4299 = vmax.xlane.f32.xlu1 %v4298_v19  ;;  %4296 = vmax.xlane.f32.xlu0 %v4295_v36  ;;  %v4270_v40 = vpop.f32.mrb[51].mxu1  ;;  %v6692_v19 = vpack.i.bf16 %v8480_v13, %v8464_v3 }
0x22a5   :  { %v4271_v42 = vadd.f32 %v4270_v40, %v2948_v32 }
0x22a6   :  { %v4304_v6 = vsel %vm736_vm4, %v4276_v38, -inf }
0x22a7   :  { %v6070_v48 = vpop.f32.mrb[52].mxu1  ;;  %v4301_v50 = vsel %vm736_vm4, %v4271_v42, -inf }
0x22a8   :  { %v4286_v52 = vadd.f32 %v6070_v48, %v2951_v45  ;;  %4305 = vmax.xlane.f32.xlu1 %v4304_v6  ;;  %4302 = vmax.xlane.f32.xlu0 %v4301_v50  ;;  %v4280_v60 = vpop.f32.mrb[53].mxu1 }
0x22a9   :  { %v4281_v47 = vadd.f32 %v4280_v60, %v2950_v46 }
0x22aa   :  { %v4310_v44 = vsel %vm736_vm4, %v4286_v52, -inf }
0x22ab   :  { %v4307_v49 = vsel %vm736_vm4, %v4281_v47, -inf }
0x22ac   :  { %4311 = vmax.xlane.f32.xlu1 %v4310_v44  ;;  %4308 = vmax.xlane.f32.xlu0 %v4307_v49 }
0x232c   :  { %v4294_v53 = vpop.xlane.xlu0 %4293 }
0x232d   :  { %v4314_v12 = vsub.f32 %v4256_v33, %v4294_v53  ;;  %v4291_v54 = vpop.xlane.xlu1 %4290 }
0x232e   :  { %v4313_v56 = vsub.f32 %v4251_v26, %v4291_v54 }
0x232f   :  { %v4323_v55 = vmul.f32 1.442695, %v4314_v12 }
0x2330   :  { %v4321_v58 = vmul.f32 1.442695, %v4313_v56 }
0x2331   :  { %6816 = vpow2.f32 %v4323_v55  ;;  %v4297_v61 = vpop.xlane.xlu0 %4296  ;;  %v4300_v43 = vpop.xlane.xlu1 %4299 }
0x2332   :  { %6818 = vpow2.f32 %v4321_v58  ;;  %v4315_v62 = vsub.f32 %v4261_v31, %v4297_v61  ;;  %v4316_v1 = vsub.f32 %v4266_v20, %v4300_v43 }
0x2334   :  { %v4325_v2 = vmul.f32 1.442695, %v4315_v62  ;;  %v4327_v5 = vmul.f32 1.442695, %v4316_v1 }
0x2335   :  { %v4303_v7 = vpop.xlane.xlu0 %4302  ;;  %v4306_v4 = vpop.xlane.xlu1 %4305 }
0x2336   :  { %6820 = vpow2.f32 %v4325_v2  ;;  %v4317_v9 = vsub.f32 %v4271_v42, %v4303_v7  ;;  %v4318_v10 = vsub.f32 %v4276_v38, %v4306_v4  ;;  %v2975_v7 = vld [vmem:[%s8752_s4 + $0x8] sm:$0xff] }
0x2337   :  { %6822 = vpow2.f32 %v4327_v5  ;;  %v2974_v5 = vld [vmem:[%s8752_s4] sm:$0xff] }
0x2338   :  { %v4329_v11 = vmul.f32 1.442695, %v4317_v9  ;;  %v4331_v14 = vmul.f32 1.442695, %v4318_v10  ;;  %v6458_v4 = vpack.c.bf16 %v2975_v7, %v2974_v5  ;;  %v2976_v9 = vld [vmem:[%s8752_s4 + $0x10] sm:$0xff]  ;;  %v2977_v10 = vld [vmem:[%s8752_s4 + $0x18] sm:$0xff] }
0x2339   :  { %v4309_v57 = vpop.xlane.xlu0 %4308  ;;  %v4312_v16 = vpop.xlane.xlu1 %4311 }
0x233a   :  { %6824 = vpow2.f32 %v4329_v11  ;;  %v4319_v17 = vsub.f32 %v4281_v47, %v4309_v57  ;;  %v4320_v18 = vsub.f32 %v4286_v52, %v4312_v16  ;;  %v6462_v11 = vpack.c.bf16 %v2977_v10, %v2976_v9 }
0x233b   :  { %v8523_v21 = vpop.eup %6816  ;;  %6826 = vpow2.f32 %v4331_v14 }
0x233c   :  { %v6819_v22 = vpop.eup %6818  ;;  %v4333_v41 = vmul.f32 1.442695, %v4319_v17  ;;  %v4335_v28 = vmul.f32 1.442695, %v4320_v18  ;;  %v4340_v23 = vsel %vm736_vm4, %v8523_v21, 0.0 }
0x233d   :  { %4341 = vadd.xlane.f32.xlu1 %v4340_v23  ;;  %v4337_v24 = vsel %vm736_vm4, %v6819_v22, 0.0 }
0x233e   :  { %6828 = vpow2.f32 %v4333_v41  ;;  %4338 = vadd.xlane.f32.xlu0 %v4337_v24 }
0x233f   :  { %6830 = vpow2.f32 %v4335_v28 }
0x2340   :  { %v6821_v33 = vpop.eup %6820 }
0x2341   :  { %v6823_v25 = vpop.eup %6822  ;;  %v4343_v26 = vsel %vm736_vm4, %v6821_v33, 0.0 }
0x2342   :  { %4344 = vadd.xlane.f32.xlu0 %v4343_v26  ;;  %v4346_v39 = vsel %vm736_vm4, %v6823_v25, 0.0 }
0x2343   :  { %4347 = vadd.xlane.f32.xlu1 %v4346_v39 }
0x2344   :  { %v6825_v37 = vpop.eup %6824 }
0x2345   :  { %v6827_v27 = vpop.eup %6826  ;;  %v4349_v29 = vsel %vm736_vm4, %v6825_v37, 0.0 }
0x2346   :  { %4350 = vadd.xlane.f32.xlu0 %v4349_v29  ;;  %v4352_v8 = vsel %vm736_vm4, %v6827_v27, 0.0 }
0x2347   :  { %4353 = vadd.xlane.f32.xlu1 %v4352_v8 }
0x2348   :  { %v6829_v20 = vpop.eup %6828 }
0x2349   :  { %v6831_v30 = vpop.eup %6830  ;;  %v4355_v31 = vsel %vm736_vm4, %v6829_v20, 0.0 }
0x234a   :  { %4356 = vadd.xlane.f32.xlu0 %v4355_v31  ;;  %v4358_v35 = vsel %vm736_vm4, %v6831_v30, 0.0 }
0x234b   :  { %4359 = vadd.xlane.f32.xlu1 %v4358_v35 }
0x235c   :  { %6698 = vrot.lane.b32.xlu1 %v6697_v15, %s7468_s2 }
0x2360   :  { %6693 = vrot.lane.b32.xlu0 %v6692_v19, %s7468_s2  ;;  %s8754_s2 = sld [smem:[#allocation95_spill]] }
0x2366   :  { %v2986_v9 = vld [vmem:[%s8754_s2] sm:$0xff]  ;;  %v2987_v10 = vld [vmem:[%s8754_s2 + $0x8] sm:$0xff] }
0x23ca   :  { %v4342_v32 = vpop.xlane.xlu1 %4341 }
0x23cb   :  { %v4339_v34 = vpop.xlane.xlu0 %4338 }
0x23cc   :  { %6832 = vrcp.f32 %v4339_v34 }
0x23cd   :  { %6834 = vrcp.f32 %v4342_v32 }
0x23cf   :  { %v4345_v36 = vpop.xlane.xlu0 %4344 }
0x23d0   :  { %v4348_v38 = vpop.xlane.xlu1 %4347  ;;  %6836 = vrcp.f32 %v4345_v36 }
0x23d1   :  { %6838 = vrcp.f32 %v4348_v38 }
0x23d3   :  { %v4351_v40 = vpop.xlane.xlu0 %4350 }
0x23d4   :  { %v4354_v42 = vpop.xlane.xlu1 %4353  ;;  %6840 = vrcp.f32 %v4351_v40 }
0x23d5   :  { %6842 = vrcp.f32 %v4354_v42 }
0x23d6   :  { %v6833_v45 = vpop.eup %6832 }
0x23d7   :  { %v4357_v6 = vpop.xlane.xlu0 %4356  ;;  %v4362_v46 = vmul.f32 %v6833_v45, %v6819_v22  ;;  %v6835_v47 = vpop.eup %6834 }
0x23d8   :  { %v4360_v48 = vpop.xlane.xlu1 %4359  ;;  %6844 = vrcp.f32 %v4357_v6  ;;  %v4364_v49 = vmul.f32 %v6835_v47, %v8523_v21 }
0x23d9   :  { %6079 = vmatprep.mubr.msk.f32.mxu0 %vm736_vm4, %v4362_v46  ;;  %6846 = vrcp.f32 %v4360_v48 }
0x23da   :  { %v6837_v44 = vpop.eup %6836 }
0x23db   :  { %v6694_v59 = vpop.permute.xlu0 %6693  ;;  %v6839_v53 = vpop.eup %6838  ;;  %v4366_v12 = vmul.f32 %v6837_v44, %v6821_v33 }
0x23dc   :  { %v6696_v51 = vunpack.i.h.bf16 %v6694_v59  ;;  %v6695_v3 = vunpack.i.l.bf16 %v6694_v59  ;;  %v6699_v13 = vpop.permute.xlu1 %6698  ;;  %v4368_v56 = vmul.f32 %v6839_v53, %v6823_v25 }
0x23dd   :  { %v6701_v15 = vunpack.i.h.bf16 %v6699_v13  ;;  %v6700_v50 = vunpack.i.l.bf16 %v6699_v13  ;;  %v2981_v13 = vld [vmem:[%s8753_s25] sm:$0xff] }
0x23de   :  { %v6450_v52 = vpack.c.bf16 %v6696_v51, %v6695_v3  ;;  %v6841_v54 = vpop.eup %6840 }
0x23df   :  { %v6454_v60 = vpack.c.bf16 %v6701_v15, %v6700_v50  ;;  %v6843_v55 = vpop.eup %6842  ;;  %v4370_v58 = vmul.f32 %v6841_v54, %v6825_v37  ;;  %v2982_v15 = vld [vmem:[%s8753_s25 + $0x8] sm:$0xff] }
0x23e0   :  { %6451 = vmatprep.subr.bf16.mxu0 %v6450_v52  ;;  %v4372_v43 = vmul.f32 %v6843_v55, %v6827_v27  ;;  %v6466_v50 = vpack.c.bf16 %v2982_v15, %v2981_v13 }
0x23e1   :  { %6453 = vmatpush3.bf16.msra.mxu0 %v6450_v52  ;;  %v2983_v52 = vld [vmem:[%s8753_s25 + $0x10] sm:$0xff] }
0x23e2   :  { %6455 = vmatprep.subr.bf16.mxu0 %v6454_v60  ;;  %v6845_v61 = vpop.eup %6844  ;;  %6467 = vmatprep.subr.bf16.mxu1 %v6466_v50 }
0x23e3   :  { %v6847_v62 = vpop.eup %6846  ;;  %v4374_v1 = vmul.f32 %v6845_v61, %v6829_v20  ;;  %6469 = vmatpush3.bf16.msra.mxu1 %v6466_v50 }
0x23e4   :  { %v4376_v2 = vmul.f32 %v6847_v62, %v6831_v30  ;;  %v5335_v30 = vld [vmem:[#allocation20] ss:$0 sm:$0xff] }
0x23e5   :  { %6457 = vmatpush3.bf16.msra.mxu0 %v6454_v60  ;;  %v2984_v60 = vld [vmem:[%s8753_s25 + $0x18] sm:$0xff] }
0x23e6   :  { %6459 = vmatprep.subr.bf16.mxu0 %v6458_v4  ;;  %v6470_v47 = vpack.c.bf16 %v2984_v60, %v2983_v52 }
0x23e8   :  { %6080 = vmatmul.mubr.msk.f32.vlgmr.msra.gmra.mrb[42].mxu0 %vm736_vm4, %v4364_v49  ;;  %6471 = vmatprep.subr.bf16.mxu1 %v6470_v47 }
0x23e9   :  { %6082 = vmatprep.mubr.msk.f32.mxu0 %vm736_vm4, %v4366_v12  ;;  %6461 = vmatpush3.bf16.msra.mxu0 %v6458_v4 }
0x23ea   :  { %6463 = vmatprep.subr.bf16.mxu0 %v6462_v11  ;;  %6473 = vmatpush3.bf16.msra.mxu1 %v6470_v47 }
0x23ec   :  { %6083 = vmatmul.mubr.msk.f32.gmra.mrb[44].mxu0 %vm736_vm4, %v4368_v56 }
0x23ed   :  { %6085 = vmatprep.mubr.msk.f32.mxu0 %vm736_vm4, %v4370_v58  ;;  %6465 = vmatpush3.bf16.msra.mxu0 %v6462_v11  ;;  %v5338_v58 = vld [vmem:[#allocation22] ss:$0 sm:$0xff]  ;;  %v6474_v11 = vpack.c.bf16 %v2987_v10, %v2986_v9 }
0x23ef   :  { %6475 = vmatprep.subr.bf16.mxu0 %v6474_v11 }
0x23f0   :  { %6086 = vmatmul.mubr.msk.f32.gmra.mrb[46].mxu0 %vm736_vm4, %v4372_v43 }
0x23f1   :  { %6088 = vmatprep.mubr.msk.f32.mxu0 %vm736_vm4, %v4374_v1  ;;  %v5339_v1 = vld [vmem:[#allocation23] ss:$0 sm:$0xff] }
0x23f4   :  { %6089 = vmatmul.mubr.msk.f32.gmra.mrb[48].mxu0 %vm736_vm4, %v4376_v2 }
0x24bb   :  { %v6081_v14 = vpop.f32.mrb[42].mxu0 }
0x24bc   :  { %v4479_v57 = vpop.f32.mrb[43].mxu0 }
0x24bf   :  { %v6084_v16 = vpop.f32.mrb[44].mxu0 }
0x24c0   :  { %4522 = vrot.lane.b32.xlu0 %v6084_v16, %s7470_s11  ;;  %v4489_v17 = vpop.f32.mrb[45].mxu0 }
0x24c1   :  { %4520 = vrot.lane.b32.xlu1 %v4489_v17, %s7470_s11  ;;  %v5340_v17 = vld [vmem:[#allocation25] ss:$0 sm:$0xff] }
0x24c3   :  { %v6087_v18 = vpop.f32.mrb[46].mxu0 }
0x24c4   :  { %4530 = vrot.lane.b32.xlu0 %v6087_v18, %s7471_s15  ;;  %v4499_v21 = vpop.f32.mrb[47].mxu0 }
0x24c5   :  { %4528 = vrot.lane.b32.xlu1 %v4499_v21, %s7471_s15 }
0x24c7   :  { %v6090_v22 = vpop.f32.mrb[48].mxu0 }
0x24c8   :  { %4538 = vrot.lane.b32.xlu0 %v6090_v22, %s7472_s30  ;;  %v4509_v41 = vpop.f32.mrb[49].mxu0 }
0x24c9   :  { %4536 = vrot.lane.b32.xlu1 %v4509_v41, %s7472_s30 }
0x2532   :  { %v4523_v28 = vpop.permute.xlu0 %4522 }
0x2533   :  { %v4521_v23 = vpop.permute.xlu1 %4520  ;;  %v4543_v39 = vsel %vm848_vm5, %v6081_v14, %v4523_v28  ;;  %v2988_v14 = vld [vmem:[%s8754_s2 + $0x10] sm:$0xff] }
0x2534   :  { %v4542_v25 = vsel %vm848_vm5, %v4479_v57, %v4521_v23  ;;  %v2989_v57 = vld [vmem:[%s8754_s2 + $0x18] sm:$0xff] }
0x2535   :  { %v6478_v16 = vpack.c.bf16 %v2989_v57, %v2988_v14 }
0x2536   :  { %v4531_v24 = vpop.permute.xlu0 %4530 }
0x2537   :  { %v4529_v33 = vpop.permute.xlu1 %4528  ;;  %v4545_v29 = vsel %vm1254_vm8, %v4543_v39, %v4531_v24 }
0x2538   :  { %v4544_v37 = vsel %vm1254_vm8, %v4542_v25, %v4529_v33 }
0x253a   :  { %v4539_v26 = vpop.permute.xlu0 %4538 }
0x253b   :  { %v4537_v27 = vpop.permute.xlu1 %4536  ;;  %v4547_v20 = vsel %vm1257_vm9, %v4545_v29, %v4539_v26 }
0x253c   :  { %v4546_v8 = vsel %vm1257_vm9, %v4544_v37, %v4537_v27 }
0x253d   :  { %6099 = vmatprep.mubr.msk.f32.mxu0 %vm736_vm4, %v4546_v8 }
0x253e   :  { %6100 = vmatmul.mubr.msk.f32.vlgmr.msra.gmra.mrb[50].mxu0 %vm736_vm4, %v4547_v20 }
0x253f   :  { %6477 = vmatpush3.bf16.msra.mxu0 %v6474_v11 }
0x2540   :  { %6479 = vmatprep.subr.bf16.mxu0 %v6478_v16 }
0x2543   :  { %6481 = vmatpush3.bf16.msra.mxu0 %v6478_v16 }
0x2611   :  { %v6101_v31 = vpop.f32.mrb[50].mxu0 }
0x2612   :  { %v4632_v35 = vadd.f32 %v6101_v31, %v5335_v30  ;;  %v4626_v19 = vpop.f32.mrb[51].mxu0 }
0x2613   :  { %v4627_v32 = vadd.f32 %v5335_v30, %v4626_v19 }
0x2614   :  { %v4636_v34 = vadd.f32 %v4632_v35, %v8456_v63 }
0x2615   :  { %v4635_v36 = vadd.f32 %v4627_v32, %v8458_v0 }
0x2616   :  { %v4640_v38 = vsel %vm736_vm4, %v4636_v34, 0.0 }
0x2617   :  { %4641 = vadd.xlane.f32.xlu0 %v4640_v38  ;;  %v4637_v40 = vsel %vm736_vm4, %v4635_v36, 0.0 }
0x2618   :  { %4638 = vadd.xlane.f32.xlu1 %v4637_v40 }
0x26a4   :  { %v4642_v42 = vpop.xlane.xlu0 %4641 }
0x26a5   :  { %v4644_v45 = vmul.f32 0.03125, %v4642_v42  ;;  %v4639_v6 = vpop.xlane.xlu1 %4638 }
0x26a6   :  { %v4643_v46 = vmul.f32 0.03125, %v4639_v6 }
0x26a7   :  { %v4646_v48 = vsub.f32 %v4636_v34, %v4644_v45 }
0x26a8   :  { %v4645_v59 = vsub.f32 %v4635_v36, %v4643_v46 }
0x26a9   :  { %v4648_v51 = vmul.f32 %v4646_v48, %v4646_v48 }
0x26aa   :  { %v4647_v63 = vmul.f32 %v4645_v59, %v4645_v59 }
0x26ab   :  { %v4652_v0 = vsel %vm736_vm4, %v4648_v51, 0.0 }
0x26ac   :  { %4653 = vadd.xlane.f32.xlu1 %v4652_v0  ;;  %v4649_v3 = vsel %vm736_vm4, %v4647_v63, 0.0 }
0x26ad   :  { %4650 = vadd.xlane.f32.xlu0 %v4649_v3 }
0x2739   :  { %v4654_v44 = vpop.xlane.xlu1 %4653 }
0x273a   :  { %v4656_v49 = vmul.f32 0.03125, %v4654_v44  ;;  %v4651_v53 = vpop.xlane.xlu0 %4650 }
0x273b   :  { %v4655_v12 = vmul.f32 0.03125, %v4651_v53 }
0x273c   :  { %v4658_v54 = vadd.f32 1e-05, %v4656_v49 }
0x273d   :  { %v4657_v56 = vadd.f32 1e-05, %v4655_v12 }
0x273e   :  { %6848 = vrsqrt.f32 %v4658_v54 }
0x273f   :  { %6850 = vrsqrt.f32 %v4657_v56 }
0x2748   :  { %v6849_v55 = vpop.eup %6848 }
0x2749   :  { %v6851_v61 = vpop.eup %6850  ;;  %v4662_v43 = vmul.f32 %v6849_v55, %v4646_v48 }
0x274a   :  { %v4661_v62 = vmul.f32 %v6851_v61, %v4645_v59 }
0x274b   :  { %v4670_v2 = vmul.f32 %v5338_v58, %v4662_v43 }
0x274c   :  { %v4669_v5 = vmul.f32 %v5338_v58, %v4661_v62 }
0x274d   :  { %v8580_v4 = vadd.f32 %v5339_v1, %v4670_v2 }
0x274e   :  { %v8578_v7 = vadd.f32 %v5339_v1, %v4669_v5  ;;  %v5343_v5 = vld [vmem:[#allocation26] ss:$0 sm:$0xff] }
0x2750   :  { %6110 = vmatprep.mubr.msk.f32.mxu1 %vm736_vm4, %v8578_v7 }
0x2751   :  { %6111 = vmatmul.mubr.msk.f32.vlgmr.msra.gmra.mrb[54].mxu1 %vm736_vm4, %v8580_v4 }
0x2824   :  { %v6112_v18 = vpop.f32.mrb[54].mxu1 }
0x2825   :  { %v4763_v21 = vadd.f32 %v6112_v18, %v5340_v17  ;;  %v4757_v22 = vpop.f32.mrb[55].mxu1 }
0x2826   :  { %v4758_v41 = vadd.f32 %v5340_v17, %v4757_v22 }
0x2827   :  { %v4767_v28 = vmul.f32 0.70710677, %v4763_v21  ;;  %v4815_v62 = vmul.f32 0.5, %v4763_v21 }
0x2828   :  { %v4766_v23 = vmul.f32 0.70710677, %v4758_v41  ;;  %v4814_v61 = vmul.f32 0.5, %v4758_v41 }
0x2829   :  { %v4769_v24 = vand.u32 2147483647, %v4767_v28  ;;  %vm4809_vm1 = vcmp.ge.f32.partialorder %v4767_v28, 0.0 }
0x282a   :  { %v4768_v33 = vand.u32 2147483647, %v4766_v23  ;;  %vm4808_vm2 = vcmp.ge.f32.partialorder %v4766_v23, 0.0 }
0x282b   :  { %v4771_v25 = vmul.f32 0.3275911, %v4769_v24  ;;  %v4797_v27 = vsub.f32 0.0, %v4769_v24 }
0x282c   :  { %v4770_v26 = vmul.f32 0.3275911, %v4768_v33  ;;  %v4796_v29 = vsub.f32 0.0, %v4768_v33 }
0x282d   :  { %v4773_v39 = vadd.f32 1.0, %v4771_v25  ;;  %v4799_v20 = vmul.f32 %v4797_v27, %v4769_v24 }
0x282e   :  { %v4772_v37 = vadd.f32 1.0, %v4770_v26  ;;  %v4798_v35 = vmul.f32 %v4796_v29, %v4768_v33 }
0x282f   :  { %6852 = vrcp.f32 %v4773_v39  ;;  %v4802_v34 = vmul.f32 1.442695, %v4799_v20 }
0x2830   :  { %6854 = vrcp.f32 %v4772_v37  ;;  %v4800_v40 = vmul.f32 1.442695, %v4798_v35 }
0x2831   :  { %6856 = vpow2.f32 %v4802_v34 }
0x2832   :  { %6858 = vpow2.f32 %v4800_v40 }
0x2839   :  { %v6853_v8 = vpop.eup %6852 }
0x283a   :  { %v6855_v30 = vpop.eup %6854  ;;  %v4779_v31 = vmul.f32 1.0614054, %v6853_v8 }
0x283b   :  { %v4778_v19 = vmul.f32 1.0614054, %v6855_v30  ;;  %v6857_v50 = vpop.eup %6856 }
0x283c   :  { %v4781_v32 = vadd.f32 -1.4531521, %v4779_v31  ;;  %v6859_v60 = vpop.eup %6858 }
0x283d   :  { %v4780_v36 = vadd.f32 -1.4531521, %v4778_v19  ;;  %v5347_v19 = vld [vmem:[#allocation29] ss:$0 sm:$0xff] }
0x283e   :  { %v4783_v38 = vmul.f32 %v6853_v8, %v4781_v32 }
0x283f   :  { %v4782_v42 = vmul.f32 %v6855_v30, %v4780_v36 }
0x2840   :  { %v4785_v45 = vadd.f32 1.4214138, %v4783_v38 }
0x2841   :  { %v4784_v6 = vadd.f32 1.4214138, %v4782_v42 }
0x2842   :  { %v4787_v46 = vmul.f32 %v6853_v8, %v4785_v45 }
0x2843   :  { %v4786_v48 = vmul.f32 %v6855_v30, %v4784_v6 }
0x2844   :  { %v4789_v59 = vadd.f32 -0.28449672, %v4787_v46 }
0x2845   :  { %v4788_v51 = vadd.f32 -0.28449672, %v4786_v48 }
0x2846   :  { %v4791_v63 = vmul.f32 %v6853_v8, %v4789_v59 }
0x2847   :  { %v4790_v0 = vmul.f32 %v6855_v30, %v4788_v51 }
0x2848   :  { %v4793_v3 = vadd.f32 0.2548296, %v4791_v63 }
0x2849   :  { %v4792_v13 = vadd.f32 0.2548296, %v4790_v0 }
0x284a   :  { %v4795_v15 = vmul.f32 %v6853_v8, %v4793_v3 }
0x284b   :  { %v4794_v52 = vmul.f32 %v6855_v30, %v4792_v13  ;;  %v5346_v30 = vld [vmem:[#allocation28] ss:$0 sm:$0xff] }
0x284c   :  { %v4805_v47 = vmul.f32 %v6857_v50, %v4795_v15  ;;  %v4953_v50 = vld [vmem:[%s7806_s19] sm:$0xff] }
0x284d   :  { %v4804_v44 = vmul.f32 %v6859_v60, %v4794_v52  ;;  %v4954_v52 = vld [vmem:[%s7806_s19 + $0x8] sm:$0xff] }
0x284e   :  { %v4807_v49 = vsub.f32 1.0, %v4805_v47  ;;  %v6482_v60 = vpack.c.bf16 %v4954_v52, %v4953_v50  ;;  %v4955_v47 = vld [vmem:[%s7806_s19 + $0x10] sm:$0xff] }
0x284f   :  { %v4806_v53 = vsub.f32 1.0, %v4804_v44  ;;  %v4956_v44 = vld [vmem:[%s7806_s19 + $0x18] sm:$0xff]  ;;  %s7477_s19 = smov [#allocation35]  }
0x2850   :  { %v4811_v12 = vsub.f32 0.0, %v4807_v49  ;;  %6483 = vmatprep.subr.bf16.mxu1 %v6482_v60  ;;  %s5098_s11 = sshll.u32 %s7477_s19, 4  ;;  %s5099_s11 = int_to_ptr.vmem [resolvable:$true] %s5098_s11 }
0x2851   :  { %v4810_v54 = vsub.f32 0.0, %v4806_v53  ;;  %6485 = vmatpush3.bf16.msra.mxu1 %v6482_v60  ;;  %s7330_s15 = scalar_lea.vmem %s5099_s11, 128  ;;  %p7335_p1 = scmp.lt.s32.totalorder %s5099_s11, %s5099_s11 }
0x2852   :  { %v4813_v56 = vsel %vm4809_vm1, %v4807_v49, %v4811_v12  ;;  %v6486_v49 = vpack.c.bf16 %v4956_v44, %v4955_v47  ;;  %p7331_p0 = scmp.ne.s32.totalorder %s5099_s11, %s7330_s15  ;;  %p7336_p2 = scmp.lt.s32.totalorder %s7330_s15, %s7330_s15 }
0x2853   :  { %v4817_v55 = vadd.f32 1.0, %v4813_v56  ;;  %v4812_v58 = vsel %vm4808_vm2, %v4806_v53, %v4810_v54 }
0x2854   :  { %v4816_v43 = vadd.f32 1.0, %v4812_v58  ;;  %6487 = vmatprep.subr.bf16.mxu1 %v6486_v49  ;;  %p7337_p3 = por %p7336_p2, %p7335_p1 }
0x2855   :  { %v4819_v2 = vmul.f32 %v4817_v55, %v4815_v62  ;;  %6489 = vmatpush3.bf16.msra.mxu1 %v6486_v49 }
0x2856   :  { %v4818_v1 = vmul.f32 %v4816_v43, %v4814_v61  ;;  %v5348_v43 = vld [vmem:[#allocation31] ss:$0 sm:$0xff]  ;;  %p7338_p4 = pnand %p7337_p3, %p7331_p0 }
0x2858   :  { %6121 = vmatprep.mubr.msk.f32.mxu0 %vm736_vm4, %v4818_v1 }
0x2859   :  { %6122 = vmatmul.mubr.msk.f32.vlgmr.msra.gmra.mrb[52].mxu0 %vm736_vm4, %v4819_v2 }
0x292c   :  { %v6123_v9 = vpop.f32.mrb[52].mxu0 }
0x292d   :  { %v4904_v10 = vadd.f32 %v6123_v9, %v5343_v5  ;;  %v4898_v11 = vpop.f32.mrb[53].mxu0 }
0x292e   :  { %v4899_v14 = vadd.f32 %v5343_v5, %v4898_v11  ;;  %v5349_v5 = vld [vmem:[#allocation32] ss:$0 sm:$0xff] }
0x292f   :  { %v4908_v57 = vadd.f32 %v4904_v10, %v8580_v4 }
0x2930   :  { %v4907_v16 = vadd.f32 %v4899_v14, %v8578_v7 }
0x2931   :  { %v4912_v17 = vsel %vm736_vm4, %v4908_v57, 0.0 }
0x2932   :  { %4913 = vadd.xlane.f32.xlu1 %v4912_v17  ;;  %v4909_v18 = vsel %vm736_vm4, %v4907_v16, 0.0 }
0x2933   :  { %4910 = vadd.xlane.f32.xlu0 %v4909_v18 }
0x29bf   :  { %v4914_v21 = vpop.xlane.xlu1 %4913 }
0x29c0   :  { %v4916_v22 = vmul.f32 0.03125, %v4914_v21  ;;  %v4911_v41 = vpop.xlane.xlu0 %4910 }
0x29c1   :  { %v4915_v28 = vmul.f32 0.03125, %v4911_v41 }
0x29c2   :  { %v4918_v23 = vsub.f32 %v4908_v57, %v4916_v22 }
0x29c3   :  { %v4917_v24 = vsub.f32 %v4907_v16, %v4915_v28 }
0x29c4   :  { %v4920_v33 = vmul.f32 %v4918_v23, %v4918_v23 }
0x29c5   :  { %v4919_v25 = vmul.f32 %v4917_v24, %v4917_v24 }
0x29c6   :  { %v4924_v26 = vsel %vm736_vm4, %v4920_v33, 0.0 }
0x29c7   :  { %4925 = vadd.xlane.f32.xlu1 %v4924_v26  ;;  %v4921_v4 = vsel %vm736_vm4, %v4919_v25, 0.0 }
0x29c8   :  { %4922 = vadd.xlane.f32.xlu0 %v4921_v4 }
0x2a54   :  { %v4926_v7 = vpop.xlane.xlu1 %4925 }
0x2a55   :  { %v4928_v39 = vmul.f32 0.03125, %v4926_v7  ;;  %v4923_v37 = vpop.xlane.xlu0 %4922 }
0x2a56   :  { %v4927_v27 = vmul.f32 0.03125, %v4923_v37 }
0x2a57   :  { %v4930_v29 = vadd.f32 1e-05, %v4928_v39 }
0x2a58   :  { %v4929_v8 = vadd.f32 1e-05, %v4927_v27 }
0x2a59   :  { %6860 = vrsqrt.f32 %v4930_v29 }
0x2a5a   :  { %6862 = vrsqrt.f32 %v4929_v8 }
0x2a63   :  { %v6861_v20 = vpop.eup %6860 }
0x2a64   :  { %v6863_v31 = vpop.eup %6862  ;;  %v4934_v35 = vmul.f32 %v6861_v20, %v4918_v23 }
0x2a65   :  { %v4933_v32 = vmul.f32 %v6863_v31, %v4917_v24 }
0x2a66   :  { %v4942_v34 = vmul.f32 %v5346_v30, %v4934_v35 }
0x2a67   :  { %v4941_v36 = vmul.f32 %v5346_v30, %v4933_v32 }
0x2a68   :  { %v4950_v38 = vadd.f32 %v5347_v19, %v4942_v34 }
0x2a69   :  { %v4949_v40 = vadd.f32 %v5347_v19, %v4941_v36 }
0x2a6a   :  { %v4961_v42 = vsel %vm736_vm4, %v4950_v38, 0.0 }
0x2a6b   :  { %4962 = vadd.xlane.f32.xlu1 %v4961_v42  ;;  %v4958_v45 = vsel %vm736_vm4, %v4949_v40, 0.0 }
0x2a6c   :  { %4959 = vadd.xlane.f32.xlu0 %v4958_v45 }
0x2af8   :  { %v4963_v6 = vpop.xlane.xlu1 %4962 }
0x2af9   :  { %v4965_v46 = vmul.f32 0.03125, %v4963_v6  ;;  %v4960_v48 = vpop.xlane.xlu0 %4959 }
0x2afa   :  { %v4964_v59 = vmul.f32 0.03125, %v4960_v48 }
0x2afb   :  { %v4967_v51 = vsub.f32 %v4950_v38, %v4965_v46 }
0x2afc   :  { %v4966_v63 = vsub.f32 %v4949_v40, %v4964_v59 }
0x2afd   :  { %v4969_v0 = vmul.f32 %v4967_v51, %v4967_v51 }
0x2afe   :  { %v4968_v3 = vmul.f32 %v4966_v63, %v4966_v63 }
0x2aff   :  { %v4973_v13 = vsel %vm736_vm4, %v4969_v0, 0.0 }
0x2b00   :  { %4974 = vadd.xlane.f32.xlu1 %v4973_v13  ;;  %v4970_v15 = vsel %vm736_vm4, %v4968_v3, 0.0 }
0x2b01   :  { %4971 = vadd.xlane.f32.xlu0 %v4970_v15 }
0x2b8d   :  { %v4975_v53 = vpop.xlane.xlu1 %4974 }
0x2b8e   :  { %v4977_v12 = vmul.f32 0.03125, %v4975_v53  ;;  %v4972_v54 = vpop.xlane.xlu0 %4971 }
0x2b8f   :  { %v4976_v56 = vmul.f32 0.03125, %v4972_v54 }
0x2b90   :  { %v4979_v55 = vadd.f32 1e-05, %v4977_v12 }
0x2b91   :  { %v4978_v58 = vadd.f32 1e-05, %v4976_v56 }
0x2b92   :  { %6864 = vrsqrt.f32 %v4979_v55 }
0x2b93   :  { %6866 = vrsqrt.f32 %v4978_v58 }
0x2b9c   :  { %v6865_v61 = vpop.eup %6864 }
0x2b9d   :  { %v6867_v62 = vpop.eup %6866  ;;  %v4983_v1 = vmul.f32 %v6865_v61, %v4967_v51 }
0x2b9e   :  { %v4982_v2 = vmul.f32 %v6867_v62, %v4966_v63 }
0x2b9f   :  { %v4991_v9 = vmul.f32 %v5348_v43, %v4983_v1 }
0x2ba0   :  { %v4990_v10 = vmul.f32 %v5348_v43, %v4982_v2 }
0x2ba1   :  { %v4999_v14 = vadd.f32 %v5349_v5, %v4991_v9 }
0x2ba2   :  { %v4998_v11 = vadd.f32 %v5349_v5, %v4990_v10 }
0x2ba4   :  { %6132 = vmatprep.mubr.msk.f32.mxu1 %vm736_vm4, %v4998_v11 }
0x2ba5   :  { %6133 = vmatmul.mubr.msk.f32.vlgmr.msra.gmra.mrb[56].mxu1 %vm736_vm4, %v4999_v14 }
0x2ba6   :  { %7341 = shalt.err (!%p7338_p4)
}
0x2ba7   :  { %s7342_s30 = scalar_lea.hbm %s7821_s29, 128 }
0x2ba8   :  { %p7343_p5 = scmp.ne.s32.totalorder %s7821_s29, %s7342_s30  ;;  %p7346_p6 = scmp.lt.u32.totalorder %s7342_s30, %s7821_s29 }
0x2baa   :  { %p7348_p7 = pnand %p7346_p6, %p7343_p5 }
0x2bac   :  { %7351 = shalt.err (!%p7348_p7)
}
0x2bad   :  { %5101 = dma.vmem_to_hbm [thread:$0]  %s5099_s11, 128, %s7821_s29, [#allocation4]   ;;  %v5350_v57 = vld [vmem:[#allocation34] ss:$0 sm:$0xff]  ;;  %vm5087_vm3 = vcmask 31744  }
0x2c78   :  { %v6134_v16 = vpop.f32.mrb[56].mxu1 }
0x2c79   :  { %v5084_v17 = vadd.f32 %v6134_v16, %v5350_v57  ;;  %v5078_v18 = vpop.f32.mrb[57].mxu1 }
0x2c7a   :  { %v5079_v21 = vadd.f32 %v5350_v57, %v5078_v18 }
0x2c7b   :  { %5089 = vst.msk [vmem:[%s7816_s5 + $0x8] sm:$0xff] %vm5087_vm3, %v5084_v17 }
0x2c7c   :  { %5088 = vst.msk [vmem:[%s7816_s5] sm:$0xff] %vm5087_vm3, %v5079_v21 }
0x2c7d   :  { %7374 = dma.done.wait [#allocation4], 128  }
0x2c7e   :  { %7375 = vsyncadd [#allocation4], 4294967168 }
0x2c7f   :  { %5107 = vsyncpa [#allocation3], 1 }
0x2c80   :  { %5108 = vsyncpa [#allocation6], 1 }
0x2c81   :  { %5109 = vsyncpa [#allocation9], 1 }
0x2c82   :  { %5110 = vsyncpa [#allocation12], 1 }
0x2c83   :  { %5111 = vsyncpa [#allocation15], 1 }
0x2c84   :  { %5112 = vsyncpa [#allocation18], 1 }
0x2c85   :  { %5113 = vsyncpa [#allocation21], 1 }
0x2c86   :  { %5114 = vsyncpa [#allocation24], 1 }
0x2c87   :  { %5115 = vsyncpa [#allocation27], 1 }
0x2c88   :  { %5116 = vsyncpa [#allocation30], 1 }
0x2c89   :  { %5117 = vsyncpa [#allocation33], 1 }
0x2c8a   :  { %5118 = vsyncpa [#allocation4], 1 }

</bundles_post_ra>
